<compile_context>
chip_gen: v5e
topology: v5e:2x2
jax: 0.10.0
libtpu: 0.0.40
codegen_flags: <defaults>
</compile_context>

<pallas_src>
import math
from functools import partial

import jax
import jax.numpy as jnp
from jax.experimental import pallas as pl
from jax.experimental.pallas import tpu as pltpu

_EPS = 1e-5                      # torch.nn.BatchNorm2d default eps
_LANE = 128                      # TPU lane width
_BN_TILE_ROWS = 512              # row tile for the BN stats reduction
_VMEM_LIMIT = 48 * 1024 * 1024   # explicit scoped-VMEM limit (headroom on v7x's 64 MiB)

_TAPS_3X3 = tuple((kh, kw) for kh in range(3) for kw in range(3))
_TAP_1X1 = ((1, 1),)             # a 1x1/stride-s conv == the centre tap of the same machinery


def _rup(x, m):
    return (x + m - 1) // m * m


def _pad_last(x, target):
    c = x.shape[-1]
    if c == target:
        return x
    return jnp.pad(x, [(0, 0)] * (x.ndim - 1) + [(0, target - c)])


def _pack_weights(w, cinp, coutp):
    """(T, cin, cout) f32 -> (T, cinp, coutp) bf16 with zero-padded channels (MXU operands)."""
    t, cin, cout = w.shape
    w = jnp.pad(w, ((0, 0), (0, cinp - cin), (0, coutp - cout)))
    return w.astype(jnp.bfloat16)


def _fold_bn(s1, s2, count, gamma, beta):
    """Fold (sum, sum_sq, count) batch stats + affine params into per-channel scale/bias."""
    c = s1.shape[-1]
    mean = s1.reshape(1, c) / count
    var = jnp.maximum(s2.reshape(1, c) / count - mean * mean, 0.0)   # clamp tiny negative cancel
    inv = jax.lax.rsqrt(var + _EPS)
    scale = gamma.reshape(1, c) * inv
    bias = beta.reshape(1, c) - mean * scale
    return scale.reshape(1, 1, c), bias.reshape(1, 1, c)


# ---------------------------------------------------------------------------
# Kernel 1: tiled BatchNorm statistics for bn1 (global reduction across the row-tile grid)
# ---------------------------------------------------------------------------
def _bn_stats_kernel(x_ref, sum_ref, sq_ref):
    @pl.when(pl.program_id(0) == 0)
    def _():
        sum_ref[...] = jnp.zeros_like(sum_ref)
        sq_ref[...] = jnp.zeros_like(sq_ref)

    x = x_ref[...].astype(jnp.float32)
    sum_ref[...] += jnp.sum(x, axis=0, keepdims=True)
    sq_ref[...] += jnp.sum(x * x, axis=0, keepdims=True)


def _bn_scale_bias(x, gamma, beta):
    """Training-mode (biased) batch stats over the full N*H*W extent, folded to scale/bias."""
    n, h, w, cp = x.shape
    m = n * h * w
    x2 = x.reshape(m, cp)
    tr = _BN_TILE_ROWS if m >= _BN_TILE_ROWS else _rup(m, 8)
    mp = _rup(m, tr)
    if mp != m:
        x2 = jnp.pad(x2, ((0, mp - m), (0, 0)))     # zero rows do not change the sums
    s1, s2 = pl.pallas_call(
        _bn_stats_kernel,
        out_shape=(jax.ShapeDtypeStruct((1, cp), jnp.float32),
                   jax.ShapeDtypeStruct((1, cp), jnp.float32)),
        grid=(mp // tr,),
        in_specs=[pl.BlockSpec((tr, cp), lambda i: (i, 0))],
        out_specs=(pl.BlockSpec((1, cp), lambda i: (0, 0)),
                   pl.BlockSpec((1, cp), lambda i: (0, 0))),
        compiler_params=pltpu.CompilerParams(
            dimension_semantics=("arbitrary",), vmem_limit_bytes=_VMEM_LIMIT),
    )(x2)
    return _fold_bn(s1, s2, m, gamma, beta)


# ---------------------------------------------------------------------------
# Kernel 2: fused BN-apply + ReLU + (3x3 or 1x1, stride 1 or 2) conv
#           + optional residual add + optional fused next-BN statistics
# ---------------------------------------------------------------------------
def _phase_split_flatten(xp, s):
    """(N, Hp, Wp, C) -> (N, s*s, (Hp//s)*(Wp//s), C) with phase (p, q)[a, b] = xp[s*a+p, s*b+q]."""
    n, hp, wp, c = xp.shape
    hph, wph = hp // s, wp // s
    x6 = xp.reshape(n, hph, s, wph, s, c)
    x6 = jnp.transpose(x6, (0, 2, 4, 1, 3, 5))
    return x6.reshape(n, s * s, hph * wph, c), hph, wph


def _conv_prep(x_raw, stride):
    """Zero-pad (halo 1 + slack rows), phase-split for the stride, flatten rows for the MXU."""
    n, h, w, c = x_raw.shape
    s = stride
    assert s in (1, 2) and h % s == 0 and w % s == 0
    hp, wp = h + 4, w + 2
    xp = jnp.pad(x_raw, ((0, 0), (1, hp - h - 1), (1, wp - w - 1), (0, 0)))
    xph, hph, wph = _phase_split_flatten(xp, s)

    # Validity mask (1 inside the original HxW window). It is applied *after* BN+ReLU inside
    # the conv kernel because BN of the zero halo is not zero.
    r = jnp.arange(hp)[:, None]
    cc = jnp.arange(wp)[None, :]
    mfull = ((r >= 1) & (r <= h) & (cc >= 1) & (cc <= w)).astype(jnp.float32)
    mph, _, _ = _phase_split_flatten(mfull[None, :, :, None], s)
    mask = mph[0]                                    # (s*s, Fph, 1)

    ho, wo = (h - 1) // s + 1, (w - 1) // s + 1
    geom = dict(s=s, P=s * s, Wph=wph, Fph=hph * wph, Ho=ho, Wo=wo, Lout=ho * wph)
    return xph, mask, geom


def _flatten_padded_rows(t, pitch):
    """(N, Ho, Wo, C) -> (N, Ho*pitch, C): residual laid out in the conv output's flat pitch."""
    n, ho, wo, c = t.shape
    t = jnp.pad(t, ((0, 0), (0, 0), (0, pitch - wo), (0, 0)))
    return t.reshape(n, ho * pitch, c)


def _make_conv_kernel(taps, s, wph, lout, add_shortcut, with_stats, ct):
    def kernel(*refs):
        it = iter(refs)
        x_ref = next(it)
        m_ref = next(it)
        sc_ref = next(it)
        bi_ref = next(it)
        w_ref = next(it)
        om_ref = next(it) if with_stats else None
        sh_ref = next(it) if add_shortcut else None
        o_ref = next(it)
        if with_stats:
            sum_ref = next(it)
            sq_ref = next(it)
        a_ref = next(it)

        # Fused BatchNorm-apply + ReLU + halo masking, computed once per batch element and
        # kept in a bf16 VMEM scratch that is reused across the cout-tile grid axis.
        @pl.when(pl.program_id(1) == 0)
        def _():
            a = x_ref[0] * sc_ref[...] + bi_ref[...]
            a = jnp.maximum(a, 0.0) * m_ref[...]
            a_ref[...] = a.astype(a_ref.dtype)

        # Each tap is a plain 2-D (rows, Cin) x (Cin, CT) MXU matmul: the phase decomposition
        # turns both the spatial shift and the stride into a static row offset -> no reshapes,
        # no strided loads on the MXU input path. First tap initializes the accumulator.
        def tap_slab(kh, kw):
            ph = (kh % s) * s + (kw % s)
            base = (kh // s) * wph + (kw // s)
            return a_ref[ph, pl.ds(base, lout), :]

        kh0, kw0 = taps[0]
        acc = jnp.dot(tap_slab(kh0, kw0), w_ref[0], preferred_element_type=jnp.float32)
        for t in range(1, len(taps)):
            kh, kw = taps[t]
            acc = acc + jnp.dot(tap_slab(kh, kw), w_ref[t],
                                preferred_element_type=jnp.float32)

        if add_shortcut:
            acc = acc + sh_ref[0]
        o_ref[0] = acc.astype(o_ref.dtype)

        if with_stats:
            # Fused next-BN statistics: per-batch partial per-channel sum / sum-of-squares over
            # the valid output columns (junk pitch columns masked out). Each cout tile writes a
            # disjoint lane slice of the per-batch row, so the batch axis stays megacore-safe.
            valid = acc * om_ref[...]
            off = pl.multiple_of(pl.program_id(1) * ct, _LANE)
            sum_ref[0, :, pl.ds(off, ct)] = jnp.sum(valid, axis=0, keepdims=True)
            sq_ref[0, :, pl.ds(off, ct)] = jnp.sum(valid * valid, axis=0, keepdims=True)

    return kernel


def _conv_fused(xph, mask, scale, bias, w_taps, taps, geom,
                shortcut_flat=None, with_stats=False):
    n, p, fph, cinp = xph.shape
    wph, lout, s, wo = geom["Wph"], geom["Lout"], geom["s"], geom["Wo"]
    t, _, coutp = w_taps.shape
    assert t == len(taps)
    assert max((kh // s) * wph + (kw // s) for kh, kw in taps) + lout <= fph

    ct = 256 if coutp % 256 == 0 else 128            # cout tile bounds the f32 accumulator / VMEM
    add_shortcut = shortcut_flat is not None
    kernel = _make_conv_kernel(taps, s, wph, lout, add_shortcut, with_stats, ct)

    in_specs = [
        pl.BlockSpec((1, p, fph, cinp), lambda i, j: (i, 0, 0, 0)),
        pl.BlockSpec((p, fph, 1), lambda i, j: (0, 0, 0)),
        pl.BlockSpec((1, 1, cinp), lambda i, j: (0, 0, 0)),
        pl.BlockSpec((1, 1, cinp), lambda i, j: (0, 0, 0)),
        pl.BlockSpec((t, cinp, ct), lambda i, j: (0, 0, j)),
    ]
    args = [xph, mask, scale, bias, w_taps]
    if with_stats:
        # 1 where a flat output position lands inside the real Wo columns (the flat layout keeps
        # Wph-Wo junk pitch columns per output row which must not pollute the statistics).
        omask = (jnp.arange(lout, dtype=jnp.int32).reshape(lout, 1) % wph < wo)
        in_specs.append(pl.BlockSpec((lout, 1), lambda i, j: (0, 0)))
        args.append(omask.astype(jnp.float32))
    if add_shortcut:
        in_specs.append(pl.BlockSpec((1, lout, ct), lambda i, j: (i, 0, j)))
        args.append(shortcut_flat)

    out_shapes = [jax.ShapeDtypeStruct((n, lout, coutp), jnp.float32)]
    out_specs = [pl.BlockSpec((1, lout, ct), lambda i, j: (i, 0, j))]
    if with_stats:
        out_shapes += [jax.ShapeDtypeStruct((n, 1, coutp), jnp.float32)] * 2
        out_specs += [pl.BlockSpec((1, 1, coutp), lambda i, j: (i, 0, 0))] * 2

    if with_stats:
        out_shape_arg, out_spec_arg = tuple(out_shapes), tuple(out_specs)
    else:
        out_shape_arg, out_spec_arg = out_shapes[0], out_specs[0]

    result = pl.pallas_call(
        kernel,
        out_shape=out_shape_arg,
        grid=(n, coutp // ct),
        in_specs=in_specs,
        out_specs=out_spec_arg,
        scratch_shapes=[pltpu.VMEM((p, fph, cinp), jnp.bfloat16)],
        compiler_params=pltpu.CompilerParams(
            dimension_semantics=("parallel", "arbitrary"),   # batch across v7x cores, cout serial
            vmem_limit_bytes=_VMEM_LIMIT),
    )(*args)

    if with_stats:
        out_flat, psum, psq = result
    else:
        out_flat, psum, psq = result, None, None

    # Drop the small junk pitch columns (flat layout keeps the kernel store lane-dense).
    out = out_flat.reshape(n, geom["Ho"], wph, coutp)[:, :, :wo, :]
    return out, psum, psq


# ---------------------------------------------------------------------------
# BasicBlock forward
# ---------------------------------------------------------------------------
@partial(jax.jit, static_argnames=("stride", "equal_in_out"))
def basic_block_forward(x_nchw, params, stride, equal_in_out):
    """WideResNet BasicBlock forward (training-mode BN, drop_rate == 0)."""
    x = jnp.transpose(x_nchw, (0, 2, 3, 1)).astype(jnp.float32)     # NCHW -> NHWC
    n, h, w, cin = x.shape
    cout = params["conv1_w"].shape[-1]
    cinp, coutp = _rup(cin, _LANE), _rup(cout, _LANE)

    x_p = _pad_last(x, cinp)                                        # lane-dense channels
    g1 = _pad_last(params["bn1_gamma"].reshape(1, 1, cin), cinp)
    b1 = _pad_last(params["bn1_beta"].reshape(1, 1, cin), cinp)
    g2 = _pad_last(params["bn2_gamma"].reshape(1, 1, cout), coutp)
    b2 = _pad_last(params["bn2_beta"].reshape(1, 1, cout), coutp)
    w1 = _pack_weights(params["conv1_w"], cinp, coutp)
    w2 = _pack_weights(params["conv2_w"], coutp, coutp)
    wsc = _pack_weights(params["convsc_w"].reshape(1, cin, cout), cinp, coutp)

    # relu1(bn1(x)) -> conv1 : stats kernel + fused apply-inside-conv (stride computed directly).
    # conv1 also emits bn2's batch statistics as fused side outputs -> no extra HBM pass on out1.
    scale1, bias1 = _bn_scale_bias(x_p, g1, b1)
    xph1, mask1, geo1 = _conv_prep(x_p, stride)
    # TODO(synk): the zero-pad + phase-split repack is still a wrapper-level XLA pass; fusing it
    # into the producing kernel's out_spec (offset writes) would remove one more HBM round trip.
    out1, psum1, psq1 = _conv_fused(xph1, mask1, scale1, bias1, w1, _TAPS_3X3, geo1,
                                    with_stats=True)                # (N, Ho, Wo, Coutp)

    # TODO(synk): F.dropout not implemented (drop_rate defaults to 0.0 -> identity).

    # relu2(bn2(out1)) -> conv2, with the residual add fused into the conv kernel.
    count1 = n * geo1["Ho"] * geo1["Wo"]
    scale2, bias2 = _fold_bn(psum1.sum(axis=0), psq1.sum(axis=0), count1, g2, b2)
    xph2, mask2, geo2 = _conv_prep(out1, 1)

    if equal_in_out:
        shortcut = x_p                                            # identity shortcut (stride == 1)
    else:
        # convShortcut(relu1(bn1(x))): same fused kernel, single centre tap, same stride phases.
        shortcut, _, _ = _conv_fused(xph1, mask1, scale1, bias1, wsc, _TAP_1X1, geo1)
    shortcut_flat = _flatten_padded_rows(shortcut, geo2["Wph"])

    out2, _, _ = _conv_fused(xph2, mask2, scale2, bias2, w2, _TAPS_3X3, geo2,
                             shortcut_flat=shortcut_flat)           # (N, Ho, Wo, Coutp)

    out = out2[..., :cout]
    return jnp.transpose(out, (0, 3, 1, 2))                       # NHWC -> NCHW


# ---------------------------------------------------------------------------
# Deterministic parameter init + pure-JAX reference for validation
# ---------------------------------------------------------------------------
def init_params(key, in_planes, out_planes):
    ks = jax.random.split(key, 7)

    def conv_w(k, cin, cout, ksize):
        wgt = jax.random.normal(k, (cout, cin, ksize, ksize), jnp.float32)
        wgt = wgt * (1.0 / math.sqrt(ksize * ksize * cin))
        # PyTorch OIHW -> (kh*kw, cin, cout)
        return jnp.transpose(wgt, (2, 3, 1, 0)).reshape(ksize * ksize, cin, cout)

    return {
        "bn1_gamma": 1.0 + 0.1 * jax.random.normal(ks[0], (in_planes,), jnp.float32),
        "bn1_beta": 0.1 * jax.random.normal(ks[1], (in_planes,), jnp.float32),
        "conv1_w": conv_w(ks[2], in_planes, out_planes, 3),
        "bn2_gamma": 1.0 + 0.1 * jax.random.normal(ks[3], (out_planes,), jnp.float32),
        "bn2_beta": 0.1 * jax.random.normal(ks[4], (out_planes,), jnp.float32),
        "conv2_w": conv_w(ks[5], out_planes, out_planes, 3),
        "convsc_w": conv_w(ks[6], in_planes, out_planes, 1).reshape(in_planes, out_planes),
    }


def _reference_forward(x_nchw, params, stride, equal_in_out):
    x = jnp.transpose(x_nchw, (0, 2, 3, 1))

    def bn_relu_ref(v, g, b):
        m = jnp.mean(v, axis=(0, 1, 2), keepdims=True)
        var = jnp.mean(v * v, axis=(0, 1, 2), keepdims=True) - m * m
        return jnp.maximum((v - m) * jax.lax.rsqrt(var + _EPS) * g + b, 0.0)

    def conv_ref(v, wgt, s, k):
        cin, cout = wgt.shape[-2], wgt.shape[-1]
        w4 = wgt.reshape(k, k, cin, cout).astype(jnp.bfloat16).astype(jnp.float32)
        vq = v.astype(jnp.bfloat16).astype(jnp.float32)     # mirror the kernel's bf16 MXU inputs
        p = (k - 1) // 2
        return jax.lax.conv_general_dilated(
            vq, w4, (s, s), [(p, p), (p, p)],
            dimension_numbers=("NHWC", "HWIO", "NHWC"))

    a1 = bn_relu_ref(x, params["bn1_gamma"], params["bn1_beta"])
    out = conv_ref(a1, params["conv1_w"], stride, 3)
    a2 = bn_relu_ref(out, params["bn2_gamma"], params["bn2_beta"])
    out = conv_ref(a2, params["conv2_w"], 1, 3)
    sh = x if equal_in_out else conv_ref(a1, params["convsc_w"], stride, 1)
    return jnp.transpose(sh + out, (0, 3, 1, 2))


if __name__ == "__main__":
    key = jax.random.PRNGKey(0)
    n, h, w = 2, 16, 16
    configs = [
        (4, 8, 2),   # not equalInOut -> convShortcut branch, strided conv
        (8, 8, 1),   # equalInOut -> identity shortcut, stride 1
    ]
    for in_planes, out_planes, stride in configs:
        kx, kp, key = jax.random.split(key, 3)
        x = jax.random.normal(kx, (n, in_planes, h, w), jnp.float32)
        params = init_params(kp, in_planes, out_planes)
        equal = in_planes == out_planes

        y = basic_block_forward(x, params, stride=stride, equal_in_out=equal)
        jax.block_until_ready(y)

        ho, wo = (h - 1) // stride + 1, (w - 1) // stride + 1
        assert y.shape == (n, out_planes, ho, wo), y.shape

        y_ref = _reference_forward(x, params, stride, equal)
        max_err = float(jnp.max(jnp.abs(y - y_ref)))
        assert jnp.allclose(y, y_ref, rtol=1e-2, atol=1e-2), (in_planes, out_planes, stride, max_err)

    print("KERNEL_OK")
</pallas_src>

<mosaic_0001>
module attributes {stable_mosaic.version = 11 : i64} {
  func.func @_bn_stats_kernel(%arg0: i32, %arg1: memref<512x128xf32, #tpu.memory_space<vmem>>, %arg2: memref<1x128xf32, #tpu.memory_space<vmem>>, %arg3: memref<1x128xf32, #tpu.memory_space<vmem>>) attributes {dimension_semantics = [#tpu.dimension_semantics<arbitrary>], iteration_bounds = array<i64: 1>, scalar_prefetch = 0 : i64, scratch_operands = 0 : i64, tpu.core_type = #tpu.core_type<tc>, window_params = [{transform_indices = @transform_0, window_bounds = array<i64: 512, 128>}, {pipeline_mode = #tpu.pipeline_mode<synchronous>, transform_indices = @transform_1, window_bounds = array<i64: 1, 128>}, {pipeline_mode = #tpu.pipeline_mode<synchronous>, transform_indices = @transform_2, window_bounds = array<i64: 1, 128>}]} {
    %c0_i32 = arith.constant 0 : i32
    %0 = arith.cmpi eq, %arg0, %c0_i32 : i32
    %1 = arith.extui %0 : i1 to i32
    %c0_i32_0 = arith.constant 0 : i32
    %2 = arith.cmpi ne, %1, %c0_i32_0 : i32
    scf.if %2 {
      %cst_11 = arith.constant 0.000000e+00 : f32
      %15 = vector.broadcast %cst_11 : f32 to vector<1x128xf32>
      %c0_12 = arith.constant 0 : index
      %c0_13 = arith.constant 0 : index
      %16 = vector.load %arg2[%c0_12, %c0_13] : memref<1x128xf32, #tpu.memory_space<vmem>>, vector<1x128xf32>
      tpu.vector_store %arg2[%c0_12, %c0_13], %15 {strides = array<i32>} : memref<1x128xf32, #tpu.memory_space<vmem>>, vector<1x128xf32>,
      %cst_14 = arith.constant 0.000000e+00 : f32
      %17 = vector.broadcast %cst_14 : f32 to vector<1x128xf32>
      %c0_15 = arith.constant 0 : index
      %c0_16 = arith.constant 0 : index
      %18 = vector.load %arg3[%c0_15, %c0_16] : memref<1x128xf32, #tpu.memory_space<vmem>>, vector<1x128xf32>
      tpu.vector_store %arg3[%c0_15, %c0_16], %17 {strides = array<i32>} : memref<1x128xf32, #tpu.memory_space<vmem>>, vector<1x128xf32>,
    } else {
    }
    %c0 = arith.constant 0 : index
    %c0_1 = arith.constant 0 : index
    %3 = vector.load %arg1[%c0, %c0_1] : memref<512x128xf32, #tpu.memory_space<vmem>>, vector<512x128xf32>
    %c0_2 = arith.constant 0 : index
    %c0_3 = arith.constant 0 : index
    %4 = vector.load %arg2[%c0_2, %c0_3] : memref<1x128xf32, #tpu.memory_space<vmem>>, vector<1x128xf32>
    %cst = arith.constant dense<0.000000e+00> : vector<128xf32>
    %5 = vector.multi_reduction <add>, %3, %cst [0] : vector<512x128xf32> to vector<128xf32>
    %6 = vector.shape_cast %5 : vector<128xf32> to vector<1x128xf32>
    %7 = arith.addf %4, %6 : vector<1x128xf32>
    %c0_4 = arith.constant 0 : index
    %c0_5 = arith.constant 0 : index
    %8 = vector.load %arg2[%c0_4, %c0_5] : memref<1x128xf32, #tpu.memory_space<vmem>>, vector<1x128xf32>
    tpu.vector_store %arg2[%c0_4, %c0_5], %7 {strides = array<i32>} : memref<1x128xf32, #tpu.memory_space<vmem>>, vector<1x128xf32>,
    %c0_6 = arith.constant 0 : index
    %c0_7 = arith.constant 0 : index
    %9 = vector.load %arg3[%c0_6, %c0_7] : memref<1x128xf32, #tpu.memory_space<vmem>>, vector<1x128xf32>
    %10 = arith.mulf %3, %3 : vector<512x128xf32>
    %cst_8 = arith.constant dense<0.000000e+00> : vector<128xf32>
    %11 = vector.multi_reduction <add>, %10, %cst_8 [0] : vector<512x128xf32> to vector<128xf32>
    %12 = vector.shape_cast %11 : vector<128xf32> to vector<1x128xf32>
    %13 = arith.addf %9, %12 : vector<1x128xf32>
    %c0_9 = arith.constant 0 : index
    %c0_10 = arith.constant 0 : index
    %14 = vector.load %arg3[%c0_9, %c0_10] : memref<1x128xf32, #tpu.memory_space<vmem>>, vector<1x128xf32>
    tpu.vector_store %arg3[%c0_9, %c0_10], %13 {strides = array<i32>} : memref<1x128xf32, #tpu.memory_space<vmem>>, vector<1x128xf32>,
    return
  }
  func.func @transform_0(%arg0: i32) -> (i32, i32) {
    %c0_i32 = arith.constant 0 : i32
    %c0_i32_0 = arith.constant 0 : i32
    return %arg0, %c0_i32 : i32, i32
  }
  func.func @transform_1(%arg0: i32) -> (i32, i32) {
    %c0_i32 = arith.constant 0 : i32
    %c0_i32_0 = arith.constant 0 : i32
    %c0_i32_1 = arith.constant 0 : i32
    return %c0_i32, %c0_i32_0 : i32, i32
  }
  func.func @transform_2(%arg0: i32) -> (i32, i32) {
    %c0_i32 = arith.constant 0 : i32
    %c0_i32_0 = arith.constant 0 : i32
    %c0_i32_1 = arith.constant 0 : i32
    return %c0_i32, %c0_i32_0 : i32, i32
  }
}

module attributes {stable_mosaic.version = 11 : i64} {
  func.func @kernel(%arg0: i32, %arg1: i32, %arg2: memref<1x4x90x128xf32, #tpu.memory_space<vmem>>, %arg3: memref<4x90x1xf32, #tpu.memory_space<vmem>>, %arg4: memref<1x1x128xf32, #tpu.memory_space<vmem>>, %arg5: memref<1x1x128xf32, #tpu.memory_space<vmem>>, %arg6: memref<9x128x128xbf16, #tpu.memory_space<vmem>>, %arg7: memref<72x1xf32, #tpu.memory_space<vmem>>, %arg8: memref<1x72x128xf32, #tpu.memory_space<vmem>>, %arg9: memref<1x1x128xf32, #tpu.memory_space<vmem>>, %arg10: memref<1x1x128xf32, #tpu.memory_space<vmem>>, %arg11: memref<4x90x128xbf16, #tpu.memory_space<vmem>>) attributes {dimension_semantics = [#tpu.dimension_semantics<parallel>, #tpu.dimension_semantics<arbitrary>], iteration_bounds = array<i64: 2, 1>, scalar_prefetch = 0 : i64, scratch_operands = 1 : i64, tpu.core_type = #tpu.core_type<tc>, window_params = [{transform_indices = @transform_0, window_bounds = array<i64: 1, 4, 90, 128>}, {pipeline_mode = #tpu.pipeline_mode<synchronous>, transform_indices = @transform_1, window_bounds = array<i64: 4, 90, 1>}, {pipeline_mode = #tpu.pipeline_mode<synchronous>, transform_indices = @transform_2, window_bounds = array<i64: 1, 1, 128>}, {pipeline_mode = #tpu.pipeline_mode<synchronous>, transform_indices = @transform_3, window_bounds = array<i64: 1, 1, 128>}, {transform_indices = @transform_4, window_bounds = array<i64: 9, 128, 128>}, {pipeline_mode = #tpu.pipeline_mode<synchronous>, transform_indices = @transform_5, window_bounds = array<i64: 72, 1>}, {transform_indices = @transform_6, window_bounds = array<i64: 1, 72, 128>}, {transform_indices = @transform_7, window_bounds = array<i64: 1, 1, 128>}, {transform_indices = @transform_8, window_bounds = array<i64: 1, 1, 128>}]} {
    %c0_i32 = arith.constant 0 : i32
    %0 = arith.cmpi eq, %arg1, %c0_i32 : i32
    %1 = arith.extui %0 : i1 to i32
    %c0_i32_0 = arith.constant 0 : i32
    %2 = arith.cmpi ne, %1, %c0_i32_0 : i32
    scf.if %2 {
      %c0_63 = arith.constant 0 : index
      %c0_64 = arith.constant 0 : index
      %c0_65 = arith.constant 0 : index
      %c0_66 = arith.constant 0 : index
      %77 = vector.load %arg2[%c0_63, %c0_64, %c0_65, %c0_66] : memref<1x4x90x128xf32, #tpu.memory_space<vmem>>, vector<1x4x90x128xf32>
      %78 = vector.shape_cast %77 : vector<1x4x90x128xf32> to vector<4x90x128xf32>
      %c0_67 = arith.constant 0 : index
      %c0_68 = arith.constant 0 : index
      %c0_69 = arith.constant 0 : index
      %79 = vector.load %arg4[%c0_67, %c0_68, %c0_69] : memref<1x1x128xf32, #tpu.memory_space<vmem>>, vector<1x1x128xf32>
      %80 = vector.broadcast %79 : vector<1x1x128xf32> to vector<4x90x128xf32>
      %81 = arith.mulf %78, %80 : vector<4x90x128xf32>
      %c0_70 = arith.constant 0 : index
      %c0_71 = arith.constant 0 : index
      %c0_72 = arith.constant 0 : index
      %82 = vector.load %arg5[%c0_70, %c0_71, %c0_72] : memref<1x1x128xf32, #tpu.memory_space<vmem>>, vector<1x1x128xf32>
      %83 = vector.broadcast %82 : vector<1x1x128xf32> to vector<4x90x128xf32>
      %84 = arith.addf %81, %83 : vector<4x90x128xf32>
      %cst_73 = arith.constant 0.000000e+00 : f32
      %85 = vector.broadcast %cst_73 : f32 to vector<4x90x128xf32>
      %86 = arith.maximumf %84, %85 : vector<4x90x128xf32>
      %c0_74 = arith.constant 0 : index
      %c0_75 = arith.constant 0 : index
      %c0_76 = arith.constant 0 : index
      %87 = vector.load %arg3[%c0_74, %c0_75, %c0_76] : memref<4x90x1xf32, #tpu.memory_space<vmem>>, vector<4x90x1xf32>
      %88 = vector.broadcast %87 : vector<4x90x1xf32> to vector<4x90x128xf32>
      %89 = arith.mulf %86, %88 : vector<4x90x128xf32>
      %90 = arith.truncf %89 : vector<4x90x128xf32> to vector<4x90x128xbf16>
      %c0_77 = arith.constant 0 : index
      %c0_78 = arith.constant 0 : index
      %c0_79 = arith.constant 0 : index
      %91 = vector.load %arg11[%c0_77, %c0_78, %c0_79] : memref<4x90x128xbf16, #tpu.memory_space<vmem>>, vector<4x90x128xbf16>
      tpu.vector_store %arg11[%c0_77, %c0_78, %c0_79], %90 {strides = array<i32>} : memref<4x90x128xbf16, #tpu.memory_space<vmem>>, vector<4x90x128xbf16>,
    } else {
    }
    %c0 = arith.constant 0 : index
    %c0_1 = arith.constant 0 : index
    %c0_2 = arith.constant 0 : index
    %3 = vector.load %arg11[%c0, %c0_1, %c0_2] : memref<4x90x128xbf16, #tpu.memory_space<vmem>>, vector<1x72x128xbf16>
    %4 = vector.shape_cast %3 : vector<1x72x128xbf16> to vector<72x128xbf16>
    %c0_3 = arith.constant 0 : index
    %c0_4 = arith.constant 0 : index
    %c0_5 = arith.constant 0 : index
    %5 = vector.load %arg6[%c0_3, %c0_4, %c0_5] : memref<9x128x128xbf16, #tpu.memory_space<vmem>>, vector<1x128x128xbf16>
    %6 = vector.shape_cast %5 : vector<1x128x128xbf16> to vector<128x128xbf16>
    %cst = arith.constant dense<0.000000e+00> : vector<72x128xf32>
    %7 = tpu.matmul %4, %6, %cst {dimension_numbers = #tpu.dot_dimension_numbers<[1], [0], [0], [1], [0, 0, 1, 1], [], []>} : vector<72x128xbf16>, vector<128x128xbf16>, vector<72x128xf32> -> vector<72x128xf32>
    %c1 = arith.constant 1 : index
    %c0_6 = arith.constant 0 : index
    %c0_7 = arith.constant 0 : index
    %8 = vector.load %arg11[%c1, %c0_6, %c0_7] : memref<4x90x128xbf16, #tpu.memory_space<vmem>>, vector<1x72x128xbf16>
    %9 = vector.shape_cast %8 : vector<1x72x128xbf16> to vector<72x128xbf16>
    %c1_8 = arith.constant 1 : index
    %c0_9 = arith.constant 0 : index
    %c0_10 = arith.constant 0 : index
    %10 = vector.load %arg6[%c1_8, %c0_9, %c0_10] : memref<9x128x128xbf16, #tpu.memory_space<vmem>>, vector<1x128x128xbf16>
    %11 = vector.shape_cast %10 : vector<1x128x128xbf16> to vector<128x128xbf16>
    %cst_11 = arith.constant dense<0.000000e+00> : vector<72x128xf32>
    %12 = tpu.matmul %9, %11, %cst_11 {dimension_numbers = #tpu.dot_dimension_numbers<[1], [0], [0], [1], [0, 0, 1, 1], [], []>} : vector<72x128xbf16>, vector<128x128xbf16>, vector<72x128xf32> -> vector<72x128xf32>
    %13 = arith.addf %7, %12 : vector<72x128xf32>
    %c0_12 = arith.constant 0 : index
    %c1_13 = arith.constant 1 : index
    %c0_14 = arith.constant 0 : index
    %14 = vector.load %arg11[%c0_12, %c1_13, %c0_14] : memref<4x90x128xbf16, #tpu.memory_space<vmem>>, vector<1x72x128xbf16>
    %15 = vector.shape_cast %14 : vector<1x72x128xbf16> to vector<72x128xbf16>
    %c2 = arith.constant 2 : index
    %c0_15 = arith.constant 0 : index
    %c0_16 = arith.constant 0 : index
    %16 = vector.load %arg6[%c2, %c0_15, %c0_16] : memref<9x128x128xbf16, #tpu.memory_space<vmem>>, vector<1x128x128xbf16>
    %17 = vector.shape_cast %16 : vector<1x128x128xbf16> to vector<128x128xbf16>
    %cst_17 = arith.constant dense<0.000000e+00> : vector<72x128xf32>
    %18 = tpu.matmul %15, %17, %cst_17 {dimension_numbers = #tpu.dot_dimension_numbers<[1], [0], [0], [1], [0, 0, 1, 1], [], []>} : vector<72x128xbf16>, vector<128x128xbf16>, vector<72x128xf32> -> vector<72x128xf32>
    %19 = arith.addf %13, %18 : vector<72x128xf32>
    %c2_18 = arith.constant 2 : index
    %c0_19 = arith.constant 0 : index
    %c0_20 = arith.constant 0 : index
    %20 = vector.load %arg11[%c2_18, %c0_19, %c0_20] : memref<4x90x128xbf16, #tpu.memory_space<vmem>>, vector<1x72x128xbf16>
    %21 = vector.shape_cast %20 : vector<1x72x128xbf16> to vector<72x128xbf16>
    %c3 = arith.constant 3 : index
    %c0_21 = arith.constant 0 : index
    %c0_22 = arith.constant 0 : index
    %22 = vector.load %arg6[%c3, %c0_21, %c0_22] : memref<9x128x128xbf16, #tpu.memory_space<vmem>>, vector<1x128x128xbf16>
    %23 = vector.shape_cast %22 : vector<1x128x128xbf16> to vector<128x128xbf16>
    %cst_23 = arith.constant dense<0.000000e+00> : vector<72x128xf32>
    %24 = tpu.matmul %21, %23, %cst_23 {dimension_numbers = #tpu.dot_dimension_numbers<[1], [0], [0], [1], [0, 0, 1, 1], [], []>} : vector<72x128xbf16>, vector<128x128xbf16>, vector<72x128xf32> -> vector<72x128xf32>
    %25 = arith.addf %19, %24 : vector<72x128xf32>
    %c3_24 = arith.constant 3 : index
    %c0_25 = arith.constant 0 : index
    %c0_26 = arith.constant 0 : index
    %26 = vector.load %arg11[%c3_24, %c0_25, %c0_26] : memref<4x90x128xbf16, #tpu.memory_space<vmem>>, vector<1x72x128xbf16>
    %27 = vector.shape_cast %26 : vector<1x72x128xbf16> to vector<72x128xbf16>
    %c4 = arith.constant 4 : index
    %c0_27 = arith.constant 0 : index
    %c0_28 = arith.constant 0 : index
    %28 = vector.load %arg6[%c4, %c0_27, %c0_28] : memref<9x128x128xbf16, #tpu.memory_space<vmem>>, vector<1x128x128xbf16>
    %29 = vector.shape_cast %28 : vector<1x128x128xbf16> to vector<128x128xbf16>
    %cst_29 = arith.constant dense<0.000000e+00> : vector<72x128xf32>
    %30 = tpu.matmul %27, %29, %cst_29 {dimension_numbers = #tpu.dot_dimension_numbers<[1], [0], [0], [1], [0, 0, 1, 1], [], []>} : vector<72x128xbf16>, vector<128x128xbf16>, vector<72x128xf32> -> vector<72x128xf32>
    %31 = arith.addf %25, %30 : vector<72x128xf32>
    %c2_30 = arith.constant 2 : index
    %c1_31 = arith.constant 1 : index
    %c0_32 = arith.constant 0 : index
    %32 = vector.load %arg11[%c2_30, %c1_31, %c0_32] : memref<4x90x128xbf16, #tpu.memory_space<vmem>>, vector<1x72x128xbf16>
    %33 = vector.shape_cast %32 : vector<1x72x128xbf16> to vector<72x128xbf16>
    %c5 = arith.constant 5 : index
    %c0_33 = arith.constant 0 : index
    %c0_34 = arith.constant 0 : index
    %34 = vector.load %arg6[%c5, %c0_33, %c0_34] : memref<9x128x128xbf16, #tpu.memory_space<vmem>>, vector<1x128x128xbf16>
    %35 = vector.shape_cast %34 : vector<1x128x128xbf16> to vector<128x128xbf16>
    %cst_35 = arith.constant dense<0.000000e+00> : vector<72x128xf32>
    %36 = tpu.matmul %33, %35, %cst_35 {dimension_numbers = #tpu.dot_dimension_numbers<[1], [0], [0], [1], [0, 0, 1, 1], [], []>} : vector<72x128xbf16>, vector<128x128xbf16>, vector<72x128xf32> -> vector<72x128xf32>
    %37 = arith.addf %31, %36 : vector<72x128xf32>
    %c0_36 = arith.constant 0 : index
    %c9 = arith.constant 9 : index
    %c0_37 = arith.constant 0 : index
    %38 = vector.load %arg11[%c0_36, %c9, %c0_37] : memref<4x90x128xbf16, #tpu.memory_space<vmem>>, vector<1x72x128xbf16>
    %39 = vector.shape_cast %38 : vector<1x72x128xbf16> to vector<72x128xbf16>
    %c6 = arith.constant 6 : index
    %c0_38 = arith.constant 0 : index
    %c0_39 = arith.constant 0 : index
    %40 = vector.load %arg6[%c6, %c0_38, %c0_39] : memref<9x128x128xbf16, #tpu.memory_space<vmem>>, vector<1x128x128xbf16>
    %41 = vector.shape_cast %40 : vector<1x128x128xbf16> to vector<128x128xbf16>
    %cst_40 = arith.constant dense<0.000000e+00> : vector<72x128xf32>
    %42 = tpu.matmul %39, %41, %cst_40 {dimension_numbers = #tpu.dot_dimension_numbers<[1], [0], [0], [1], [0, 0, 1, 1], [], []>} : vector<72x128xbf16>, vector<128x128xbf16>, vector<72x128xf32> -> vector<72x128xf32>
    %43 = arith.addf %37, %42 : vector<72x128xf32>
    %c1_41 = arith.constant 1 : index
    %c9_42 = arith.constant 9 : index
    %c0_43 = arith.constant 0 : index
    %44 = vector.load %arg11[%c1_41, %c9_42, %c0_43] : memref<4x90x128xbf16, #tpu.memory_space<vmem>>, vector<1x72x128xbf16>
    %45 = vector.shape_cast %44 : vector<1x72x128xbf16> to vector<72x128xbf16>
    %c7 = arith.constant 7 : index
    %c0_44 = arith.constant 0 : index
    %c0_45 = arith.constant 0 : index
    %46 = vector.load %arg6[%c7, %c0_44, %c0_45] : memref<9x128x128xbf16, #tpu.memory_space<vmem>>, vector<1x128x128xbf16>
    %47 = vector.shape_cast %46 : vector<1x128x128xbf16> to vector<128x128xbf16>
    %cst_46 = arith.constant dense<0.000000e+00> : vector<72x128xf32>
    %48 = tpu.matmul %45, %47, %cst_46 {dimension_numbers = #tpu.dot_dimension_numbers<[1], [0], [0], [1], [0, 0, 1, 1], [], []>} : vector<72x128xbf16>, vector<128x128xbf16>, vector<72x128xf32> -> vector<72x128xf32>
    %49 = arith.addf %43, %48 : vector<72x128xf32>
    %c0_47 = arith.constant 0 : index
    %c10 = arith.constant 10 : index
    %c0_48 = arith.constant 0 : index
    %50 = vector.load %arg11[%c0_47, %c10, %c0_48] : memref<4x90x128xbf16, #tpu.memory_space<vmem>>, vector<1x72x128xbf16>
    %51 = vector.shape_cast %50 : vector<1x72x128xbf16> to vector<72x128xbf16>
    %c8 = arith.constant 8 : index
    %c0_49 = arith.constant 0 : index
    %c0_50 = arith.constant 0 : index
    %52 = vector.load %arg6[%c8, %c0_49, %c0_50] : memref<9x128x128xbf16, #tpu.memory_space<vmem>>, vector<1x128x128xbf16>
    %53 = vector.shape_cast %52 : vector<1x128x128xbf16> to vector<128x128xbf16>
    %cst_51 = arith.constant dense<0.000000e+00> : vector<72x128xf32>
    %54 = tpu.matmul %51, %53, %cst_51 {dimension_numbers = #tpu.dot_dimension_numbers<[1], [0], [0], [1], [0, 0, 1, 1], [], []>} : vector<72x128xbf16>, vector<128x128xbf16>, vector<72x128xf32> -> vector<72x128xf32>
    %55 = arith.addf %49, %54 : vector<72x128xf32>
    %c0_52 = arith.constant 0 : index
    %c0_53 = arith.constant 0 : index
    %c0_54 = arith.constant 0 : index
    %56 = vector.load %arg8[%c0_52, %c0_53, %c0_54] : memref<1x72x128xf32, #tpu.memory_space<vmem>>, vector<1x72x128xf32>
    %57 = vector.shape_cast %56 : vector<1x72x128xf32> to vector<72x128xf32>
    %58 = vector.shape_cast %55 : vector<72x128xf32> to vector<1x72x128xf32>
    tpu.vector_store %arg8[%c0_52, %c0_53, %c0_54], %58 {strides = array<i32>} : memref<1x72x128xf32, #tpu.memory_space<vmem>>, vector<1x72x128xf32>,
    %c0_55 = arith.constant 0 : index
    %c0_56 = arith.constant 0 : index
    %59 = vector.load %arg7[%c0_55, %c0_56] : memref<72x1xf32, #tpu.memory_space<vmem>>, vector<72x1xf32>
    %60 = vector.broadcast %59 : vector<72x1xf32> to vector<72x128xf32>
    %61 = arith.mulf %55, %60 : vector<72x128xf32>
    %c128_i32 = arith.constant 128 : i32
    %62 = arith.muli %arg1, %c128_i32 : i32
    %63 = tpu.assume_multiple %62, 128 : i32
    %cst_57 = arith.constant dense<0.000000e+00> : vector<128xf32>
    %64 = vector.multi_reduction <add>, %61, %cst_57 [0] : vector<72x128xf32> to vector<128xf32>
    %65 = vector.shape_cast %64 : vector<128xf32> to vector<1x128xf32>
    %c0_58 = arith.constant 0 : index
    %c0_59 = arith.constant 0 : index
    %66 = arith.index_cast %63 : i32 to index
    %67 = vector.load %arg9[%c0_58, %c0_59, %66] : memref<1x1x128xf32, #tpu.memory_space<vmem>>, vector<1x1x128xf32>
    %68 = vector.shape_cast %67 : vector<1x1x128xf32> to vector<1x128xf32>
    %69 = vector.shape_cast %65 : vector<1x128xf32> to vector<1x1x128xf32>
    tpu.vector_store %arg9[%c0_58, %c0_59, %66], %69 {strides = array<i32>} : memref<1x1x128xf32, #tpu.memory_space<vmem>>, vector<1x1x128xf32>,
    %70 = arith.mulf %61, %61 : vector<72x128xf32>
    %cst_60 = arith.constant dense<0.000000e+00> : vector<128xf32>
    %71 = vector.multi_reduction <add>, %70, %cst_60 [0] : vector<72x128xf32> to vector<128xf32>
    %72 = vector.shape_cast %71 : vector<128xf32> to vector<1x128xf32>
    %c0_61 = arith.constant 0 : index
    %c0_62 = arith.constant 0 : index
    %73 = arith.index_cast %63 : i32 to index
    %74 = vector.load %arg10[%c0_61, %c0_62, %73] : memref<1x1x128xf32, #tpu.memory_space<vmem>>, vector<1x1x128xf32>
    %75 = vector.shape_cast %74 : vector<1x1x128xf32> to vector<1x128xf32>
    %76 = vector.shape_cast %72 : vector<1x128xf32> to vector<1x1x128xf32>
    tpu.vector_store %arg10[%c0_61, %c0_62, %73], %76 {strides = array<i32>} : memref<1x1x128xf32, #tpu.memory_space<vmem>>, vector<1x1x128xf32>,
    return
  }
  func.func @transform_0(%arg0: i32, %arg1: i32) -> (i32, i32, i32, i32) {
    %c0_i32 = arith.constant 0 : i32
    %c0_i32_0 = arith.constant 0 : i32
    %c0_i32_1 = arith.constant 0 : i32
    %c0_i32_2 = arith.constant 0 : i32
    return %arg0, %c0_i32, %c0_i32_0, %c0_i32_1 : i32, i32, i32, i32
  }
  func.func @transform_1(%arg0: i32, %arg1: i32) -> (i32, i32, i32) {
    %c0_i32 = arith.constant 0 : i32
    %c0_i32_0 = arith.constant 0 : i32
    %c0_i32_1 = arith.constant 0 : i32
    %c0_i32_2 = arith.constant 0 : i32
    return %c0_i32, %c0_i32_0, %c0_i32_1 : i32, i32, i32
  }
  func.func @transform_2(%arg0: i32, %arg1: i32) -> (i32, i32, i32) {
    %c0_i32 = arith.constant 0 : i32
    %c0_i32_0 = arith.constant 0 : i32
    %c0_i32_1 = arith.constant 0 : i32
    %c0_i32_2 = arith.constant 0 : i32
    return %c0_i32, %c0_i32_0, %c0_i32_1 : i32, i32, i32
  }
  func.func @transform_3(%arg0: i32, %arg1: i32) -> (i32, i32, i32) {
    %c0_i32 = arith.constant 0 : i32
    %c0_i32_0 = arith.constant 0 : i32
    %c0_i32_1 = arith.constant 0 : i32
    %c0_i32_2 = arith.constant 0 : i32
    return %c0_i32, %c0_i32_0, %c0_i32_1 : i32, i32, i32
  }
  func.func @transform_4(%arg0: i32, %arg1: i32) -> (i32, i32, i32) {
    %c0_i32 = arith.constant 0 : i32
    %c0_i32_0 = arith.constant 0 : i32
    %c0_i32_1 = arith.constant 0 : i32
    return %c0_i32, %c0_i32_0, %arg1 : i32, i32, i32
  }
  func.func @transform_5(%arg0: i32, %arg1: i32) -> (i32, i32) {
    %c0_i32 = arith.constant 0 : i32
    %c0_i32_0 = arith.constant 0 : i32
    %c0_i32_1 = arith.constant 0 : i32
    return %c0_i32, %c0_i32_0 : i32, i32
  }
  func.func @transform_6(%arg0: i32, %arg1: i32) -> (i32, i32, i32) {
    %c0_i32 = arith.constant 0 : i32
    %c0_i32_0 = arith.constant 0 : i32
    return %arg0, %c0_i32, %arg1 : i32, i32, i32
  }
  func.func @transform_7(%arg0: i32, %arg1: i32) -> (i32, i32, i32) {
    %c0_i32 = arith.constant 0 : i32
    %c0_i32_0 = arith.constant 0 : i32
    %c0_i32_1 = arith.constant 0 : i32
    return %arg0, %c0_i32, %c0_i32_0 : i32, i32, i32
  }
  func.func @transform_8(%arg0: i32, %arg1: i32) -> (i32, i32, i32) {
    %c0_i32 = arith.constant 0 : i32
    %c0_i32_0 = arith.constant 0 : i32
    %c0_i32_1 = arith.constant 0 : i32
    return %arg0, %c0_i32, %c0_i32_0 : i32, i32, i32
  }
}

module attributes {stable_mosaic.version = 11 : i64} {
  func.func @kernel(%arg0: i32, %arg1: i32, %arg2: memref<1x4x90x128xf32, #tpu.memory_space<vmem>>, %arg3: memref<4x90x1xf32, #tpu.memory_space<vmem>>, %arg4: memref<1x1x128xf32, #tpu.memory_space<vmem>>, %arg5: memref<1x1x128xf32, #tpu.memory_space<vmem>>, %arg6: memref<1x128x128xbf16, #tpu.memory_space<vmem>>, %arg7: memref<1x72x128xf32, #tpu.memory_space<vmem>>, %arg8: memref<4x90x128xbf16, #tpu.memory_space<vmem>>) attributes {dimension_semantics = [#tpu.dimension_semantics<parallel>, #tpu.dimension_semantics<arbitrary>], iteration_bounds = array<i64: 2, 1>, scalar_prefetch = 0 : i64, scratch_operands = 1 : i64, tpu.core_type = #tpu.core_type<tc>, window_params = [{transform_indices = @transform_0, window_bounds = array<i64: 1, 4, 90, 128>}, {pipeline_mode = #tpu.pipeline_mode<synchronous>, transform_indices = @transform_1, window_bounds = array<i64: 4, 90, 1>}, {pipeline_mode = #tpu.pipeline_mode<synchronous>, transform_indices = @transform_2, window_bounds = array<i64: 1, 1, 128>}, {pipeline_mode = #tpu.pipeline_mode<synchronous>, transform_indices = @transform_3, window_bounds = array<i64: 1, 1, 128>}, {transform_indices = @transform_4, window_bounds = array<i64: 1, 128, 128>}, {transform_indices = @transform_5, window_bounds = array<i64: 1, 72, 128>}]} {
    %c0_i32 = arith.constant 0 : i32
    %0 = arith.cmpi eq, %arg1, %c0_i32 : i32
    %1 = arith.extui %0 : i1 to i32
    %c0_i32_0 = arith.constant 0 : i32
    %2 = arith.cmpi ne, %1, %c0_i32_0 : i32
    scf.if %2 {
      %c0_8 = arith.constant 0 : index
      %c0_9 = arith.constant 0 : index
      %c0_10 = arith.constant 0 : index
      %c0_11 = arith.constant 0 : index
      %11 = vector.load %arg2[%c0_8, %c0_9, %c0_10, %c0_11] : memref<1x4x90x128xf32, #tpu.memory_space<vmem>>, vector<1x4x90x128xf32>
      %12 = vector.shape_cast %11 : vector<1x4x90x128xf32> to vector<4x90x128xf32>
      %c0_12 = arith.constant 0 : index
      %c0_13 = arith.constant 0 : index
      %c0_14 = arith.constant 0 : index
      %13 = vector.load %arg4[%c0_12, %c0_13, %c0_14] : memref<1x1x128xf32, #tpu.memory_space<vmem>>, vector<1x1x128xf32>
      %14 = vector.broadcast %13 : vector<1x1x128xf32> to vector<4x90x128xf32>
      %15 = arith.mulf %12, %14 : vector<4x90x128xf32>
      %c0_15 = arith.constant 0 : index
      %c0_16 = arith.constant 0 : index
      %c0_17 = arith.constant 0 : index
      %16 = vector.load %arg5[%c0_15, %c0_16, %c0_17] : memref<1x1x128xf32, #tpu.memory_space<vmem>>, vector<1x1x128xf32>
      %17 = vector.broadcast %16 : vector<1x1x128xf32> to vector<4x90x128xf32>
      %18 = arith.addf %15, %17 : vector<4x90x128xf32>
      %cst_18 = arith.constant 0.000000e+00 : f32
      %19 = vector.broadcast %cst_18 : f32 to vector<4x90x128xf32>
      %20 = arith.maximumf %18, %19 : vector<4x90x128xf32>
      %c0_19 = arith.constant 0 : index
      %c0_20 = arith.constant 0 : index
      %c0_21 = arith.constant 0 : index
      %21 = vector.load %arg3[%c0_19, %c0_20, %c0_21] : memref<4x90x1xf32, #tpu.memory_space<vmem>>, vector<4x90x1xf32>
      %22 = vector.broadcast %21 : vector<4x90x1xf32> to vector<4x90x128xf32>
      %23 = arith.mulf %20, %22 : vector<4x90x128xf32>
      %24 = arith.truncf %23 : vector<4x90x128xf32> to vector<4x90x128xbf16>
      %c0_22 = arith.constant 0 : index
      %c0_23 = arith.constant 0 : index
      %c0_24 = arith.constant 0 : index
      %25 = vector.load %arg8[%c0_22, %c0_23, %c0_24] : memref<4x90x128xbf16, #tpu.memory_space<vmem>>, vector<4x90x128xbf16>
      tpu.vector_store %arg8[%c0_22, %c0_23, %c0_24], %24 {strides = array<i32>} : memref<4x90x128xbf16, #tpu.memory_space<vmem>>, vector<4x90x128xbf16>,
    } else {
    }
    %c3 = arith.constant 3 : index
    %c0 = arith.constant 0 : index
    %c0_1 = arith.constant 0 : index
    %3 = vector.load %arg8[%c3, %c0, %c0_1] : memref<4x90x128xbf16, #tpu.memory_space<vmem>>, vector<1x72x128xbf16>
    %4 = vector.shape_cast %3 : vector<1x72x128xbf16> to vector<72x128xbf16>
    %c0_2 = arith.constant 0 : index
    %c0_3 = arith.constant 0 : index
    %c0_4 = arith.constant 0 : index
    %5 = vector.load %arg6[%c0_2, %c0_3, %c0_4] : memref<1x128x128xbf16, #tpu.memory_space<vmem>>, vector<1x128x128xbf16>
    %6 = vector.shape_cast %5 : vector<1x128x128xbf16> to vector<128x128xbf16>
    %cst = arith.constant dense<0.000000e+00> : vector<72x128xf32>
    %7 = tpu.matmul %4, %6, %cst {dimension_numbers = #tpu.dot_dimension_numbers<[1], [0], [0], [1], [0, 0, 1, 1], [], []>} : vector<72x128xbf16>, vector<128x128xbf16>, vector<72x128xf32> -> vector<72x128xf32>
    %c0_5 = arith.constant 0 : index
    %c0_6 = arith.constant 0 : index
    %c0_7 = arith.constant 0 : index
    %8 = vector.load %arg7[%c0_5, %c0_6, %c0_7] : memref<1x72x128xf32, #tpu.memory_space<vmem>>, vector<1x72x128xf32>
    %9 = vector.shape_cast %8 : vector<1x72x128xf32> to vector<72x128xf32>
    %10 = vector.shape_cast %7 : vector<72x128xf32> to vector<1x72x128xf32>
    tpu.vector_store %arg7[%c0_5, %c0_6, %c0_7], %10 {strides = array<i32>} : memref<1x72x128xf32, #tpu.memory_space<vmem>>, vector<1x72x128xf32>,
    return
  }
  func.func @transform_0(%arg0: i32, %arg1: i32) -> (i32, i32, i32, i32) {
    %c0_i32 = arith.constant 0 : i32
    %c0_i32_0 = arith.constant 0 : i32
    %c0_i32_1 = arith.constant 0 : i32
    %c0_i32_2 = arith.constant 0 : i32
    return %arg0, %c0_i32, %c0_i32_0, %c0_i32_1 : i32, i32, i32, i32
  }
  func.func @transform_1(%arg0: i32, %arg1: i32) -> (i32, i32, i32) {
    %c0_i32 = arith.constant 0 : i32
    %c0_i32_0 = arith.constant 0 : i32
    %c0_i32_1 = arith.constant 0 : i32
    %c0_i32_2 = arith.constant 0 : i32
    return %c0_i32, %c0_i32_0, %c0_i32_1 : i32, i32, i32
  }
  func.func @transform_2(%arg0: i32, %arg1: i32) -> (i32, i32, i32) {
    %c0_i32 = arith.constant 0 : i32
    %c0_i32_0 = arith.constant 0 : i32
    %c0_i32_1 = arith.constant 0 : i32
    %c0_i32_2 = arith.constant 0 : i32
    return %c0_i32, %c0_i32_0, %c0_i32_1 : i32, i32, i32
  }
  func.func @transform_3(%arg0: i32, %arg1: i32) -> (i32, i32, i32) {
    %c0_i32 = arith.constant 0 : i32
    %c0_i32_0 = arith.constant 0 : i32
    %c0_i32_1 = arith.constant 0 : i32
    %c0_i32_2 = arith.constant 0 : i32
    return %c0_i32, %c0_i32_0, %c0_i32_1 : i32, i32, i32
  }
  func.func @transform_4(%arg0: i32, %arg1: i32) -> (i32, i32, i32) {
    %c0_i32 = arith.constant 0 : i32
    %c0_i32_0 = arith.constant 0 : i32
    %c0_i32_1 = arith.constant 0 : i32
    return %c0_i32, %c0_i32_0, %arg1 : i32, i32, i32
  }
  func.func @transform_5(%arg0: i32, %arg1: i32) -> (i32, i32, i32) {
    %c0_i32 = arith.constant 0 : i32
    %c0_i32_0 = arith.constant 0 : i32
    return %arg0, %c0_i32, %arg1 : i32, i32, i32
  }
}

module attributes {stable_mosaic.version = 11 : i64} {
  func.func @kernel(%arg0: i32, %arg1: i32, %arg2: memref<1x1x120x128xf32, #tpu.memory_space<vmem>>, %arg3: memref<1x120x1xf32, #tpu.memory_space<vmem>>, %arg4: memref<1x1x128xf32, #tpu.memory_space<vmem>>, %arg5: memref<1x1x128xf32, #tpu.memory_space<vmem>>, %arg6: memref<9x128x128xbf16, #tpu.memory_space<vmem>>, %arg7: memref<1x80x128xf32, #tpu.memory_space<vmem>>, %arg8: memref<1x80x128xf32, #tpu.memory_space<vmem>>, %arg9: memref<1x120x128xbf16, #tpu.memory_space<vmem>>) attributes {dimension_semantics = [#tpu.dimension_semantics<parallel>, #tpu.dimension_semantics<arbitrary>], iteration_bounds = array<i64: 2, 1>, scalar_prefetch = 0 : i64, scratch_operands = 1 : i64, tpu.core_type = #tpu.core_type<tc>, window_params = [{transform_indices = @transform_0, window_bounds = array<i64: 1, 1, 120, 128>}, {pipeline_mode = #tpu.pipeline_mode<synchronous>, transform_indices = @transform_1, window_bounds = array<i64: 1, 120, 1>}, {pipeline_mode = #tpu.pipeline_mode<synchronous>, transform_indices = @transform_2, window_bounds = array<i64: 1, 1, 128>}, {pipeline_mode = #tpu.pipeline_mode<synchronous>, transform_indices = @transform_3, window_bounds = array<i64: 1, 1, 128>}, {transform_indices = @transform_4, window_bounds = array<i64: 9, 128, 128>}, {transform_indices = @transform_5, window_bounds = array<i64: 1, 80, 128>}, {transform_indices = @transform_6, window_bounds = array<i64: 1, 80, 128>}]} {
    %c0_i32 = arith.constant 0 : i32
    %0 = arith.cmpi eq, %arg1, %c0_i32 : i32
    %1 = arith.extui %0 : i1 to i32
    %c0_i32_0 = arith.constant 0 : i32
    %2 = arith.cmpi ne, %1, %c0_i32_0 : i32
    scf.if %2 {
      %c0_54 = arith.constant 0 : index
      %c0_55 = arith.constant 0 : index
      %c0_56 = arith.constant 0 : index
      %c0_57 = arith.constant 0 : index
      %62 = vector.load %arg2[%c0_54, %c0_55, %c0_56, %c0_57] : memref<1x1x120x128xf32, #tpu.memory_space<vmem>>, vector<1x1x120x128xf32>
      %63 = vector.shape_cast %62 : vector<1x1x120x128xf32> to vector<1x120x128xf32>
      %c0_58 = arith.constant 0 : index
      %c0_59 = arith.constant 0 : index
      %c0_60 = arith.constant 0 : index
      %64 = vector.load %arg4[%c0_58, %c0_59, %c0_60] : memref<1x1x128xf32, #tpu.memory_space<vmem>>, vector<1x1x128xf32>
      %65 = vector.broadcast %64 : vector<1x1x128xf32> to vector<1x120x128xf32>
      %66 = arith.mulf %63, %65 : vector<1x120x128xf32>
      %c0_61 = arith.constant 0 : index
      %c0_62 = arith.constant 0 : index
      %c0_63 = arith.constant 0 : index
      %67 = vector.load %arg5[%c0_61, %c0_62, %c0_63] : memref<1x1x128xf32, #tpu.memory_space<vmem>>, vector<1x1x128xf32>
      %68 = vector.broadcast %67 : vector<1x1x128xf32> to vector<1x120x128xf32>
      %69 = arith.addf %66, %68 : vector<1x120x128xf32>
      %cst_64 = arith.constant 0.000000e+00 : f32
      %70 = vector.broadcast %cst_64 : f32 to vector<1x120x128xf32>
      %71 = arith.maximumf %69, %70 : vector<1x120x128xf32>
      %c0_65 = arith.constant 0 : index
      %c0_66 = arith.constant 0 : index
      %c0_67 = arith.constant 0 : index
      %72 = vector.load %arg3[%c0_65, %c0_66, %c0_67] : memref<1x120x1xf32, #tpu.memory_space<vmem>>, vector<1x120x1xf32>
      %73 = vector.broadcast %72 : vector<1x120x1xf32> to vector<1x120x128xf32>
      %74 = arith.mulf %71, %73 : vector<1x120x128xf32>
      %75 = arith.truncf %74 : vector<1x120x128xf32> to vector<1x120x128xbf16>
      %c0_68 = arith.constant 0 : index
      %c0_69 = arith.constant 0 : index
      %c0_70 = arith.constant 0 : index
      %76 = vector.load %arg9[%c0_68, %c0_69, %c0_70] : memref<1x120x128xbf16, #tpu.memory_space<vmem>>, vector<1x120x128xbf16>
      tpu.vector_store %arg9[%c0_68, %c0_69, %c0_70], %75 {strides = array<i32>} : memref<1x120x128xbf16, #tpu.memory_space<vmem>>, vector<1x120x128xbf16>,
    } else {
    }
    %c0 = arith.constant 0 : index
    %c0_1 = arith.constant 0 : index
    %c0_2 = arith.constant 0 : index
    %3 = vector.load %arg9[%c0, %c0_1, %c0_2] : memref<1x120x128xbf16, #tpu.memory_space<vmem>>, vector<1x80x128xbf16>
    %4 = vector.shape_cast %3 : vector<1x80x128xbf16> to vector<80x128xbf16>
    %c0_3 = arith.constant 0 : index
    %c0_4 = arith.constant 0 : index
    %c0_5 = arith.constant 0 : index
    %5 = vector.load %arg6[%c0_3, %c0_4, %c0_5] : memref<9x128x128xbf16, #tpu.memory_space<vmem>>, vector<1x128x128xbf16>
    %6 = vector.shape_cast %5 : vector<1x128x128xbf16> to vector<128x128xbf16>
    %cst = arith.constant dense<0.000000e+00> : vector<80x128xf32>
    %7 = tpu.matmul %4, %6, %cst {dimension_numbers = #tpu.dot_dimension_numbers<[1], [0], [0], [1], [0, 0, 1, 1], [], []>} : vector<80x128xbf16>, vector<128x128xbf16>, vector<80x128xf32> -> vector<80x128xf32>
    %c0_6 = arith.constant 0 : index
    %c1 = arith.constant 1 : index
    %c0_7 = arith.constant 0 : index
    %8 = vector.load %arg9[%c0_6, %c1, %c0_7] : memref<1x120x128xbf16, #tpu.memory_space<vmem>>, vector<1x80x128xbf16>
    %9 = vector.shape_cast %8 : vector<1x80x128xbf16> to vector<80x128xbf16>
    %c1_8 = arith.constant 1 : index
    %c0_9 = arith.constant 0 : index
    %c0_10 = arith.constant 0 : index
    %10 = vector.load %arg6[%c1_8, %c0_9, %c0_10] : memref<9x128x128xbf16, #tpu.memory_space<vmem>>, vector<1x128x128xbf16>
    %11 = vector.shape_cast %10 : vector<1x128x128xbf16> to vector<128x128xbf16>
    %cst_11 = arith.constant dense<0.000000e+00> : vector<80x128xf32>
    %12 = tpu.matmul %9, %11, %cst_11 {dimension_numbers = #tpu.dot_dimension_numbers<[1], [0], [0], [1], [0, 0, 1, 1], [], []>} : vector<80x128xbf16>, vector<128x128xbf16>, vector<80x128xf32> -> vector<80x128xf32>
    %13 = arith.addf %7, %12 : vector<80x128xf32>
    %c0_12 = arith.constant 0 : index
    %c2 = arith.constant 2 : index
    %c0_13 = arith.constant 0 : index
    %14 = vector.load %arg9[%c0_12, %c2, %c0_13] : memref<1x120x128xbf16, #tpu.memory_space<vmem>>, vector<1x80x128xbf16>
    %15 = vector.shape_cast %14 : vector<1x80x128xbf16> to vector<80x128xbf16>
    %c2_14 = arith.constant 2 : index
    %c0_15 = arith.constant 0 : index
    %c0_16 = arith.constant 0 : index
    %16 = vector.load %arg6[%c2_14, %c0_15, %c0_16] : memref<9x128x128xbf16, #tpu.memory_space<vmem>>, vector<1x128x128xbf16>
    %17 = vector.shape_cast %16 : vector<1x128x128xbf16> to vector<128x128xbf16>
    %cst_17 = arith.constant dense<0.000000e+00> : vector<80x128xf32>
    %18 = tpu.matmul %15, %17, %cst_17 {dimension_numbers = #tpu.dot_dimension_numbers<[1], [0], [0], [1], [0, 0, 1, 1], [], []>} : vector<80x128xbf16>, vector<128x128xbf16>, vector<80x128xf32> -> vector<80x128xf32>
    %19 = arith.addf %13, %18 : vector<80x128xf32>
    %c0_18 = arith.constant 0 : index
    %c10 = arith.constant 10 : index
    %c0_19 = arith.constant 0 : index
    %20 = vector.load %arg9[%c0_18, %c10, %c0_19] : memref<1x120x128xbf16, #tpu.memory_space<vmem>>, vector<1x80x128xbf16>
    %21 = vector.shape_cast %20 : vector<1x80x128xbf16> to vector<80x128xbf16>
    %c3 = arith.constant 3 : index
    %c0_20 = arith.constant 0 : index
    %c0_21 = arith.constant 0 : index
    %22 = vector.load %arg6[%c3, %c0_20, %c0_21] : memref<9x128x128xbf16, #tpu.memory_space<vmem>>, vector<1x128x128xbf16>
    %23 = vector.shape_cast %22 : vector<1x128x128xbf16> to vector<128x128xbf16>
    %cst_22 = arith.constant dense<0.000000e+00> : vector<80x128xf32>
    %24 = tpu.matmul %21, %23, %cst_22 {dimension_numbers = #tpu.dot_dimension_numbers<[1], [0], [0], [1], [0, 0, 1, 1], [], []>} : vector<80x128xbf16>, vector<128x128xbf16>, vector<80x128xf32> -> vector<80x128xf32>
    %25 = arith.addf %19, %24 : vector<80x128xf32>
    %c0_23 = arith.constant 0 : index
    %c11 = arith.constant 11 : index
    %c0_24 = arith.constant 0 : index
    %26 = vector.load %arg9[%c0_23, %c11, %c0_24] : memref<1x120x128xbf16, #tpu.memory_space<vmem>>, vector<1x80x128xbf16>
    %27 = vector.shape_cast %26 : vector<1x80x128xbf16> to vector<80x128xbf16>
    %c4 = arith.constant 4 : index
    %c0_25 = arith.constant 0 : index
    %c0_26 = arith.constant 0 : index
    %28 = vector.load %arg6[%c4, %c0_25, %c0_26] : memref<9x128x128xbf16, #tpu.memory_space<vmem>>, vector<1x128x128xbf16>
    %29 = vector.shape_cast %28 : vector<1x128x128xbf16> to vector<128x128xbf16>
    %cst_27 = arith.constant dense<0.000000e+00> : vector<80x128xf32>
    %30 = tpu.matmul %27, %29, %cst_27 {dimension_numbers = #tpu.dot_dimension_numbers<[1], [0], [0], [1], [0, 0, 1, 1], [], []>} : vector<80x128xbf16>, vector<128x128xbf16>, vector<80x128xf32> -> vector<80x128xf32>
    %31 = arith.addf %25, %30 : vector<80x128xf32>
    %c0_28 = arith.constant 0 : index
    %c12 = arith.constant 12 : index
    %c0_29 = arith.constant 0 : index
    %32 = vector.load %arg9[%c0_28, %c12, %c0_29] : memref<1x120x128xbf16, #tpu.memory_space<vmem>>, vector<1x80x128xbf16>
    %33 = vector.shape_cast %32 : vector<1x80x128xbf16> to vector<80x128xbf16>
    %c5 = arith.constant 5 : index
    %c0_30 = arith.constant 0 : index
    %c0_31 = arith.constant 0 : index
    %34 = vector.load %arg6[%c5, %c0_30, %c0_31] : memref<9x128x128xbf16, #tpu.memory_space<vmem>>, vector<1x128x128xbf16>
    %35 = vector.shape_cast %34 : vector<1x128x128xbf16> to vector<128x128xbf16>
    %cst_32 = arith.constant dense<0.000000e+00> : vector<80x128xf32>
    %36 = tpu.matmul %33, %35, %cst_32 {dimension_numbers = #tpu.dot_dimension_numbers<[1], [0], [0], [1], [0, 0, 1, 1], [], []>} : vector<80x128xbf16>, vector<128x128xbf16>, vector<80x128xf32> -> vector<80x128xf32>
    %37 = arith.addf %31, %36 : vector<80x128xf32>
    %c0_33 = arith.constant 0 : index
    %c20 = arith.constant 20 : index
    %c0_34 = arith.constant 0 : index
    %38 = vector.load %arg9[%c0_33, %c20, %c0_34] : memref<1x120x128xbf16, #tpu.memory_space<vmem>>, vector<1x80x128xbf16>
    %39 = vector.shape_cast %38 : vector<1x80x128xbf16> to vector<80x128xbf16>
    %c6 = arith.constant 6 : index
    %c0_35 = arith.constant 0 : index
    %c0_36 = arith.constant 0 : index
    %40 = vector.load %arg6[%c6, %c0_35, %c0_36] : memref<9x128x128xbf16, #tpu.memory_space<vmem>>, vector<1x128x128xbf16>
    %41 = vector.shape_cast %40 : vector<1x128x128xbf16> to vector<128x128xbf16>
    %cst_37 = arith.constant dense<0.000000e+00> : vector<80x128xf32>
    %42 = tpu.matmul %39, %41, %cst_37 {dimension_numbers = #tpu.dot_dimension_numbers<[1], [0], [0], [1], [0, 0, 1, 1], [], []>} : vector<80x128xbf16>, vector<128x128xbf16>, vector<80x128xf32> -> vector<80x128xf32>
    %43 = arith.addf %37, %42 : vector<80x128xf32>
    %c0_38 = arith.constant 0 : index
    %c21 = arith.constant 21 : index
    %c0_39 = arith.constant 0 : index
    %44 = vector.load %arg9[%c0_38, %c21, %c0_39] : memref<1x120x128xbf16, #tpu.memory_space<vmem>>, vector<1x80x128xbf16>
    %45 = vector.shape_cast %44 : vector<1x80x128xbf16> to vector<80x128xbf16>
    %c7 = arith.constant 7 : index
    %c0_40 = arith.constant 0 : index
    %c0_41 = arith.constant 0 : index
    %46 = vector.load %arg6[%c7, %c0_40, %c0_41] : memref<9x128x128xbf16, #tpu.memory_space<vmem>>, vector<1x128x128xbf16>
    %47 = vector.shape_cast %46 : vector<1x128x128xbf16> to vector<128x128xbf16>
    %cst_42 = arith.constant dense<0.000000e+00> : vector<80x128xf32>
    %48 = tpu.matmul %45, %47, %cst_42 {dimension_numbers = #tpu.dot_dimension_numbers<[1], [0], [0], [1], [0, 0, 1, 1], [], []>} : vector<80x128xbf16>, vector<128x128xbf16>, vector<80x128xf32> -> vector<80x128xf32>
    %49 = arith.addf %43, %48 : vector<80x128xf32>
    %c0_43 = arith.constant 0 : index
    %c22 = arith.constant 22 : index
    %c0_44 = arith.constant 0 : index
    %50 = vector.load %arg9[%c0_43, %c22, %c0_44] : memref<1x120x128xbf16, #tpu.memory_space<vmem>>, vector<1x80x128xbf16>
    %51 = vector.shape_cast %50 : vector<1x80x128xbf16> to vector<80x128xbf16>
    %c8 = arith.constant 8 : index
    %c0_45 = arith.constant 0 : index
    %c0_46 = arith.constant 0 : index
    %52 = vector.load %arg6[%c8, %c0_45, %c0_46] : memref<9x128x128xbf16, #tpu.memory_space<vmem>>, vector<1x128x128xbf16>
    %53 = vector.shape_cast %52 : vector<1x128x128xbf16> to vector<128x128xbf16>
    %cst_47 = arith.constant dense<0.000000e+00> : vector<80x128xf32>
    %54 = tpu.matmul %51, %53, %cst_47 {dimension_numbers = #tpu.dot_dimension_numbers<[1], [0], [0], [1], [0, 0, 1, 1], [], []>} : vector<80x128xbf16>, vector<128x128xbf16>, vector<80x128xf32> -> vector<80x128xf32>
    %55 = arith.addf %49, %54 : vector<80x128xf32>
    %c0_48 = arith.constant 0 : index
    %c0_49 = arith.constant 0 : index
    %c0_50 = arith.constant 0 : index
    %56 = vector.load %arg7[%c0_48, %c0_49, %c0_50] : memref<1x80x128xf32, #tpu.memory_space<vmem>>, vector<1x80x128xf32>
    %57 = vector.shape_cast %56 : vector<1x80x128xf32> to vector<80x128xf32>
    %58 = arith.addf %55, %57 : vector<80x128xf32>
    %c0_51 = arith.constant 0 : index
    %c0_52 = arith.constant 0 : index
    %c0_53 = arith.constant 0 : index
    %59 = vector.load %arg8[%c0_51, %c0_52, %c0_53] : memref<1x80x128xf32, #tpu.memory_space<vmem>>, vector<1x80x128xf32>
    %60 = vector.shape_cast %59 : vector<1x80x128xf32> to vector<80x128xf32>
    %61 = vector.shape_cast %58 : vector<80x128xf32> to vector<1x80x128xf32>
    tpu.vector_store %arg8[%c0_51, %c0_52, %c0_53], %61 {strides = array<i32>} : memref<1x80x128xf32, #tpu.memory_space<vmem>>, vector<1x80x128xf32>,
    return
  }
  func.func @transform_0(%arg0: i32, %arg1: i32) -> (i32, i32, i32, i32) {
    %c0_i32 = arith.constant 0 : i32
    %c0_i32_0 = arith.constant 0 : i32
    %c0_i32_1 = arith.constant 0 : i32
    %c0_i32_2 = arith.constant 0 : i32
    return %arg0, %c0_i32, %c0_i32_0, %c0_i32_1 : i32, i32, i32, i32
  }
  func.func @transform_1(%arg0: i32, %arg1: i32) -> (i32, i32, i32) {
    %c0_i32 = arith.constant 0 : i32
    %c0_i32_0 = arith.constant 0 : i32
    %c0_i32_1 = arith.constant 0 : i32
    %c0_i32_2 = arith.constant 0 : i32
    return %c0_i32, %c0_i32_0, %c0_i32_1 : i32, i32, i32
  }
  func.func @transform_2(%arg0: i32, %arg1: i32) -> (i32, i32, i32) {
    %c0_i32 = arith.constant 0 : i32
    %c0_i32_0 = arith.constant 0 : i32
    %c0_i32_1 = arith.constant 0 : i32
    %c0_i32_2 = arith.constant 0 : i32
    return %c0_i32, %c0_i32_0, %c0_i32_1 : i32, i32, i32
  }
  func.func @transform_3(%arg0: i32, %arg1: i32) -> (i32, i32, i32) {
    %c0_i32 = arith.constant 0 : i32
    %c0_i32_0 = arith.constant 0 : i32
    %c0_i32_1 = arith.constant 0 : i32
    %c0_i32_2 = arith.constant 0 : i32
    return %c0_i32, %c0_i32_0, %c0_i32_1 : i32, i32, i32
  }
  func.func @transform_4(%arg0: i32, %arg1: i32) -> (i32, i32, i32) {
    %c0_i32 = arith.constant 0 : i32
    %c0_i32_0 = arith.constant 0 : i32
    %c0_i32_1 = arith.constant 0 : i32
    return %c0_i32, %c0_i32_0, %arg1 : i32, i32, i32
  }
  func.func @transform_5(%arg0: i32, %arg1: i32) -> (i32, i32, i32) {
    %c0_i32 = arith.constant 0 : i32
    %c0_i32_0 = arith.constant 0 : i32
    return %arg0, %c0_i32, %arg1 : i32, i32, i32
  }
  func.func @transform_6(%arg0: i32, %arg1: i32) -> (i32, i32, i32) {
    %c0_i32 = arith.constant 0 : i32
    %c0_i32_0 = arith.constant 0 : i32
    return %arg0, %c0_i32, %arg1 : i32, i32, i32
  }
}

</mosaic_0001>

<bundles_post_ra>
// kernel: basic_block_forward.4
= control target key start
LH: loop header
LB: loop body
LE: loop exit
PB: predicated region body
PF: predicated region fallthrough
CT: control target
= control target key end

     0   :  { %v297_v0 = vmov 0.0   ;;  %s523_s0 = inlined_call_operand.vmem [shape: f32[512,128], index: 0, kind: input, shape index: {}]   ;;  %s524_s1 = inlined_call_operand.vmem [shape: f32[1,128], index: 1, kind: output, shape index: {0}]   ;;  %s525_s2 = inlined_call_operand.vmem [shape: f32[1,128], index: 2, kind: output, shape index: {1}]  }
   0x1   :  { %14 = vst [vmem:[%s524_s1] sm:$0x1] %v297_v0  ;;  %v16_v1 = vld [vmem:[%s523_s0] sm:$0xff]  ;;  %v17_v2 = vld [vmem:[%s523_s0 + $0x8] sm:$0xff]  ;;  %v18_v3 = vld [vmem:[%s523_s0 + $0x10] sm:$0xff] }
   0x2   :  { %15 = vst [vmem:[%s525_s2] sm:$0x1] %v297_v0  ;;  %v19_v4 = vld [vmem:[%s523_s0 + $0x18] sm:$0xff]  ;;  %v81_v5 = vadd.f32 %v17_v2, %v16_v1  ;;  %v153_v6 = vmul.f32 %v16_v1, %v16_v1  ;;  %v154_v7 = vmul.f32 %v17_v2, %v17_v2  ;;  %v155_v8 = vmul.f32 %v18_v3, %v18_v3  ;;  %v20_v9 = vld [vmem:[%s523_s0 + $0x20] sm:$0xff]  ;;  %v21_v13 = vld [vmem:[%s523_s0 + $0x28] sm:$0xff] }
   0x3   :  { %v156_v11 = vmul.f32 %v19_v4, %v19_v4  ;;  %v157_v15 = vmul.f32 %v20_v9, %v20_v9  ;;  %v22_v17 = vld [vmem:[%s523_s0 + $0x30] sm:$0xff]  ;;  %v158_v19 = vmul.f32 %v21_v13, %v21_v13  ;;  %v23_v21 = vld [vmem:[%s523_s0 + $0x38] sm:$0xff]  ;;  %v24_v25 = vld [vmem:[%s523_s0 + $0x40] sm:$0xff] }
   0x4   :  { %v82_v10 = vadd.f32 %v81_v5, %v18_v3  ;;  %v217_v12 = vadd.f32 %v154_v7, %v153_v6  ;;  %v159_v23 = vmul.f32 %v22_v17, %v22_v17  ;;  %v160_v27 = vmul.f32 %v23_v21, %v23_v21  ;;  %v25_v29 = vld [vmem:[%s523_s0 + $0x48] sm:$0xff]  ;;  %v26_v33 = vld [vmem:[%s523_s0 + $0x50] sm:$0xff]  ;;  %v27_v37 = vld [vmem:[%s523_s0 + $0x58] sm:$0xff] }
   0x5   :  { %v161_v31 = vmul.f32 %v24_v25, %v24_v25  ;;  %v162_v35 = vmul.f32 %v25_v29, %v25_v29  ;;  %v163_v39 = vmul.f32 %v26_v33, %v26_v33  ;;  %v28_v41 = vld [vmem:[%s523_s0 + $0x60] sm:$0xff]  ;;  %v164_v43 = vmul.f32 %v27_v37, %v27_v37  ;;  %v29_v45 = vld [vmem:[%s523_s0 + $0x68] sm:$0xff]  ;;  %v30_v49 = vld [vmem:[%s523_s0 + $0x70] sm:$0xff] }
   0x6   :  { %v83_v14 = vadd.f32 %v82_v10, %v19_v4  ;;  %v218_v16 = vadd.f32 %v217_v12, %v155_v8  ;;  %v165_v47 = vmul.f32 %v28_v41, %v28_v41  ;;  %v166_v51 = vmul.f32 %v29_v45, %v29_v45  ;;  %v31_v53 = vld [vmem:[%s523_s0 + $0x78] sm:$0xff]  ;;  %v32_v57 = vld [vmem:[%s523_s0 + $0x80] sm:$0xff]  ;;  %v33_v61 = vld [vmem:[%s523_s0 + $0x88] sm:$0xff] }
   0x7   :  { %v167_v55 = vmul.f32 %v30_v49, %v30_v49  ;;  %v168_v59 = vmul.f32 %v31_v53, %v31_v53  ;;  %v169_v63 = vmul.f32 %v32_v57, %v32_v57  ;;  %v34_v1 = vld [vmem:[%s523_s0 + $0x90] sm:$0xff]  ;;  %v170_v3 = vmul.f32 %v33_v61, %v33_v61  ;;  %v35_v5 = vld [vmem:[%s523_s0 + $0x98] sm:$0xff] }
   0x8   :  { %v84_v18 = vadd.f32 %v83_v14, %v20_v9  ;;  %v219_v20 = vadd.f32 %v218_v16, %v156_v11  ;;  %v171_v7 = vmul.f32 %v34_v1, %v34_v1  ;;  %v36_v9 = vld [vmem:[%s523_s0 + $0xa0] sm:$0xff]  ;;  %v172_v11 = vmul.f32 %v35_v5, %v35_v5 }
   0xa   :  { %v85_v22 = vadd.f32 %v84_v18, %v21_v13  ;;  %v220_v24 = vadd.f32 %v219_v20, %v157_v15  ;;  %v37_v13 = vld [vmem:[%s523_s0 + $0xa8] sm:$0xff]  ;;  %v173_v15 = vmul.f32 %v36_v9, %v36_v9 }
   0xc   :  { %v86_v26 = vadd.f32 %v85_v22, %v22_v17  ;;  %v221_v28 = vadd.f32 %v220_v24, %v158_v19  ;;  %v38_v17 = vld [vmem:[%s523_s0 + $0xb0] sm:$0xff]  ;;  %v174_v19 = vmul.f32 %v37_v13, %v37_v13 }
   0xe   :  { %v87_v30 = vadd.f32 %v86_v26, %v23_v21  ;;  %v222_v32 = vadd.f32 %v221_v28, %v159_v23  ;;  %v39_v21 = vld [vmem:[%s523_s0 + $0xb8] sm:$0xff]  ;;  %v175_v23 = vmul.f32 %v38_v17, %v38_v17 }
  0x10   :  { %v88_v34 = vadd.f32 %v87_v30, %v24_v25  ;;  %v223_v36 = vadd.f32 %v222_v32, %v160_v27  ;;  %v40_v25 = vld [vmem:[%s523_s0 + $0xc0] sm:$0xff]  ;;  %v176_v27 = vmul.f32 %v39_v21, %v39_v21 }
  0x12   :  { %v89_v38 = vadd.f32 %v88_v34, %v25_v29  ;;  %v224_v40 = vadd.f32 %v223_v36, %v161_v31  ;;  %v41_v29 = vld [vmem:[%s523_s0 + $0xc8] sm:$0xff]  ;;  %v177_v31 = vmul.f32 %v40_v25, %v40_v25 }
  0x14   :  { %v90_v42 = vadd.f32 %v89_v38, %v26_v33  ;;  %v225_v44 = vadd.f32 %v224_v40, %v162_v35  ;;  %v42_v33 = vld [vmem:[%s523_s0 + $0xd0] sm:$0xff]  ;;  %v178_v35 = vmul.f32 %v41_v29, %v41_v29 }
  0x16   :  { %v91_v46 = vadd.f32 %v90_v42, %v27_v37  ;;  %v226_v48 = vadd.f32 %v225_v44, %v163_v39  ;;  %v43_v37 = vld [vmem:[%s523_s0 + $0xd8] sm:$0xff]  ;;  %v179_v39 = vmul.f32 %v42_v33, %v42_v33 }
  0x18   :  { %v92_v50 = vadd.f32 %v91_v46, %v28_v41  ;;  %v227_v52 = vadd.f32 %v226_v48, %v164_v43  ;;  %v44_v41 = vld [vmem:[%s523_s0 + $0xe0] sm:$0xff]  ;;  %v180_v43 = vmul.f32 %v43_v37, %v43_v37 }
  0x1a   :  { %v93_v54 = vadd.f32 %v92_v50, %v29_v45  ;;  %v228_v56 = vadd.f32 %v227_v52, %v165_v47  ;;  %v45_v45 = vld [vmem:[%s523_s0 + $0xe8] sm:$0xff]  ;;  %v181_v47 = vmul.f32 %v44_v41, %v44_v41 }
  0x1c   :  { %v94_v58 = vadd.f32 %v93_v54, %v30_v49  ;;  %v229_v60 = vadd.f32 %v228_v56, %v166_v51  ;;  %v46_v49 = vld [vmem:[%s523_s0 + $0xf0] sm:$0xff]  ;;  %v182_v51 = vmul.f32 %v45_v45, %v45_v45 }
  0x1e   :  { %v95_v62 = vadd.f32 %v94_v58, %v31_v53  ;;  %v230_v0 = vadd.f32 %v229_v60, %v167_v55  ;;  %v47_v53 = vld [vmem:[%s523_s0 + $0xf8] sm:$0xff]  ;;  %v183_v55 = vmul.f32 %v46_v49, %v46_v49 }
  0x20   :  { %v96_v2 = vadd.f32 %v95_v62, %v32_v57  ;;  %v231_v4 = vadd.f32 %v230_v0, %v168_v59  ;;  %v48_v57 = vld [vmem:[%s523_s0 + $0x100] sm:$0xff]  ;;  %v184_v59 = vmul.f32 %v47_v53, %v47_v53 }
  0x22   :  { %v97_v6 = vadd.f32 %v96_v2, %v33_v61  ;;  %v232_v8 = vadd.f32 %v231_v4, %v169_v63  ;;  %v49_v61 = vld [vmem:[%s523_s0 + $0x108] sm:$0xff]  ;;  %v185_v63 = vmul.f32 %v48_v57, %v48_v57 }
  0x24   :  { %v98_v10 = vadd.f32 %v97_v6, %v34_v1  ;;  %v233_v12 = vadd.f32 %v232_v8, %v170_v3  ;;  %v50_v1 = vld [vmem:[%s523_s0 + $0x110] sm:$0xff]  ;;  %v186_v3 = vmul.f32 %v49_v61, %v49_v61 }
  0x26   :  { %v99_v14 = vadd.f32 %v98_v10, %v35_v5  ;;  %v234_v16 = vadd.f32 %v233_v12, %v171_v7  ;;  %v51_v5 = vld [vmem:[%s523_s0 + $0x118] sm:$0xff]  ;;  %v187_v7 = vmul.f32 %v50_v1, %v50_v1 }
  0x28   :  { %v100_v18 = vadd.f32 %v99_v14, %v36_v9  ;;  %v235_v20 = vadd.f32 %v234_v16, %v172_v11  ;;  %v52_v9 = vld [vmem:[%s523_s0 + $0x120] sm:$0xff]  ;;  %v188_v11 = vmul.f32 %v51_v5, %v51_v5 }
  0x2a   :  { %v101_v22 = vadd.f32 %v100_v18, %v37_v13  ;;  %v236_v24 = vadd.f32 %v235_v20, %v173_v15  ;;  %v53_v13 = vld [vmem:[%s523_s0 + $0x128] sm:$0xff]  ;;  %v189_v15 = vmul.f32 %v52_v9, %v52_v9 }
  0x2c   :  { %v102_v26 = vadd.f32 %v101_v22, %v38_v17  ;;  %v237_v28 = vadd.f32 %v236_v24, %v174_v19  ;;  %v54_v17 = vld [vmem:[%s523_s0 + $0x130] sm:$0xff]  ;;  %v190_v19 = vmul.f32 %v53_v13, %v53_v13 }
  0x2e   :  { %v103_v30 = vadd.f32 %v102_v26, %v39_v21  ;;  %v238_v32 = vadd.f32 %v237_v28, %v175_v23  ;;  %v55_v21 = vld [vmem:[%s523_s0 + $0x138] sm:$0xff]  ;;  %v191_v23 = vmul.f32 %v54_v17, %v54_v17 }
  0x30   :  { %v104_v34 = vadd.f32 %v103_v30, %v40_v25  ;;  %v239_v36 = vadd.f32 %v238_v32, %v176_v27  ;;  %v56_v25 = vld [vmem:[%s523_s0 + $0x140] sm:$0xff]  ;;  %v192_v27 = vmul.f32 %v55_v21, %v55_v21 }
  0x32   :  { %v105_v38 = vadd.f32 %v104_v34, %v41_v29  ;;  %v240_v40 = vadd.f32 %v239_v36, %v177_v31  ;;  %v57_v29 = vld [vmem:[%s523_s0 + $0x148] sm:$0xff]  ;;  %v193_v31 = vmul.f32 %v56_v25, %v56_v25 }
  0x34   :  { %v106_v42 = vadd.f32 %v105_v38, %v42_v33  ;;  %v241_v44 = vadd.f32 %v240_v40, %v178_v35  ;;  %v58_v33 = vld [vmem:[%s523_s0 + $0x150] sm:$0xff]  ;;  %v194_v35 = vmul.f32 %v57_v29, %v57_v29 }
  0x36   :  { %v107_v46 = vadd.f32 %v106_v42, %v43_v37  ;;  %v242_v48 = vadd.f32 %v241_v44, %v179_v39  ;;  %v59_v37 = vld [vmem:[%s523_s0 + $0x158] sm:$0xff]  ;;  %v195_v39 = vmul.f32 %v58_v33, %v58_v33 }
  0x38   :  { %v108_v50 = vadd.f32 %v107_v46, %v44_v41  ;;  %v243_v52 = vadd.f32 %v242_v48, %v180_v43  ;;  %v60_v41 = vld [vmem:[%s523_s0 + $0x160] sm:$0xff]  ;;  %v196_v43 = vmul.f32 %v59_v37, %v59_v37 }
  0x3a   :  { %v109_v54 = vadd.f32 %v108_v50, %v45_v45  ;;  %v244_v56 = vadd.f32 %v243_v52, %v181_v47  ;;  %v61_v45 = vld [vmem:[%s523_s0 + $0x168] sm:$0xff]  ;;  %v197_v47 = vmul.f32 %v60_v41, %v60_v41 }
  0x3c   :  { %v110_v58 = vadd.f32 %v109_v54, %v46_v49  ;;  %v245_v60 = vadd.f32 %v244_v56, %v182_v51  ;;  %v62_v49 = vld [vmem:[%s523_s0 + $0x170] sm:$0xff]  ;;  %v198_v51 = vmul.f32 %v61_v45, %v61_v45 }
  0x3e   :  { %v111_v62 = vadd.f32 %v110_v58, %v47_v53  ;;  %v246_v0 = vadd.f32 %v245_v60, %v183_v55  ;;  %v63_v53 = vld [vmem:[%s523_s0 + $0x178] sm:$0xff]  ;;  %v199_v55 = vmul.f32 %v62_v49, %v62_v49 }
  0x40   :  { %v112_v2 = vadd.f32 %v111_v62, %v48_v57  ;;  %v247_v4 = vadd.f32 %v246_v0, %v184_v59  ;;  %v64_v57 = vld [vmem:[%s523_s0 + $0x180] sm:$0xff]  ;;  %v200_v59 = vmul.f32 %v63_v53, %v63_v53 }
  0x42   :  { %v113_v6 = vadd.f32 %v112_v2, %v49_v61  ;;  %v248_v8 = vadd.f32 %v247_v4, %v185_v63  ;;  %v65_v61 = vld [vmem:[%s523_s0 + $0x188] sm:$0xff]  ;;  %v201_v63 = vmul.f32 %v64_v57, %v64_v57 }
  0x44   :  { %v114_v10 = vadd.f32 %v113_v6, %v50_v1  ;;  %v249_v12 = vadd.f32 %v248_v8, %v186_v3  ;;  %v66_v1 = vld [vmem:[%s523_s0 + $0x190] sm:$0xff]  ;;  %v202_v3 = vmul.f32 %v65_v61, %v65_v61 }
  0x46   :  { %v115_v14 = vadd.f32 %v114_v10, %v51_v5  ;;  %v250_v16 = vadd.f32 %v249_v12, %v187_v7  ;;  %v67_v5 = vld [vmem:[%s523_s0 + $0x198] sm:$0xff]  ;;  %v203_v7 = vmul.f32 %v66_v1, %v66_v1 }
  0x48   :  { %v116_v18 = vadd.f32 %v115_v14, %v52_v9  ;;  %v251_v20 = vadd.f32 %v250_v16, %v188_v11  ;;  %v68_v9 = vld [vmem:[%s523_s0 + $0x1a0] sm:$0xff]  ;;  %v204_v11 = vmul.f32 %v67_v5, %v67_v5 }
  0x4a   :  { %v117_v22 = vadd.f32 %v116_v18, %v53_v13  ;;  %v252_v24 = vadd.f32 %v251_v20, %v189_v15  ;;  %v69_v13 = vld [vmem:[%s523_s0 + $0x1a8] sm:$0xff]  ;;  %v205_v15 = vmul.f32 %v68_v9, %v68_v9 }
  0x4c   :  { %v118_v26 = vadd.f32 %v117_v22, %v54_v17  ;;  %v253_v28 = vadd.f32 %v252_v24, %v190_v19  ;;  %v70_v17 = vld [vmem:[%s523_s0 + $0x1b0] sm:$0xff]  ;;  %v206_v19 = vmul.f32 %v69_v13, %v69_v13 }
  0x4e   :  { %v119_v30 = vadd.f32 %v118_v26, %v55_v21  ;;  %v254_v32 = vadd.f32 %v253_v28, %v191_v23  ;;  %v71_v21 = vld [vmem:[%s523_s0 + $0x1b8] sm:$0xff]  ;;  %v207_v23 = vmul.f32 %v70_v17, %v70_v17 }
  0x50   :  { %v120_v34 = vadd.f32 %v119_v30, %v56_v25  ;;  %v255_v36 = vadd.f32 %v254_v32, %v192_v27  ;;  %v72_v25 = vld [vmem:[%s523_s0 + $0x1c0] sm:$0xff]  ;;  %v208_v27 = vmul.f32 %v71_v21, %v71_v21 }
  0x52   :  { %v121_v38 = vadd.f32 %v120_v34, %v57_v29  ;;  %v256_v40 = vadd.f32 %v255_v36, %v193_v31  ;;  %v73_v29 = vld [vmem:[%s523_s0 + $0x1c8] sm:$0xff]  ;;  %v209_v31 = vmul.f32 %v72_v25, %v72_v25 }
  0x54   :  { %v122_v42 = vadd.f32 %v121_v38, %v58_v33  ;;  %v257_v44 = vadd.f32 %v256_v40, %v194_v35  ;;  %v74_v33 = vld [vmem:[%s523_s0 + $0x1d0] sm:$0xff]  ;;  %v210_v35 = vmul.f32 %v73_v29, %v73_v29 }
  0x56   :  { %v123_v46 = vadd.f32 %v122_v42, %v59_v37  ;;  %v258_v48 = vadd.f32 %v257_v44, %v195_v39  ;;  %v75_v37 = vld [vmem:[%s523_s0 + $0x1d8] sm:$0xff]  ;;  %v211_v39 = vmul.f32 %v74_v33, %v74_v33 }
  0x58   :  { %v124_v50 = vadd.f32 %v123_v46, %v60_v41  ;;  %v259_v52 = vadd.f32 %v258_v48, %v196_v43  ;;  %v76_v41 = vld [vmem:[%s523_s0 + $0x1e0] sm:$0xff]  ;;  %v212_v43 = vmul.f32 %v75_v37, %v75_v37 }
  0x5a   :  { %v125_v54 = vadd.f32 %v124_v50, %v61_v45  ;;  %v260_v56 = vadd.f32 %v259_v52, %v197_v47  ;;  %v77_v45 = vld [vmem:[%s523_s0 + $0x1e8] sm:$0xff]  ;;  %v213_v47 = vmul.f32 %v76_v41, %v76_v41 }
  0x5c   :  { %v126_v58 = vadd.f32 %v125_v54, %v62_v49  ;;  %v261_v60 = vadd.f32 %v260_v56, %v198_v51  ;;  %v78_v49 = vld [vmem:[%s523_s0 + $0x1f0] sm:$0xff]  ;;  %v214_v51 = vmul.f32 %v77_v45, %v77_v45 }
  0x5e   :  { %v127_v62 = vadd.f32 %v126_v58, %v63_v53  ;;  %v262_v0 = vadd.f32 %v261_v60, %v199_v55  ;;  %v79_v53 = vld [vmem:[%s523_s0 + $0x1f8] sm:$0xff]  ;;  %v215_v55 = vmul.f32 %v78_v49, %v78_v49 }
  0x5f   :  { %v216_v58 = vmul.f32 %v79_v53, %v79_v53 }
  0x60   :  { %v128_v2 = vadd.f32 %v127_v62, %v64_v57  ;;  %v263_v4 = vadd.f32 %v262_v0, %v200_v59 }
  0x62   :  { %v129_v6 = vadd.f32 %v128_v2, %v65_v61  ;;  %v264_v8 = vadd.f32 %v263_v4, %v201_v63 }
  0x64   :  { %v130_v10 = vadd.f32 %v129_v6, %v66_v1  ;;  %v265_v12 = vadd.f32 %v264_v8, %v202_v3 }
  0x66   :  { %v131_v14 = vadd.f32 %v130_v10, %v67_v5  ;;  %v266_v16 = vadd.f32 %v265_v12, %v203_v7  ;;  %v80_v7 = vld [vmem:[%s524_s1] sm:$0x1] }
  0x67   :  { %v152_v12 = vld [vmem:[%s525_s2] sm:$0x1] }
  0x68   :  { %v132_v18 = vadd.f32 %v131_v14, %v68_v9  ;;  %v267_v20 = vadd.f32 %v266_v16, %v204_v11 }
  0x6a   :  { %v133_v22 = vadd.f32 %v132_v18, %v69_v13  ;;  %v268_v24 = vadd.f32 %v267_v20, %v205_v15 }
  0x6c   :  { %v134_v26 = vadd.f32 %v133_v22, %v70_v17  ;;  %v269_v28 = vadd.f32 %v268_v24, %v206_v19 }
  0x6e   :  { %v135_v30 = vadd.f32 %v134_v26, %v71_v21  ;;  %v270_v32 = vadd.f32 %v269_v28, %v207_v23 }
  0x70   :  { %v136_v34 = vadd.f32 %v135_v30, %v72_v25  ;;  %v271_v36 = vadd.f32 %v270_v32, %v208_v27 }
  0x72   :  { %v137_v38 = vadd.f32 %v136_v34, %v73_v29  ;;  %v272_v40 = vadd.f32 %v271_v36, %v209_v31 }
  0x74   :  { %v138_v42 = vadd.f32 %v137_v38, %v74_v33  ;;  %v273_v44 = vadd.f32 %v272_v40, %v210_v35 }
  0x76   :  { %v139_v46 = vadd.f32 %v138_v42, %v75_v37  ;;  %v274_v48 = vadd.f32 %v273_v44, %v211_v39 }
  0x78   :  { %v140_v50 = vadd.f32 %v139_v46, %v76_v41  ;;  %v275_v52 = vadd.f32 %v274_v48, %v212_v43 }
  0x7a   :  { %v141_v54 = vadd.f32 %v140_v50, %v77_v45  ;;  %v276_v56 = vadd.f32 %v275_v52, %v213_v47 }
  0x7c   :  { %v142_v57 = vadd.f32 %v141_v54, %v78_v49  ;;  %v277_v59 = vadd.f32 %v276_v56, %v214_v51 }
  0x7e   :  { %v143_v60 = vadd.f32 %v142_v57, %v79_v53  ;;  %v278_v61 = vadd.f32 %v277_v59, %v215_v55 }
  0x80   :  { %v144_v62 = vrot.slane %v143_v60, 4  ;;  %v279_v63 = vadd.f32 %v278_v61, %v216_v58 }
  0x82   :  { %v145_v0 = vadd.f32 %v144_v62, %v143_v60  ;;  %v280_v1 = vrot.slane %v279_v63, 4 }
  0x84   :  { %v146_v2 = vrot.slane %v145_v0, 2  ;;  %v281_v3 = vadd.f32 %v280_v1, %v279_v63 }
  0x86   :  { %v147_v4 = vadd.f32 %v146_v2, %v145_v0  ;;  %v282_v5 = vrot.slane %v281_v3, 2 }
  0x88   :  { %v148_v6 = vrot.slane %v147_v4, 1  ;;  %v283_v8 = vadd.f32 %v282_v5, %v281_v3 }
  0x8a   :  { %v149_v9 = vadd.f32 %v148_v6, %v147_v4  ;;  %v284_v10 = vrot.slane %v283_v8, 1 }
  0x8c   :  { %v150_v11 = vadd.f32 %v149_v9, %v80_v7  ;;  %v285_v13 = vadd.f32 %v284_v10, %v283_v8 }
  0x8e   :  { %151 = vst [vmem:[%s524_s1] sm:$0x1] %v150_v11  ;;  %v286_v14 = vadd.f32 %v285_v13, %v152_v12 }
  0x90   :  { %287 = vst [vmem:[%s525_s2] sm:$0x1] %v286_v14 }

// kernel: basic_block_forward.6
= control target key start
LH: loop header
LB: loop body
LE: loop exit
PB: predicated region body
PF: predicated region fallthrough
CT: control target
= control target key end

     0   :  { %s1435_s18 = smov 0   ;;  %s1437_s19 = smov 0   ;;  %s1689_s0 = inlined_call_operand.vmem [shape: f32[2,4,90,128], index: 0, kind: input, shape index: {}]   ;;  %s1690_s1 = inlined_call_operand.vmem [shape: f32[4,90,1], index: 1, kind: input, shape index: {}]   ;;  %s1691_s2 = inlined_call_operand.vmem [shape: f32[1,1,128], index: 2, kind: input, shape index: {}]   ;;  %s1692_s3 = inlined_call_operand.vmem [shape: f32[1,1,128], index: 3, kind: input, shape index: {}]   ;;  %s1693_s4 = inlined_call_operand.vmem [shape: bf16[1,128,128], index: 4, kind: input, shape index: {}]   ;;  %s1694_s5 = inlined_call_operand.vmem [shape: f32[2,72,128], index: 5, kind: output, shape index: {}]  }
   0x1   :  { %s1439_s20 = smov 0  }
   0x2 LB: > { %s27_s21 = sadd.s32 1, %s1398_s19  ;;  %p1140_p0 = scmp.ge.s32.totalorder %s1402_s20, 1  ;;  %s1402_s20 = sphi %s1439_s20, %s15_s20   ;;  %s1398_s19 = sphi %s1437_s19, %s1696_s19   ;;  %s1394_s18 = sphi %s1435_s18, %s1695_s18  }
   0x3   : > { %p29_p1 = scmp.ge.s32.totalorder %s27_s21, 2  ;;  %p210_p2 = scmp.lt.s32.totalorder %s1402_s20, 3 }
   0x5   : > { %s1698_s21 = smov (%p29_p1, %s27_s21), 0  ;;  %p211_p3 = pnand %p1140_p0, %p210_p2 }
   0x6   : > { %p245_p4 = scmp.lt.s32.totalorder (!%p211_p3), %s1394_s18, 1 }
   0x7   : > { %214 = sbr.rel (%p211_p3) target bundleno = 339 (0x153), region = 40 }
   0xc   : > { %v470_v0 = vld [vmem:[%s1690_s1 + $0x20] sm:$0xff]  ;;  %v468_v1 = vld [vmem:[%s1690_s1 + $0x10] sm:$0xff]  ;;  %v1404_v3 = vmov 0   ;;  %v471_v4 = vld [vmem:[%s1690_s1 + $0x28] sm:$0xff]  ;;  %s1700_s18 = smov (!%p245_p4, %s1394_s18), 1 }
   0xd   : > { %v466_v2 = vld [vmem:[%s1690_s1] sm:$0xff]  ;;  %1377 = vset.pattern.permute.xlu2 %v1404_v3  ;;  %1376 = vset.pattern.permute.xlu1 %v1404_v3  ;;  %v469_v5 = vld [vmem:[%s1690_s1 + $0x18] sm:$0xff]  ;;  %v467_v6 = vld [vmem:[%s1690_s1 + $0x8] sm:$0xff]  ;;  %s1348_s17 = smul.u32 384, %s1700_s18 }
   0xe   : > { %1375 = vset.pattern.permute.xlu0 %v1404_v3  ;;  %536 = vperm.xlu2 %1377, %v470_v0   ;;  %v474_v7 = vld [vmem:[%s1690_s1 + $0x40] sm:$0xff]  ;;  %v473_v8 = vld [vmem:[%s1690_s1 + $0x38] sm:$0xff]  ;;  %v472_v9 = vld [vmem:[%s1690_s1 + $0x30] sm:$0xff] }
   0xf   : > { %526 = vperm.xlu1 %1376, %v468_v1   ;;  %516 = vperm.xlu0 %1375, %v466_v2   ;;  %v477_v10 = vld [vmem:[%s1690_s1 + $0x58] sm:$0x3]  ;;  %v476_v11 = vld [vmem:[%s1690_s1 + $0x50] sm:$0xff]  ;;  %v475_v12 = vld [vmem:[%s1690_s1 + $0x48] sm:$0xff]  ;;  %s1562_s28 = scalar_lea.vmem %s1689_s0, %s1348_s17 }
  0x10   : > { %v508_v13 = vld [vmem:[%s1690_s1 + $0x150] sm:$0xff]  ;;  %v479_v14 = vld [vmem:[%s1690_s1 + $0x68] sm:$0xff]  ;;  %v478_v15 = vld [vmem:[%s1690_s1 + $0x60] sm:$0xff] }
  0x11   : > { %v511_v16 = vld [vmem:[%s1690_s1 + $0x168] sm:$0xff]  ;;  %v510_v17 = vld [vmem:[%s1690_s1 + $0x160] sm:$0xff]  ;;  %v509_v18 = vld [vmem:[%s1690_s1 + $0x158] sm:$0xff] }
  0x12   : > { %v502_v19 = vld [vmem:[%s1690_s1 + $0x120] sm:$0xff]  ;;  %v507_v20 = vld [vmem:[%s1690_s1 + $0x148] sm:$0xff]  ;;  %v505_v22 = vld [vmem:[%s1690_s1 + $0x138] sm:$0xff] }
  0x13   : > { %v506_v21 = vld [vmem:[%s1690_s1 + $0x140] sm:$0xff]  ;;  %v504_v23 = vld [vmem:[%s1690_s1 + $0x130] sm:$0xff]  ;;  %v503_v24 = vld [vmem:[%s1690_s1 + $0x128] sm:$0xff] }
  0x14   : > { %v482_v25 = vld [vmem:[%s1690_s1 + $0x80] sm:$0xff]  ;;  %v481_v26 = vld [vmem:[%s1690_s1 + $0x78] sm:$0xff]  ;;  %v480_v27 = vld [vmem:[%s1690_s1 + $0x70] sm:$0xff] }
  0x15   : > { %v485_v28 = vld [vmem:[%s1690_s1 + $0x98] sm:$0xff]  ;;  %v484_v29 = vld [vmem:[%s1690_s1 + $0x90] sm:$0xff]  ;;  %v483_v30 = vld [vmem:[%s1690_s1 + $0x88] sm:$0xff] }
  0x16   : > { %541 = vperm.xlu2 %1377, %v471_v4   ;;  %v488_v31 = vld [vmem:[%s1690_s1 + $0xb0] sm:$0xff]  ;;  %v487_v32 = vld [vmem:[%s1690_s1 + $0xa8] sm:$0xff]  ;;  %v486_v33 = vld [vmem:[%s1690_s1 + $0xa0] sm:$0xff] }
  0x17   : > { %531 = vperm.xlu1 %1376, %v469_v5   ;;  %521 = vperm.xlu0 %1375, %v467_v6   ;;  %v1567_v34 = vld [vmem:[%s1691_s2] ss:$0 sm:$0xff]  ;;  %v491_v35 = vld [vmem:[%s1690_s1 + $0xc8] sm:$0xff]  ;;  %v489_v37 = vld [vmem:[%s1690_s1 + $0xb8] sm:$0x3] }
  0x18   : > { %v490_v36 = vld [vmem:[%s1690_s1 + $0xc0] sm:$0xff]  ;;  %v493_v41 = vld [vmem:[%s1690_s1 + $0xd8] sm:$0xff]  ;;  %v492_v42 = vld [vmem:[%s1690_s1 + $0xd0] sm:$0xff] }
  0x19   : > { %v1581_v38 = vld [vmem:[%s1692_s3] ss:$0 sm:$0xff]  ;;  %v497_v44 = vld [vmem:[%s1690_s1 + $0xf8] sm:$0xff]  ;;  %v496_v45 = vld [vmem:[%s1690_s1 + $0xf0] sm:$0xff] }
  0x1a   : > { %v494_v40 = vld [vmem:[%s1690_s1 + $0xe0] sm:$0xff]  ;;  %v495_v46 = vld [vmem:[%s1690_s1 + $0xe8] sm:$0xff]  ;;  %v1204_v47 = vld [vmem:[%s1693_s4 + $0x38] sm:$0xff] }
  0x1b   : > { %1326 = vmatpush.bf16.msra.mxu3 %v1204_v47  ;;  %1325 = vmatpush.bf16.msra.mxu2 %v1204_v47  ;;  %v500_v49 = vld [vmem:[%s1690_s1 + $0x110] sm:$0xff]  ;;  %v499_v51 = vld [vmem:[%s1690_s1 + $0x108] sm:$0xff]  ;;  %v498_v52 = vld [vmem:[%s1690_s1 + $0x100] sm:$0xff] }
  0x1c   : > { %1000 = vmatpush.bf16.msra.mxu0 %v1204_v47  ;;  %1324 = vmatpush.bf16.msra.mxu1 %v1204_v47  ;;  %v1203_v50 = vld [vmem:[%s1693_s4 + $0x30] sm:$0xff]  ;;  %v1202_v53 = vld [vmem:[%s1693_s4 + $0x28] sm:$0xff]  ;;  %v513_v57 = vld [vmem:[%s1690_s1 + $0x178] sm:$0x3] }
  0x1d   : > { %v1201_v58 = vld [vmem:[%s1693_s4 + $0x20] sm:$0xff]  ;;  %v512_v59 = vld [vmem:[%s1690_s1 + $0x170] sm:$0xff]  ;;  %v501_v60 = vld [vmem:[%s1690_s1 + $0x118] sm:$0x3] }
  0x1e   : > { %556 = vperm.xlu2 %1377, %v474_v7   ;;  %v1200_v61 = vld [vmem:[%s1693_s4 + $0x18] sm:$0xff]  ;;  %v1199_v1 = vld [vmem:[%s1693_s4 + $0x10] sm:$0xff]  ;;  %v1198_v2 = vld [vmem:[%s1693_s4 + $0x8] sm:$0xff] }
  0x1f   : > { %551 = vperm.xlu1 %1376, %v473_v8   ;;  %546 = vperm.xlu0 %1375, %v472_v9   ;;  %v1197_v6 = vld [vmem:[%s1693_s4] sm:$0xff]  ;;  %v303_v47 = vld [vmem:[%s1562_s28 + $0x128] sm:$0xff] }
  0x20   : > { %1329 = vmatpush.bf16.msra.mxu3 %v1203_v50  ;;  %1328 = vmatpush.bf16.msra.mxu2 %v1203_v50 }
  0x21   : > { %1001 = vmatpush.bf16.msra.mxu0 %v1203_v50  ;;  %1327 = vmatpush.bf16.msra.mxu1 %v1203_v50 }
  0x24   : > { %1332 = vmatpush.bf16.msra.mxu3 %v1202_v53  ;;  %1331 = vmatpush.bf16.msra.mxu2 %v1202_v53 }
  0x25   : > { %1002 = vmatpush.bf16.msra.mxu0 %v1202_v53  ;;  %1330 = vmatpush.bf16.msra.mxu1 %v1202_v53 }
  0x26   : > { %571 = vperm.xlu2 %1377, %v477_v10   ;;  %v308_v10 = vld [vmem:[%s1562_s28 + $0x150] sm:$0xff] }
  0x27   : > { %566 = vperm.xlu1 %1376, %v476_v11   ;;  %561 = vperm.xlu0 %1375, %v475_v12   ;;  %v311_v11 = vld [vmem:[%s1562_s28 + $0x168] sm:$0xff]  ;;  %v310_v12 = vld [vmem:[%s1562_s28 + $0x160] sm:$0xff] }
  0x28   : > { %1335 = vmatpush.bf16.msra.mxu3 %v1201_v58  ;;  %1334 = vmatpush.bf16.msra.mxu2 %v1201_v58 }
  0x29   : > { %1003 = vmatpush.bf16.msra.mxu0 %v1201_v58  ;;  %1333 = vmatpush.bf16.msra.mxu1 %v1201_v58 }
  0x2c   : > { %1338 = vmatpush.bf16.msra.mxu3 %v1200_v61  ;;  %1337 = vmatpush.bf16.msra.mxu2 %v1200_v61 }
  0x2d   : > { %1004 = vmatpush.bf16.msra.mxu0 %v1200_v61  ;;  %1336 = vmatpush.bf16.msra.mxu1 %v1200_v61 }
  0x2e   : > { %726 = vperm.xlu2 %1377, %v508_v13   ;;  %v309_v13 = vld [vmem:[%s1562_s28 + $0x158] sm:$0xff] }
  0x2f   : > { %581 = vperm.xlu1 %1376, %v479_v14   ;;  %576 = vperm.xlu0 %1375, %v478_v15   ;;  %v360_v14 = vmul.f32 %v1567_v34, %v308_v10  ;;  %v363_v15 = vmul.f32 %v1567_v34, %v311_v11 }
  0x30   : > { %1341 = vmatpush.bf16.msra.mxu3 %v1199_v1  ;;  %1340 = vmatpush.bf16.msra.mxu2 %v1199_v1 }
  0x31   : > { %1005 = vmatpush.bf16.msra.mxu0 %v1199_v1  ;;  %1339 = vmatpush.bf16.msra.mxu1 %v1199_v1 }
  0x34   : > { %1344 = vmatpush.bf16.msra.mxu3 %v1198_v2  ;;  %1343 = vmatpush.bf16.msra.mxu2 %v1198_v2 }
  0x35   : > { %1006 = vmatpush.bf16.msra.mxu0 %v1198_v2  ;;  %1342 = vmatpush.bf16.msra.mxu1 %v1198_v2 }
  0x36   : > { %741 = vperm.xlu2 %1377, %v511_v16   ;;  %v362_v16 = vmul.f32 %v1567_v34, %v310_v12 }
  0x37   : > { %736 = vperm.xlu1 %1376, %v510_v17   ;;  %731 = vperm.xlu0 %1375, %v509_v18   ;;  %v361_v17 = vmul.f32 %v1567_v34, %v309_v13 }
  0x38   : > { %1347 = vmatpush.bf16.msra.mxu3 %v1197_v6  ;;  %1346 = vmatpush.bf16.msra.mxu2 %v1197_v6 }
  0x39   : > { %1007 = vmatpush.bf16.msra.mxu0 %v1197_v6  ;;  %1345 = vmatpush.bf16.msra.mxu1 %v1197_v6 }
  0x3e   : > { %696 = vperm.xlu2 %1377, %v502_v19   ;;  %v412_v19 = vadd.f32 %v1581_v38, %v360_v14 }
  0x3f   : > { %721 = vperm.xlu1 %1376, %v507_v20   ;;  %716 = vperm.xlu0 %1375, %v506_v21   ;;  %v415_v20 = vadd.f32 %v1581_v38, %v363_v15 }
  0x46   : > { %711 = vperm.xlu2 %1377, %v505_v22  }
  0x47   : > { %706 = vperm.xlu1 %1376, %v504_v23   ;;  %701 = vperm.xlu0 %1375, %v503_v24   ;;  %v414_v23 = vadd.f32 %v1581_v38, %v362_v16  ;;  %v413_v24 = vadd.f32 %v1581_v38, %v361_v17 }
  0x4e   : > { %596 = vperm.xlu2 %1377, %v482_v25   ;;  %v307_v25 = vld [vmem:[%s1562_s28 + $0x148] sm:$0xff] }
  0x4f   : > { %591 = vperm.xlu1 %1376, %v481_v26   ;;  %586 = vperm.xlu0 %1375, %v480_v27   ;;  %v306_v26 = vld [vmem:[%s1562_s28 + $0x140] sm:$0xff]  ;;  %v460_v27 = vmax.f32 %v412_v19, 0.0 }
  0x56   : > { %611 = vperm.xlu2 %1377, %v485_v28   ;;  %v359_v28 = vmul.f32 %v1567_v34, %v307_v25 }
  0x57   : > { %606 = vperm.xlu1 %1376, %v484_v29   ;;  %601 = vperm.xlu0 %1375, %v483_v30   ;;  %v463_v29 = vmax.f32 %v415_v20, 0.0  ;;  %v462_v30 = vmax.f32 %v414_v23, 0.0 }
  0x5e   : > { %626 = vperm.xlu2 %1377, %v488_v31   ;;  %v461_v31 = vmax.f32 %v413_v24, 0.0 }
  0x5f   : > { %621 = vperm.xlu1 %1376, %v487_v32   ;;  %616 = vperm.xlu0 %1375, %v486_v33   ;;  %v358_v32 = vmul.f32 %v1567_v34, %v306_v26 }
  0x66   : > { %641 = vperm.xlu2 %1377, %v491_v35  }
  0x67   : > { %636 = vperm.xlu1 %1376, %v490_v36   ;;  %631 = vperm.xlu0 %1375, %v489_v37  }
  0x68   : > { %v537_v39 = vpop.permute.xlu2 %536 }
  0x69   : > { %v411_v39 = vadd.f32 %v1581_v38, %v359_v28 }
  0x6e   : > { %656 = vperm.xlu2 %1377, %v494_v40  }
  0x6f   : > { %651 = vperm.xlu1 %1376, %v493_v41   ;;  %646 = vperm.xlu0 %1375, %v492_v42   ;;  %v302_v41 = vld [vmem:[%s1562_s28 + $0x120] sm:$0xff]  ;;  %v305_v42 = vld [vmem:[%s1562_s28 + $0x138] sm:$0xff] }
  0x70   : > { %v542_v43 = vpop.permute.xlu2 %541  ;;  %v354_v50 = vmul.f32 %v1567_v34, %v302_v41 }
  0x76   : > { %671 = vperm.xlu2 %1377, %v497_v44  }
  0x77   : > { %666 = vperm.xlu1 %1376, %v496_v45   ;;  %661 = vperm.xlu0 %1375, %v495_v46   ;;  %v410_v45 = vadd.f32 %v1581_v38, %v358_v32  ;;  %v304_v46 = vld [vmem:[%s1562_s28 + $0x130] sm:$0xff]  ;;  %s1349_s28 = smul.u32 72, %s1700_s18 }
  0x78   : > { %v557_v48 = vpop.permute.xlu2 %556 }
  0x79   : > { %v458_v53 = vmax.f32 %v410_v45, 0.0  ;;  %s261_s16 = scalar_lea.vmem %s1694_s5, %s1349_s28 }
  0x7e   : > { %686 = vperm.xlu2 %1377, %v500_v49  }
  0x7f   : > { %681 = vperm.xlu1 %1376, %v499_v51   ;;  %676 = vperm.xlu0 %1375, %v498_v52   ;;  %v357_v51 = vmul.f32 %v1567_v34, %v305_v42  ;;  %v459_v52 = vmax.f32 %v411_v39, 0.0 }
  0x80   : > { %v572_v54 = vpop.permute.xlu2 %571 }
  0x81   : > { %v527_v55 = vpop.permute.xlu1 %526  ;;  %v517_v56 = vpop.permute.xlu0 %516  ;;  %v356_v54 = vmul.f32 %v1567_v34, %v304_v46  ;;  %v409_v58 = vadd.f32 %v1581_v38, %v357_v51 }
  0x82   : > { %v355_v55 = vmul.f32 %v1567_v34, %v303_v47 }
  0x86   : > { %751 = vperm.xlu2 %1377, %v513_v57   ;;  %v406_v57 = vadd.f32 %v1581_v38, %v354_v50 }
  0x87   : > { %746 = vperm.xlu1 %1376, %v512_v59   ;;  %691 = vperm.xlu0 %1375, %v501_v60  }
  0x88   : > { %v727_v62 = vpop.permute.xlu2 %726  ;;  %v454_v2 = vmax.f32 %v406_v57, 0.0 }
  0x89   : > { %v532_v63 = vpop.permute.xlu1 %531  ;;  %v522_v0 = vpop.permute.xlu0 %521  ;;  %v796_v35 = vmul.f32 %v727_v62, %v460_v27 }
  0x8a   : > { %v408_v63 = vadd.f32 %v1581_v38, %v356_v54  ;;  %v407_v0 = vadd.f32 %v1581_v38, %v355_v55 }
  0x8c   : > { %v456_v34 = vmax.f32 %v408_v63, 0.0 }
  0x90   : > { %v742_v3 = vpop.permute.xlu2 %741 }
  0x91   : > { %v552_v4 = vpop.permute.xlu1 %551  ;;  %v547_v5 = vpop.permute.xlu0 %546  ;;  %v799_v40 = vmul.f32 %v742_v3, %v463_v29  ;;  %v457_v3 = vmax.f32 %v409_v58, 0.0 }
  0x92   : > { %v455_v5 = vmax.f32 %v407_v0, 0.0 }
  0x98   : > { %v1643_v7 = vpop.permute.xlu2 %696 }
  0x99   : > { %v567_v8 = vpop.permute.xlu1 %566  ;;  %v562_v9 = vpop.permute.xlu0 %561 }
  0x9a   : > { %v790_v8 = vmul.f32 %v1643_v7, %v454_v2 }
  0xa0   : > { %v712_v18 = vpop.permute.xlu2 %711 }
  0xa1   : > { %v582_v21 = vpop.permute.xlu1 %581  ;;  %v577_v22 = vpop.permute.xlu0 %576  ;;  %v793_v11 = vmul.f32 %v712_v18, %v457_v3 }
  0xa8   : > { %v597_v33 = vpop.permute.xlu2 %596 }
  0xa9   : > { %v737_v36 = vpop.permute.xlu1 %736  ;;  %v732_v37 = vpop.permute.xlu0 %731 }
  0xaa   : > { %v798_v43 = vmul.f32 %v737_v36, %v462_v30  ;;  %v797_v44 = vmul.f32 %v732_v37, %v461_v31 }
  0xac   : > { %v1303_v48 = vpack.c.bf16 %v799_v40, %v798_v43  ;;  %v1298_v49 = vpack.c.bf16 %v797_v44, %v796_v35 }
  0xae   : > { %1323 = vst [vmem:[#allocation2 + $0xb0] sm:$0xff] %v1303_v48  }
  0xaf   : > { %1322 = vst [vmem:[#allocation2 + $0xa8] sm:$0xff] %v1298_v49  }
  0xb0   : > { %v612_v56 = vpop.permute.xlu2 %611 }
  0xb1   : > { %v722_v59 = vpop.permute.xlu1 %721  ;;  %v717_v60 = vpop.permute.xlu0 %716 }
  0xb2   : > { %v795_v61 = vmul.f32 %v722_v59, %v459_v52  ;;  %v794_v62 = vmul.f32 %v717_v60, %v458_v53 }
  0xb4   : > { %v1293_v1 = vpack.c.bf16 %v795_v61, %v794_v62 }
  0xb5   : > { %v907_v38 = vld [vmem:[#allocation2 + $0xb0] sm:$0xf] }
  0xb6   : > { %1321 = vst [vmem:[#allocation2 + $0xa0] sm:$0xff] %v1293_v1   ;;  %v1196_v4 = vld [vmem:[#allocation2 + $0xa8] sm:$0xff]  ;;  %v941_v21 = vunpack.c.l.b16 %v907_v38 }
  0xb7   : > { %1023 = vmatmul.bf16.vlgmr.msra.gmra.mxu3 %v1196_v4 }
  0xb8   : > { %v627_v6 = vpop.permute.xlu2 %626  ;;  %v946_v24 = vpack.c.b16 %v941_v21, %v941_v21 }
  0xb9   : > { %v707_v9 = vpop.permute.xlu1 %706  ;;  %v702_v10 = vpop.permute.xlu0 %701 }
  0xba   : > { %v792_v12 = vmul.f32 %v707_v9, %v456_v34  ;;  %v791_v13 = vmul.f32 %v702_v10, %v455_v5 }
  0xbc   : > { %v1288_v14 = vpack.c.bf16 %v793_v11, %v792_v12  ;;  %v1283_v15 = vpack.c.bf16 %v791_v13, %v790_v8 }
  0xbd   : > { %v1195_v16 = vld [vmem:[#allocation2 + $0xa0] sm:$0xff] }
  0xbe   : > { %1320 = vst [vmem:[#allocation2 + $0x98] sm:$0xff] %v1288_v14   ;;  %1018 = vmatmul.bf16.vlgmr.msra.gmra.mxu2 %v1195_v16 }
  0xbf   : > { %1319 = vst [vmem:[#allocation2 + $0x90] sm:$0xff] %v1283_v15  }
  0xc0   : > { %v642_v17 = vpop.permute.xlu2 %641 }
  0xc1   : > { %v592_v19 = vpop.permute.xlu1 %591  ;;  %v587_v20 = vpop.permute.xlu0 %586 }
  0xc5   : > { %v1194_v22 = vld [vmem:[#allocation2 + $0x98] sm:$0xff] }
  0xc6   : > { %v1193_v23 = vld [vmem:[#allocation2 + $0x90] sm:$0xff]  ;;  %1013 = vmatmul.bf16.vlgmr.msra.gmra.mxu1 %v1194_v22 }
  0xc7   : > { %1008 = vmatmul.bf16.vlgmr.msra.gmra.mxu0 %v1193_v23  ;;  %1028 = vmatmul.bf16.gmra.mxu3 %v946_v24 }
  0xc8   : > { %v657_v7 = vpop.permute.xlu2 %656 }
  0xc9   : > { %v607_v18 = vpop.permute.xlu1 %606  ;;  %v602_v25 = vpop.permute.xlu0 %601 }
  0xd0   : > { %v672_v26 = vpop.permute.xlu2 %671 }
  0xd1   : > { %v622_v27 = vpop.permute.xlu1 %621  ;;  %v617_v28 = vpop.permute.xlu0 %616 }
  0xd8   : > { %v687_v29 = vpop.permute.xlu2 %686 }
  0xd9   : > { %v637_v30 = vpop.permute.xlu1 %636  ;;  %v632_v31 = vpop.permute.xlu0 %631 }
  0xe0   : > { %v752_v32 = vpop.permute.xlu2 %751 }
  0xe1   : > { %v652_v33 = vpop.permute.xlu1 %651  ;;  %v647_v35 = vpop.permute.xlu0 %646 }
  0xe9   : > { %v667_v36 = vpop.permute.xlu1 %666  ;;  %v662_v37 = vpop.permute.xlu0 %661 }
  0xf1   : > { %v682_v39 = vpop.permute.xlu1 %681  ;;  %v677_v40 = vpop.permute.xlu0 %676 }
  0xf9   : > { %v747_v41 = vpop.permute.xlu1 %746  ;;  %v692_v42 = vpop.permute.xlu0 %691 }
 0x13a   : > { %v1024_v43 = vpop.f32.mrf.mxu3 }
 0x13b   : > { %1039 = vst [vmem:[%s261_s16 + $0x30] sm:$0xff] %v1024_v43 }
 0x141   : > { %v1019_v44 = vpop.f32.mrf.mxu2 }
 0x142   : > { %1037 = vst [vmem:[%s261_s16 + $0x20] sm:$0xff] %v1019_v44  ;;  %v1026_v45 = vpop.f32.mrf.mxu3 }
 0x143   : > { %1040 = vst [vmem:[%s261_s16 + $0x38] sm:$0xff] %v1026_v45  ;;  %v1014_v46 = vpop.f32.mrf.mxu1 }
 0x144   : > { %v1009_v47 = vpop.f32.mrf.mxu0  ;;  %1035 = vst [vmem:[%s261_s16 + $0x10] sm:$0xff] %v1014_v46 }
 0x145   : > { %1033 = vst [vmem:[%s261_s16] sm:$0xff] %v1009_v47 }
 0x149   : > { %v1021_v48 = vpop.f32.mrf.mxu2 }
 0x14a   : > { %1038 = vst [vmem:[%s261_s16 + $0x28] sm:$0xff] %v1021_v48  ;;  %v1029_v49 = vpop.f32.mrf.mxu3 }
 0x14b   : > { %1041 = vst [vmem:[%s261_s16 + $0x40] sm:$0xff] %v1029_v49  ;;  %v1016_v50 = vpop.f32.mrf.mxu1 }
 0x14c   : > { %v1011_v51 = vpop.f32.mrf.mxu0  ;;  %1036 = vst [vmem:[%s261_s16 + $0x18] sm:$0xff] %v1016_v50 }
 0x14d   : > { %1034 = vst [vmem:[%s261_s16 + $0x8] sm:$0xff] %v1011_v51 }
 0x152   : > { %v1031_v52 = vpop.f32.mrf.mxu3 }
 0x153 PF: > { %s15_s20 = sadd.s32 1, %s1402_s20   ;;  %s1695_s18 = smov %s1398_s19 }
 0x154   : > { %p12_p5 = scmp.ge.s32.totalorder %s15_s20, 4   ;;  %s1696_s19 = smov %s1698_s21 }
 0x156   :  { %14 = sbr.rel (!%p12_p5) target bundleno = 2 (0x2), region = 78 }

// kernel: basic_block_forward.5
= control target key start
LH: loop header
LB: loop body
LE: loop exit
PB: predicated region body
PF: predicated region fallthrough
CT: control target
= control target key end

     0   :  { %s3603_s27 = smov 0   ;;  %s3605_s28 = smov 0   ;;  %s4349_s0 = inlined_call_operand.vmem [shape: f32[2,4,90,128], index: 0, kind: input, shape index: {}]   ;;  %s4350_s1 = inlined_call_operand.vmem [shape: f32[4,90,1], index: 1, kind: input, shape index: {}]   ;;  %s4351_s2 = inlined_call_operand.vmem [shape: f32[1,1,128], index: 2, kind: input, shape index: {}]   ;;  %s4352_s3 = inlined_call_operand.vmem [shape: f32[1,1,128], index: 3, kind: input, shape index: {}]   ;;  %s4353_s4 = inlined_call_operand.vmem [shape: bf16[9,128,128], index: 4, kind: input, shape index: {}]   ;;  %s4354_s5 = inlined_call_operand.vmem [shape: f32[72,1], index: 5, kind: input, shape index: {}]   ;;  %s4355_s6 = inlined_call_operand.vmem [shape: f32[2,72,128], index: 6, kind: output, shape index: {0}]   ;;  %s4356_s7 = inlined_call_operand.vmem [shape: f32[2,1,128], index: 7, kind: output, shape index: {1}]   ;;  %s4357_s8 = inlined_call_operand.vmem [shape: f32[2,1,128], index: 8, kind: output, shape index: {2}]  }
   0x1   :  { %s3607_s29 = smov 0  }
   0x2 LB: > { %s31_s30 = sadd.s32 1, %s3551_s28  ;;  %p2693_p0 = scmp.ge.s32.totalorder %s3555_s29, 1  ;;  %s3555_s29 = sphi %s3607_s29, %s19_s29   ;;  %s3551_s28 = sphi %s3605_s28, %s4359_s28   ;;  %s3547_s27 = sphi %s3603_s27, %s4358_s27  }
   0x3   : > { %p33_p1 = scmp.ge.s32.totalorder %s31_s30, 2  ;;  %p290_p2 = scmp.lt.s32.totalorder %s3555_s29, 3 }
   0x5   : > { %s4361_s30 = smov (%p33_p1, %s31_s30), 0  ;;  %p291_p3 = pnand %p2693_p0, %p290_p2 }
   0x6   : > { %p337_p4 = scmp.lt.s32.totalorder (!%p291_p3), %s3547_s27, 1 }
   0x7   : > { %294 = sbr.rel (%p291_p3) target bundleno = 482 (0x1e2), region = 44 }
   0xc   : > { %v584_v0 = vld [vmem:[%s4350_s1 + $0xa0] sm:$0xff]  ;;  %v3557_v3 = vmov 0   ;;  %v585_v4 = vld [vmem:[%s4350_s1 + $0xa8] sm:$0xff]  ;;  %v582_v8 = vld [vmem:[%s4350_s1 + $0x90] sm:$0xff]  ;;  %s4363_s27 = smov (!%p337_p4, %s3547_s27), 1  ;;  %vm2322_vm1 = vcmask 1046528  }
   0xd   : > { %v580_v1 = vld [vmem:[%s4350_s1 + $0x80] sm:$0xff]  ;;  %3525 = vset.pattern.permute.xlu2 %v3557_v3  ;;  %3524 = vset.pattern.permute.xlu1 %v3557_v3  ;;  %v581_v5 = vld [vmem:[%s4350_s1 + $0x88] sm:$0xff]  ;;  %v583_v9 = vld [vmem:[%s4350_s1 + $0x98] sm:$0xff]  ;;  %s3496_s19 = smul.u32 384, %s4363_s27  ;;  %vm1318_vm0 = vsmask.f32 7424  ;;  %s356_s25 = scalar_lea.vmem %s4356_s7, %s4363_s27 }
   0xe   : > { %v576_v2 = vld [vmem:[%s4350_s1 + $0x60] sm:$0xff]  ;;  %3523 = vset.pattern.permute.xlu0 %v3557_v3  ;;  %714 = vperm.xlu2 %3525, %v584_v0   ;;  %v577_v6 = vld [vmem:[%s4350_s1 + $0x68] sm:$0xff]  ;;  %v579_v10 = vld [vmem:[%s4350_s1 + $0x78] sm:$0xff]  ;;  %s359_s9 = scalar_lea.vmem %s4357_s8, %s4363_s27 }
   0xf   : > { %694 = vperm.xlu0 %3523, %v580_v1   ;;  %674 = vperm.xlu1 %3524, %v576_v2   ;;  %v564_v7 = vld [vmem:[%s4350_s1] sm:$0xff]  ;;  %v578_v11 = vld [vmem:[%s4350_s1 + $0x70] sm:$0xff]  ;;  %v565_v12 = vld [vmem:[%s4350_s1 + $0x8] sm:$0xff]  ;;  %s3742_s14 = scalar_lea.vmem %s4349_s0, %s3496_s19  ;;  %s3497_s19 = smul.u32 72, %s4363_s27 }
  0x10   : > { %v588_v13 = vld [vmem:[%s4350_s1 + $0xc0] sm:$0xff]  ;;  %v567_v14 = vld [vmem:[%s4350_s1 + $0x18] sm:$0xff]  ;;  %v566_v15 = vld [vmem:[%s4350_s1 + $0x10] sm:$0xff] }
  0x11   : > { %v601_v16 = vld [vmem:[%s4350_s1 + $0x128] sm:$0xff]  ;;  %v600_v17 = vld [vmem:[%s4350_s1 + $0x120] sm:$0xff]  ;;  %v590_v19 = vld [vmem:[%s4350_s1 + $0xd0] sm:$0xff]  ;;  %s4307_s22 = scalar_lea.vmem %s4355_s6, %s3497_s19 }
  0x12   : > { %v589_v18 = vld [vmem:[%s4350_s1 + $0xc8] sm:$0xff]  ;;  %v568_v21 = vld [vmem:[%s4350_s1 + $0x20] sm:$0xff]  ;;  %v603_v22 = vld [vmem:[%s4350_s1 + $0x138] sm:$0xff] }
  0x13   : > { %v569_v20 = vld [vmem:[%s4350_s1 + $0x28] sm:$0xff]  ;;  %v602_v23 = vld [vmem:[%s4350_s1 + $0x130] sm:$0xff]  ;;  %v591_v24 = vld [vmem:[%s4350_s1 + $0xd8] sm:$0xff] }
  0x14   : > { %v592_v25 = vld [vmem:[%s4350_s1 + $0xe0] sm:$0xff]  ;;  %v571_v26 = vld [vmem:[%s4350_s1 + $0x38] sm:$0xff]  ;;  %v570_v27 = vld [vmem:[%s4350_s1 + $0x30] sm:$0xff] }
  0x15   : > { %v3277_v28 = vld [vmem:[%s4353_s4 + $0x78] sm:$0xff]  ;;  %v605_v29 = vld [vmem:[%s4350_s1 + $0x148] sm:$0xff]  ;;  %v604_v30 = vld [vmem:[%s4350_s1 + $0x140] sm:$0xff] }
  0x16   : > { %719 = vperm.xlu2 %3525, %v585_v4   ;;  %3481 = vmatpush.bf16.msra.mxu2 %v3277_v28  ;;  %v593_v31 = vld [vmem:[%s4350_s1 + $0xe8] sm:$0xff]  ;;  %v3276_v32 = vld [vmem:[%s4353_s4 + $0x70] sm:$0xff]  ;;  %v572_v36 = vld [vmem:[%s4350_s1 + $0x40] sm:$0xff] }
  0x17   : > { %699 = vperm.xlu0 %3523, %v581_v5   ;;  %679 = vperm.xlu1 %3524, %v577_v6   ;;  %v3275_v33 = vld [vmem:[%s4353_s4 + $0x68] sm:$0xff]  ;;  %v594_v34 = vld [vmem:[%s4350_s1 + $0xf0] sm:$0xff]  ;;  %v3274_v37 = vld [vmem:[%s4353_s4 + $0x60] sm:$0xff] }
  0x18   : > { %1124 = vmatpush.bf16.msra.mxu0 %v3277_v28  ;;  %3480 = vmatpush.bf16.msra.mxu1 %v3277_v28  ;;  %v573_v35 = vld [vmem:[%s4350_s1 + $0x48] sm:$0xff]  ;;  %v3747_v38 = vld [vmem:[%s4351_s2] ss:$0 sm:$0xff]  ;;  %v3273_v40 = vld [vmem:[%s4353_s4 + $0x58] sm:$0xff] }
  0x19   : > { %v384_v39 = vld [vmem:[%s3742_s14 + $0xa0] sm:$0xff]  ;;  %v385_v41 = vld [vmem:[%s3742_s14 + $0xa8] sm:$0xff]  ;;  %v607_v42 = vld [vmem:[%s4350_s1 + $0x158] sm:$0xff] }
  0x1a   : > { %3483 = vmatpush.bf16.msra.mxu2 %v3276_v32  ;;  %v436_v43 = vmul.f32 %v3747_v38, %v384_v39  ;;  %v3761_v44 = vld [vmem:[%s4352_s3] ss:$0 sm:$0xff]  ;;  %v606_v45 = vld [vmem:[%s4350_s1 + $0x150] sm:$0xff]  ;;  %v595_v46 = vld [vmem:[%s4350_s1 + $0xf8] sm:$0xff]  ;;  %v437_v48 = vmul.f32 %v3747_v38, %v385_v41 }
  0x1b   : > { %v3272_v47 = vld [vmem:[%s4353_s4 + $0x50] sm:$0xff]  ;;  %v3271_v52 = vld [vmem:[%s4353_s4 + $0x48] sm:$0xff]  ;;  %v608_v54 = vld [vmem:[%s4350_s1 + $0x160] sm:$0xff] }
  0x1c   : > { %1125 = vmatpush.bf16.msra.mxu0 %v3276_v32  ;;  %3482 = vmatpush.bf16.msra.mxu1 %v3276_v32  ;;  %v488_v49 = vadd.f32 %v3761_v44, %v436_v43  ;;  %v489_v51 = vadd.f32 %v3761_v44, %v437_v48  ;;  %v597_v55 = vld [vmem:[%s4350_s1 + $0x108] sm:$0xff]  ;;  %v596_v56 = vld [vmem:[%s4350_s1 + $0x100] sm:$0xff]  ;;  %v586_v63 = vld [vmem:[%s4350_s1 + $0xb0] sm:$0xff] }
  0x1d   : > { %v3270_v58 = vld [vmem:[%s4353_s4 + $0x40] sm:$0xff]  ;;  %v574_v0 = vld [vmem:[%s4350_s1 + $0x50] sm:$0xff]  ;;  %v609_v1 = vld [vmem:[%s4350_s1 + $0x168] sm:$0xff] }
  0x1e   : > { %614 = vperm.xlu2 %3525, %v564_v7   ;;  %3485 = vmatpush.bf16.msra.mxu2 %v3275_v33  ;;  %v536_v53 = vmax.f32 %v488_v49, 0.0  ;;  %v537_v57 = vmax.f32 %v489_v51, 0.0  ;;  %v3290_v2 = vld [vmem:[%s4353_s4 + $0xb8] sm:$0xff]  ;;  %v3289_v7 = vld [vmem:[%s4353_s4 + $0xb0] sm:$0xff]  ;;  %v3300_v28 = vld [vmem:[%s4353_s4 + $0xe8] sm:$0xff] }
  0x1f   : > { %704 = vperm.xlu0 %3523, %v582_v8   ;;  %709 = vperm.xlu1 %3524, %v583_v9   ;;  %v3265_v3 = vld [vmem:[%s4353_s4 + $0x38] sm:$0xff]  ;;  %v380_v8 = vld [vmem:[%s3742_s14 + $0x80] sm:$0xff]  ;;  %v2437_v41 = vld [vmem:[%s4354_s5 + $0x8] sm:$0xff] }
  0x20   : > { %1126 = vmatpush.bf16.msra.mxu0 %v3275_v33  ;;  %3484 = vmatpush.bf16.msra.mxu1 %v3275_v33  ;;  %v3302_v5 = vld [vmem:[%s4353_s4 + $0xf8] sm:$0xff]  ;;  %v376_v9 = vld [vmem:[%s3742_s14 + $0x60] sm:$0xff] }
  0x21   : > { %v3314_v6 = vld [vmem:[%s4353_s4 + $0x138] sm:$0xff]  ;;  %1556 = vmatpush.bf16.msra.mxu3 %v3302_v5  ;;  %v3287_v33 = vld [vmem:[%s4353_s4 + $0xa0] sm:$0xff] }
  0x22   : > { %3487 = vmatpush.bf16.msra.mxu2 %v3274_v37  ;;  %v383_v39 = vld [vmem:[%s3742_s14 + $0x98] sm:$0xff] }
  0x23   : > { %v599_v43 = vld [vmem:[%s4350_s1 + $0x118] sm:$0x3]  ;;  %v435_v48 = vmul.f32 %v3747_v38, %v383_v39 }
  0x24   : > { %1127 = vmatpush.bf16.msra.mxu0 %v3274_v37  ;;  %3486 = vmatpush.bf16.msra.mxu1 %v3274_v37  ;;  %v382_v37 = vld [vmem:[%s3742_s14 + $0x90] sm:$0xff]  ;;  %v3286_v49 = vld [vmem:[%s4353_s4 + $0x98] sm:$0xff] }
  0x25   : > { %v2443_v39 = vld [vmem:[%s4354_s5 + $0x38] sm:$0xff] }
  0x26   : > { %689 = vperm.xlu2 %3525, %v579_v10   ;;  %3489 = vmatpush.bf16.msra.mxu2 %v3273_v40  ;;  %v587_v10 = vld [vmem:[%s4350_s1 + $0xb8] sm:$0x3] }
  0x27   : > { %684 = vperm.xlu1 %3524, %v578_v11   ;;  %619 = vperm.xlu0 %3523, %v565_v12   ;;  %v575_v11 = vld [vmem:[%s4350_s1 + $0x58] sm:$0x3]  ;;  %v598_v12 = vld [vmem:[%s4350_s1 + $0x110] sm:$0xff] }
  0x28   : > { %1128 = vmatpush.bf16.msra.mxu0 %v3273_v40  ;;  %3488 = vmatpush.bf16.msra.mxu1 %v3273_v40  ;;  %v2436_v40 = vld [vmem:[%s4354_s5] sm:$0xff] }
  0x2a   : > { %3491 = vmatpush.bf16.msra.mxu2 %v3272_v47 }
  0x2c   : > { %1129 = vmatpush.bf16.msra.mxu0 %v3272_v47  ;;  %3490 = vmatpush.bf16.msra.mxu1 %v3272_v47  ;;  %v434_v47 = vmul.f32 %v3747_v38, %v382_v37  ;;  %v367_v37 = vld [vmem:[%s3742_s14 + $0x18] sm:$0xff] }
  0x2e   : > { %734 = vperm.xlu2 %3525, %v588_v13   ;;  %3493 = vmatpush.bf16.msra.mxu2 %v3271_v52  ;;  %v381_v13 = vld [vmem:[%s3742_s14 + $0x88] sm:$0xff] }
  0x2f   : > { %629 = vperm.xlu1 %3524, %v567_v14   ;;  %624 = vperm.xlu0 %3523, %v566_v15   ;;  %v377_v14 = vld [vmem:[%s3742_s14 + $0x68] sm:$0xff]  ;;  %v3264_v15 = vld [vmem:[%s4353_s4 + $0x30] sm:$0xff] }
  0x30   : > { %1130 = vmatpush.bf16.msra.mxu0 %v3271_v52  ;;  %3492 = vmatpush.bf16.msra.mxu1 %v3271_v52 }
  0x32   : > { %3495 = vmatpush.bf16.msra.mxu2 %v3270_v58 }
  0x34   : > { %1131 = vmatpush.bf16.msra.mxu0 %v3270_v58  ;;  %3494 = vmatpush.bf16.msra.mxu1 %v3270_v58  ;;  %v364_v58 = vld [vmem:[%s3742_s14] sm:$0xff] }
  0x36   : > { %799 = vperm.xlu2 %3525, %v601_v16   ;;  %1411 = vmatpush.bf16.msrb.mxu2 %v3290_v2  ;;  %v3301_v16 = vld [vmem:[%s4353_s4 + $0xf0] sm:$0xff]  ;;  %v379_v2 = vld [vmem:[%s3742_s14 + $0x78] sm:$0xff] }
  0x37   : > { %794 = vperm.xlu1 %3524, %v600_v17   ;;  %739 = vperm.xlu0 %3523, %v589_v18   ;;  %v3313_v18 = vld [vmem:[%s4353_s4 + $0x130] sm:$0xff] }
  0x38   : > { %1233 = vmatpush.bf16.msrb.mxu1 %v3265_v3  ;;  %1701 = vmatpush.bf16.msrb.mxu0 %v3314_v6  ;;  %v2439_v6 = vld [vmem:[%s4354_s5 + $0x18] sm:$0xff] }
  0x39   : > { %1557 = vmatpush.bf16.msra.mxu3 %v3301_v16  ;;  %v416_v16 = vmul.f32 %v3747_v38, %v364_v58 }
  0x3a   : > { %1412 = vmatpush.bf16.msrb.mxu2 %v3289_v7  ;;  %v2440_v7 = vld [vmem:[%s4354_s5 + $0x20] sm:$0xff] }
  0x3c   : > { %1234 = vmatpush.bf16.msrb.mxu1 %v3264_v15  ;;  %1702 = vmatpush.bf16.msrb.mxu0 %v3313_v18  ;;  %v3309_v15 = vld [vmem:[%s4353_s4 + $0x110] sm:$0xff]  ;;  %v3284_v18 = vld [vmem:[%s4353_s4 + $0x88] sm:$0xff] }
  0x3d   : > { %1558 = vmatpush.bf16.msra.mxu3 %v3300_v28  ;;  %v468_v28 = vadd.f32 %v3761_v44, %v416_v16 }
  0x3e   : > { %744 = vperm.xlu2 %3525, %v590_v19   ;;  %v3288_v19 = vld [vmem:[%s4353_s4 + $0xa8] sm:$0xff] }
  0x3f   : > { %639 = vperm.xlu1 %3524, %v569_v20   ;;  %634 = vperm.xlu0 %3523, %v568_v21   ;;  %v432_v20 = vmul.f32 %v3747_v38, %v380_v8  ;;  %v378_v8 = vld [vmem:[%s3742_s14 + $0x70] sm:$0xff] }
  0x40   : > { %1413 = vmatpush.bf16.msrb.mxu2 %v3288_v19 }
  0x44   : > { %1414 = vmatpush.bf16.msrb.mxu2 %v3287_v33 }
  0x46   : > { %809 = vperm.xlu2 %3525, %v603_v22   ;;  %v428_v22 = vmul.f32 %v3747_v38, %v376_v9  ;;  %v365_v9 = vld [vmem:[%s3742_s14 + $0x8] sm:$0xff] }
  0x47   : > { %804 = vperm.xlu1 %3524, %v602_v23   ;;  %749 = vperm.xlu0 %3523, %v591_v24   ;;  %v433_v23 = vmul.f32 %v3747_v38, %v381_v13  ;;  %v429_v24 = vmul.f32 %v3747_v38, %v377_v14  ;;  %v2438_v13 = vld [vmem:[%s4354_s5 + $0x10] sm:$0xff] }
  0x48   : > { %1415 = vmatpush.bf16.msrb.mxu2 %v3286_v49  ;;  %v3297_v14 = vld [vmem:[%s4353_s4 + $0xd0] sm:$0xff]  ;;  %v3295_v49 = vld [vmem:[%s4353_s4 + $0xc0] sm:$0xff] }
  0x4e   : > { %754 = vperm.xlu2 %3525, %v592_v25  }
  0x4f   : > { %649 = vperm.xlu1 %3524, %v571_v26   ;;  %644 = vperm.xlu0 %3523, %v570_v27   ;;  %v3263_v27 = vld [vmem:[%s4353_s4 + $0x28] sm:$0xff] }
  0x50   : > { %1235 = vmatpush.bf16.msrb.mxu1 %v3263_v27  ;;  %v3308_v27 = vld [vmem:[%s4353_s4 + $0x108] sm:$0xff] }
  0x56   : > { %819 = vperm.xlu2 %3525, %v605_v29   ;;  %v3312_v29 = vld [vmem:[%s4353_s4 + $0x128] sm:$0xff] }
  0x57   : > { %814 = vperm.xlu1 %3524, %v604_v30   ;;  %759 = vperm.xlu0 %3523, %v593_v31   ;;  %v484_v31 = vadd.f32 %v3761_v44, %v432_v20 }
  0x58   : > { %1703 = vmatpush.bf16.msrb.mxu0 %v3312_v29 }
  0x5e   : > { %764 = vperm.xlu2 %3525, %v594_v34   ;;  %v480_v34 = vadd.f32 %v3761_v44, %v428_v22  ;;  %v417_v22 = vmul.f32 %v3747_v38, %v365_v9 }
  0x5f   : > { %659 = vperm.xlu1 %3524, %v573_v35   ;;  %654 = vperm.xlu0 %3523, %v572_v36   ;;  %v485_v35 = vadd.f32 %v3761_v44, %v433_v23  ;;  %v481_v36 = vadd.f32 %v3761_v44, %v429_v24  ;;  %v3259_v23 = vld [vmem:[%s4353_s4 + $0x8] sm:$0xff] }
  0x60   : > { %v528_v51 = vmax.f32 %v480_v34, 0.0 }
  0x61   : > { %v533_v52 = vmax.f32 %v485_v35, 0.0 }
  0x66   : > { %829 = vperm.xlu2 %3525, %v607_v42   ;;  %v3262_v42 = vld [vmem:[%s4353_s4 + $0x20] sm:$0xff] }
  0x67   : > { %824 = vperm.xlu1 %3524, %v606_v45   ;;  %769 = vperm.xlu0 %3523, %v595_v46   ;;  %v3299_v45 = vld [vmem:[%s4353_s4 + $0xe0] sm:$0xff] }
  0x68   : > { %v715_v50 = vpop.permute.xlu2 %714  ;;  %v3311_v46 = vld [vmem:[%s4353_s4 + $0x120] sm:$0xff]  ;;  %1236 = vmatpush.bf16.msrb.mxu1 %v3262_v42  ;;  %1559 = vmatpush.bf16.msra.mxu3 %v3299_v45  ;;  %v2441_v45 = vld [vmem:[%s4354_s5 + $0x28] sm:$0xff] }
  0x69   : > { %v872_v59 = vmul.f32 %v715_v50, %v536_v53  ;;  %v532_v50 = vmax.f32 %v484_v31, 0.0  ;;  %v529_v53 = vmax.f32 %v481_v36, 0.0  ;;  %1704 = vmatpush.bf16.msrb.mxu0 %v3311_v46  ;;  %v469_v36 = vadd.f32 %v3761_v44, %v417_v22 }
  0x6a   : > { %v516_v46 = vmax.f32 %v468_v28, 0.0 }
  0x6e   : > { %834 = vperm.xlu2 %3525, %v608_v54   ;;  %v3261_v54 = vld [vmem:[%s4353_s4 + $0x18] sm:$0xff] }
  0x6f   : > { %779 = vperm.xlu1 %3524, %v597_v55   ;;  %774 = vperm.xlu0 %3523, %v596_v56   ;;  %v3298_v56 = vld [vmem:[%s4353_s4 + $0xd8] sm:$0xff] }
  0x70   : > { %v720_v60 = vpop.permute.xlu2 %719  ;;  %1237 = vmatpush.bf16.msrb.mxu1 %v3261_v54  ;;  %1560 = vmatpush.bf16.msra.mxu3 %v3298_v56  ;;  %v517_v54 = vmax.f32 %v469_v36, 0.0 }
  0x71   : > { %v873_v61 = vmul.f32 %v720_v60, %v537_v57  ;;  %v3310_v57 = vld [vmem:[%s4353_s4 + $0x118] sm:$0xff] }
  0x72   : > { %1705 = vmatpush.bf16.msrb.mxu0 %v3310_v57  ;;  %v3339_v57 = vld [vmem:[%s4353_s4 + $0x1b8] sm:$0xff] }
  0x73   : > { %v3409_v62 = vpack.c.bf16 %v873_v61, %v872_v59  ;;  %v486_v61 = vadd.f32 %v3761_v44, %v434_v47 }
  0x74   : > { %1561 = vmatpush.bf16.msra.mxu3 %v3297_v14 }
  0x75   : > { %3469 = vst [vmem:[#allocation2 + $0x50] sm:$0xff] %v3409_v62   ;;  %v487_v62 = vadd.f32 %v3761_v44, %v435_v48  ;;  %v534_v19 = vmax.f32 %v486_v61, 0.0  ;;  %v419_v48 = vmul.f32 %v3747_v38, %v367_v37 }
  0x76   : > { %724 = vperm.xlu2 %3525, %v586_v63   ;;  %v3285_v63 = vld [vmem:[%s4353_s4 + $0x90] sm:$0xff]  ;;  %1706 = vmatpush.bf16.msrb.mxu0 %v3309_v15 }
  0x77   : > { %664 = vperm.xlu1 %3524, %v574_v0   ;;  %839 = vperm.xlu0 %3523, %v609_v1   ;;  %v535_v20 = vmax.f32 %v487_v62, 0.0  ;;  %v471_v62 = vadd.f32 %v3761_v44, %v419_v48 }
  0x78   : > { %v3805_v4 = vpop.permute.xlu2 %614  ;;  %1416 = vmatpush.bf16.msrb.mxu2 %v3285_v63  ;;  %v3352_v63 = vld [vmem:[%s4353_s4 + $0x1f8] sm:$0xff] }
  0x79   : > { %v519_v14 = vmax.f32 %v471_v62, 0.0  ;;  %v402_v62 = vld [vmem:[%s3742_s14 + $0x130] sm:$0xff] }
  0x7a   : > { %1707 = vmatpush.bf16.msrb.mxu0 %v3308_v27 }
  0x7c   : > { %v1030_v17 = vld [vmem:[#allocation2 + $0x50] sm:$0xf]  ;;  %1417 = vmatpush.bf16.msrb.mxu2 %v3284_v18  ;;  %v3327_v18 = vld [vmem:[%s4353_s4 + $0x178] sm:$0xff] }
  0x7d   : > { %v1065_v21 = vunpack.c.l.b16 %v1030_v17  ;;  %v431_v17 = vmul.f32 %v3747_v38, %v379_v2  ;;  %v401_v2 = vld [vmem:[%s3742_s14 + $0x128] sm:$0xff] }
  0x7e   : > { %784 = vperm.xlu2 %3525, %v598_v12  }
  0x7f   : > { %729 = vperm.xlu1 %3524, %v587_v10   ;;  %669 = vperm.xlu0 %3523, %v575_v11   ;;  %v1070_v25 = vpack.c.b16 %v1065_v21, %v1065_v21  ;;  %v3260_v10 = vld [vmem:[%s4353_s4 + $0x10] sm:$0xff]  ;;  %v430_v21 = vmul.f32 %v3747_v38, %v378_v8  ;;  %v483_v29 = vadd.f32 %v3761_v44, %v431_v17  ;;  %v389_v8 = vld [vmem:[%s3742_s14 + $0xc8] sm:$0xff] }
  0x80   : > { %v3845_v26 = vpop.permute.xlu2 %689  ;;  %1238 = vmatpush.bf16.msrb.mxu1 %v3260_v10  ;;  %v441_v17 = vmul.f32 %v3747_v38, %v389_v8 }
  0x81   : > { %v695_v30 = vpop.permute.xlu0 %694  ;;  %v675_v32 = vpop.permute.xlu1 %674  ;;  %1152 = vmatmul.bf16.vlgmr.msra.gmra.mxu2 %v1070_v25  ;;  %v3296_v25 = vld [vmem:[%s4353_s4 + $0xc8] sm:$0xff]  ;;  %v482_v35 = vadd.f32 %v3761_v44, %v430_v21 }
  0x82   : > { %v868_v0 = vmul.f32 %v695_v30, %v532_v50  ;;  %v864_v1 = vmul.f32 %v675_v32, %v528_v51  ;;  %v3283_v32 = vld [vmem:[%s4353_s4 + $0x80] sm:$0xff]  ;;  %1562 = vmatpush.bf16.msra.mxu3 %v3296_v25  ;;  %v531_v51 = vmax.f32 %v483_v29, 0.0 }
  0x83   : > { %1418 = vmatpush.bf16.msrb.mxu2 %v3283_v32  ;;  %v3307_v50 = vld [vmem:[%s4353_s4 + $0x100] sm:$0xff]  ;;  %v369_v32 = vld [vmem:[%s3742_s14 + $0x28] sm:$0xff] }
  0x84   : > { %1239 = vmatpush.bf16.msrb.mxu1 %v3259_v23  ;;  %1708 = vmatpush.bf16.msrb.mxu0 %v3307_v50  ;;  %v390_v50 = vld [vmem:[%s3742_s14 + $0xd0] sm:$0xff] }
  0x86   : > { %2452 = vperm.xlu2 %3525, %v2437_v41   ;;  %v3258_v41 = vld [vmem:[%s4353_s4] sm:$0xff]  ;;  %1563 = vmatpush.bf16.msra.mxu3 %v3295_v49 }
  0x87   : > { %2447 = vperm.xlu1 %3524, %v2436_v40   ;;  %789 = vperm.xlu0 %3523, %v599_v43   ;;  %v366_v40 = vld [vmem:[%s3742_s14 + $0x10] sm:$0xff] }
  0x88   : > { %v3891_v55 = vpop.permute.xlu2 %734  ;;  %v2442_v43 = vld [vmem:[%s4354_s5 + $0x30] sm:$0xff]  ;;  %v418_v56 = vmul.f32 %v3747_v38, %v366_v40  ;;  %1240 = vmatpush.bf16.msrb.mxu1 %v3258_v41  ;;  %2073 = vmatpush.bf16.msra.mxu2 %v3339_v57  ;;  %v403_v57 = vld [vmem:[%s3742_s14 + $0x138] sm:$0xff] }
  0x89   : > { %v700_v59 = vpop.permute.xlu0 %699  ;;  %v680_v60 = vpop.permute.xlu1 %679 }
  0x8a   : > { %v869_v3 = vmul.f32 %v700_v59, %v533_v52  ;;  %v865_v5 = vmul.f32 %v680_v60, %v529_v53  ;;  %v530_v53 = vmax.f32 %v482_v35, 0.0  ;;  %v852_v59 = vmul.f32 %v3805_v4, %v516_v46  ;;  %v611_v4 = vld [vmem:[%s4350_s1 + $0x178] sm:$0x3]  ;;  %2259 = vmatpush.bf16.msrb.mxu3 %v3352_v63  ;;  %v3351_v46 = vld [vmem:[%s4353_s4 + $0x1f0] sm:$0xff] }
  0x8b   : > { %v391_v63 = vld [vmem:[%s3742_s14 + $0xd8] sm:$0xff] }
  0x8c   : > { %v3399_v11 = vpack.c.bf16 %v869_v3, %v868_v0  ;;  %v3389_v12 = vpack.c.bf16 %v865_v5, %v864_v1  ;;  %v867_v0 = vmul.f32 %v3845_v26, %v531_v51  ;;  %v388_v1 = vld [vmem:[%s3742_s14 + $0xc0] sm:$0xff]  ;;  %v610_v26 = vld [vmem:[%s4350_s1 + $0x170] sm:$0xff] }
  0x8e   : > { %3467 = vst [vmem:[#allocation2 + $0x40] sm:$0xff] %v3399_v11   ;;  %2467 = vperm.xlu2 %3525, %v2440_v7   ;;  %v400_v7 = vld [vmem:[%s3742_s14 + $0x120] sm:$0xff]  ;;  %2260 = vmatpush.bf16.msrb.mxu3 %v3351_v46 }
  0x8f   : > { %3465 = vst [vmem:[#allocation2 + $0x30] sm:$0xff] %v3389_v12   ;;  %2462 = vperm.xlu1 %3524, %v2439_v6   ;;  %2457 = vperm.xlu0 %3523, %v2438_v13   ;;  %v470_v6 = vadd.f32 %v3761_v44, %v418_v56  ;;  %v2444_v11 = vld [vmem:[%s4354_s5 + $0x40] sm:$0xff]  ;;  %v440_v12 = vmul.f32 %v3747_v38, %v388_v1 }
  0x90   : > { %v3936_v24 = vpop.permute.xlu2 %799  ;;  %v453_v13 = vmul.f32 %v3747_v38, %v401_v2  ;;  %v452_v16 = vmul.f32 %v3747_v38, %v400_v7  ;;  %v455_v2 = vmul.f32 %v3747_v38, %v403_v57  ;;  %v443_v7 = vmul.f32 %v3747_v38, %v391_v63 }
  0x91   : > { %v705_v30 = vpop.permute.xlu0 %704  ;;  %v710_v31 = vpop.permute.xlu1 %709  ;;  %v518_v15 = vmax.f32 %v470_v6, 0.0  ;;  %v492_v22 = vadd.f32 %v3761_v44, %v440_v12  ;;  %v454_v6 = vmul.f32 %v3747_v38, %v402_v62 }
  0x92   : > { %v870_v33 = vmul.f32 %v705_v30, %v534_v19  ;;  %v871_v34 = vmul.f32 %v710_v31, %v535_v20  ;;  %v3338_v19 = vld [vmem:[%s4353_s4 + $0x1b0] sm:$0xff]  ;;  %v3360_v20 = vld [vmem:[%s4353_s4 + $0x238] sm:$0xff]  ;;  %v505_v23 = vadd.f32 %v3761_v44, %v453_v13  ;;  %v504_v30 = vadd.f32 %v3761_v44, %v452_v16 }
  0x93   : > { %2074 = vmatpush.bf16.msra.mxu2 %v3338_v19  ;;  %v493_v31 = vadd.f32 %v3761_v44, %v441_v17  ;;  %v540_v35 = vmax.f32 %v492_v22, 0.0 }
  0x94   : > { %v3404_v42 = vpack.c.bf16 %v871_v34, %v870_v33  ;;  %v368_v33 = vld [vmem:[%s3742_s14 + $0x20] sm:$0xff]  ;;  %v553_v36 = vmax.f32 %v505_v23, 0.0  ;;  %v552_v41 = vmax.f32 %v504_v30, 0.0 }
  0x95   : > { %v3268_v47 = vld [vmem:[#allocation2 + $0x40] sm:$0xff]  ;;  %v876_v49 = vmul.f32 %v3891_v55, %v540_v35 }
  0x96   : > { %3468 = vst [vmem:[#allocation2 + $0x48] sm:$0xff] %v3404_v42   ;;  %2482 = vperm.xlu2 %3525, %v2443_v39   ;;  %v3266_v52 = vld [vmem:[#allocation2 + $0x30] sm:$0xff]  ;;  %1142 = vmatmul.bf16.vlgmr.msra.gmra.mxu1 %v3268_v47  ;;  %v421_v39 = vmul.f32 %v3747_v38, %v369_v32  ;;  %v541_v42 = vmax.f32 %v493_v31, 0.0  ;;  %v889_v56 = vmul.f32 %v3936_v24, %v553_v36 }
  0x97   : > { %2477 = vperm.xlu1 %3524, %v2442_v43   ;;  %2472 = vperm.xlu0 %3523, %v2441_v45   ;;  %v420_v43 = vmul.f32 %v3747_v38, %v368_v33  ;;  %v3326_v47 = vld [vmem:[%s4353_s4 + $0x170] sm:$0xff] }
  0x98   : > { %1132 = vmatmul.bf16.vlgmr.msra.gmra.mxu0 %v3266_v52  ;;  %v3976_v58 = vpop.permute.xlu2 %744  ;;  %1887 = vmatpush.bf16.msra.mxu1 %v3327_v18 }
  0x99   : > { %v685_v60 = vpop.permute.xlu1 %684  ;;  %v620_v61 = vpop.permute.xlu0 %619  ;;  %2385 = vmatpush.bf16.msra.mxu0 %v3360_v20  ;;  %v506_v20 = vadd.f32 %v3761_v44, %v454_v6 }
  0x9a   : > { %v866_v3 = vmul.f32 %v685_v60, %v530_v53  ;;  %v853_v5 = vmul.f32 %v620_v61, %v517_v54  ;;  %v473_v53 = vadd.f32 %v3761_v44, %v421_v39  ;;  %v472_v61 = vadd.f32 %v3761_v44, %v420_v43  ;;  %v3349_v43 = vld [vmem:[%s4353_s4 + $0x1e0] sm:$0xff] }
  0x9b   : > { %v554_v39 = vmax.f32 %v506_v20, 0.0  ;;  %v373_v20 = vld [vmem:[%s3742_s14 + $0x48] sm:$0xff] }
  0x9c   : > { %v3394_v9 = vpack.c.bf16 %v867_v0, %v866_v3  ;;  %v3364_v10 = vpack.c.bf16 %v853_v5, %v852_v59  ;;  %1888 = vmatpush.bf16.msra.mxu1 %v3326_v47  ;;  %v442_v0 = vmul.f32 %v3747_v38, %v390_v50  ;;  %v521_v24 = vmax.f32 %v473_v53, 0.0 }
  0x9d   : > { %v3269_v40 = vld [vmem:[#allocation2 + $0x48] sm:$0xff] }
  0x9e   : > { %3466 = vst [vmem:[#allocation2 + $0x38] sm:$0xff] %v3394_v9   ;;  %849 = vperm.xlu2 %3525, %v611_v4   ;;  %v520_v4 = vmax.f32 %v472_v61, 0.0  ;;  %v494_v12 = vadd.f32 %v3761_v44, %v442_v0 }
  0x9f   : > { %3365 = vst [vmem:[#allocation2] sm:$0xff] %v3364_v10   ;;  %844 = vperm.xlu1 %3524, %v610_v26   ;;  %2487 = vperm.xlu0 %3523, %v2444_v11   ;;  %v3337_v10 = vld [vmem:[%s4353_s4 + $0x1a8] sm:$0xff]  ;;  %v3359_v26 = vld [vmem:[%s4353_s4 + $0x230] sm:$0xff] }
  0xa0   : > { %v4011_v21 = vpop.permute.xlu2 %809  ;;  %v3350_v11 = vld [vmem:[%s4353_s4 + $0x1e8] sm:$0xff]  ;;  %2075 = vmatpush.bf16.msra.mxu2 %v3337_v10  ;;  %2386 = vmatpush.bf16.msra.mxu0 %v3359_v26  ;;  %v542_v31 = vmax.f32 %v494_v12, 0.0 }
  0xa1   : > { %v630_v25 = vpop.permute.xlu1 %629  ;;  %v625_v27 = vpop.permute.xlu0 %624  ;;  %2261 = vmatpush.bf16.msrb.mxu3 %v3350_v11 }
  0xa2   : > { %v855_v28 = vmul.f32 %v630_v25, %v519_v14  ;;  %v854_v29 = vmul.f32 %v625_v27, %v518_v15  ;;  %v3325_v14 = vld [vmem:[%s4353_s4 + $0x168] sm:$0xff]  ;;  %v507_v15 = vadd.f32 %v3761_v44, %v455_v2  ;;  %v495_v25 = vadd.f32 %v3761_v44, %v443_v7  ;;  %v371_v27 = vld [vmem:[%s3742_s14 + $0x38] sm:$0xff]  ;;  %v3357_v7 = vld [vmem:[%s4353_s4 + $0x220] sm:$0xff] }
  0xa3   : > { %1889 = vmatpush.bf16.msra.mxu1 %v3325_v14  ;;  %v423_v35 = vmul.f32 %v3747_v38, %v371_v27  ;;  %v878_v46 = vmul.f32 %v3976_v58, %v542_v31  ;;  %v404_v58 = vld [vmem:[%s3742_s14 + $0x140] sm:$0xff] }
  0xa4   : > { %v3369_v34 = vpack.c.bf16 %v855_v28, %v854_v29  ;;  %v370_v28 = vld [vmem:[%s3742_s14 + $0x30] sm:$0xff]  ;;  %v555_v32 = vmax.f32 %v507_v15, 0.0  ;;  %v456_v2 = vmul.f32 %v3747_v38, %v404_v58 }
  0xa5   : > { %v3267_v37 = vld [vmem:[#allocation2 + $0x38] sm:$0xff]  ;;  %v422_v36 = vmul.f32 %v3747_v38, %v370_v28  ;;  %v475_v50 = vadd.f32 %v3761_v44, %v423_v35  ;;  %2262 = vmatpush.bf16.msrb.mxu3 %v3349_v43 }
  0xa6   : > { %3461 = vst [vmem:[#allocation2 + $0x8] sm:$0xff] %v3369_v34   ;;  %v3278_v45 = vld [vmem:[#allocation2] sm:$0xff]  ;;  %1147 = vmatmul.bf16.gmra.mxu1 %v3269_v40  ;;  %v543_v40 = vmax.f32 %v495_v25, 0.0  ;;  %v891_v53 = vmul.f32 %v4011_v21, %v555_v32 }
  0xa7   : > { %v1322_v54 = vshll.u32 %v3278_v45, 16  ;;  %v1320_v8 = vshrl.u32 %v3278_v45, 16  ;;  %v3254_v33 = vld [vmem:[#allocation2] sm:$0xff] }
  0xa8   : > { %1137 = vmatmul.bf16.gmra.mxu0 %v3267_v37  ;;  %v4027_v48 = vpop.permute.xlu2 %754  ;;  %v372_v25 = vld [vmem:[%s3742_s14 + $0x40] sm:$0xff] }
  0xa9   : > { %v795_v51 = vpop.permute.xlu1 %794  ;;  %v740_v52 = vpop.permute.xlu0 %739  ;;  %v1324_v5 = vrot.slane %v1322_v54, 1  ;;  %v392_v54 = vld [vmem:[%s3742_s14 + $0xe0] sm:$0xff] }
  0xaa   : > { %v888_v59 = vmul.f32 %v795_v51, %v552_v41  ;;  %v877_v60 = vmul.f32 %v740_v52, %v541_v42  ;;  %v3336_v41 = vld [vmem:[%s4353_s4 + $0x1a0] sm:$0xff]  ;;  %v3358_v42 = vld [vmem:[%s4353_s4 + $0x228] sm:$0xff]  ;;  %v474_v51 = vadd.f32 %v3761_v44, %v422_v36  ;;  %v444_v63 = vmul.f32 %v3747_v38, %v392_v54 }
  0xab   : > { %v1325_v18 = vor.u32 %v1324_v5, %v1320_v8  ;;  %2076 = vmatpush.bf16.msra.mxu2 %v3336_v41  ;;  %v3324_v52 = vld [vmem:[%s4353_s4 + $0x160] sm:$0xff]  ;;  %2387 = vmatpush.bf16.msra.mxu0 %v3358_v42  ;;  %v3348_v8 = vld [vmem:[%s4353_s4 + $0x1d8] sm:$0xff]  ;;  %v424_v36 = vmul.f32 %v3747_v38, %v372_v25 }
  0xac   : > { %v3439_v55 = vpack.c.bf16 %v889_v56, %v888_v59  ;;  %v3414_v1 = vpack.c.bf16 %v877_v60, %v876_v49  ;;  %v405_v56 = vld [vmem:[%s3742_s14 + $0x148] sm:$0xff]  ;;  %1890 = vmatpush.bf16.msra.mxu1 %v3324_v52  ;;  %v522_v21 = vmax.f32 %v474_v51, 0.0  ;;  %2263 = vmatpush.bf16.msrb.mxu3 %v3348_v8  ;;  %v407_v42 = vld [vmem:[%s3742_s14 + $0x158] sm:$0xff] }
  0xad   : > { %v4039_v3 = vld [vmem:[#allocation2 + $0x8] sm:$0xff]  ;;  %v457_v0 = vmul.f32 %v3747_v38, %v405_v56  ;;  %v3356_v51 = vld [vmem:[%s4353_s4 + $0x218] sm:$0xff]  ;;  %v476_v54 = vadd.f32 %v3761_v44, %v424_v36  ;;  %v406_v56 = vld [vmem:[%s3742_s14 + $0x150] sm:$0xff]  ;;  %v459_v58 = vmul.f32 %v3747_v38, %v407_v42 }
  0xae   : > { %3475 = vst [vmem:[#allocation2 + $0x90] sm:$0xff] %v3439_v55   ;;  %v1327_v9 = vshll.u32 %v4039_v3, 16  ;;  %v393_v60 = vld [vmem:[%s3742_s14 + $0xe8] sm:$0xff]  ;;  %v1331_v6 = vshrl.u32 %v4039_v3, 16  ;;  %v496_v3 = vadd.f32 %v3761_v44, %v444_v63 }
  0xaf   : > { %3470 = vst [vmem:[#allocation2 + $0x60] sm:$0xff] %v3414_v1   ;;  %v523_v1 = vmax.f32 %v475_v50, 0.0  ;;  %v445_v5 = vmul.f32 %v3747_v38, %v393_v60  ;;  %v509_v10 = vadd.f32 %v3761_v44, %v457_v0  ;;  %2388 = vmatpush.bf16.msra.mxu0 %v3357_v7  ;;  %v3255_v32 = vld [vmem:[#allocation2 + $0x8] sm:$0xff]  ;;  %v3334_v50 = vld [vmem:[%s4353_s4 + $0x190] sm:$0xff]  ;;  %v511_v7 = vadd.f32 %v3761_v44, %v459_v58 }
  0xb0   : > { %v4054_v13 = vpop.permute.xlu2 %819  ;;  %v4060_v19 = vrot.slane %v1327_v9, 1  ;;  %v3346_v36 = vld [vmem:[%s4353_s4 + $0x1c8] sm:$0xff] }
  0xb1   : > { %v640_v16 = vpop.permute.xlu1 %639  ;;  %v635_v17 = vpop.permute.xlu0 %634  ;;  %v557_v28 = vmax.f32 %v509_v10, 0.0 }
  0xb2   : > { %v857_v22 = vmul.f32 %v640_v16, %v521_v24  ;;  %v856_v23 = vmul.f32 %v635_v17, %v520_v4  ;;  %v1330_v29 = vsel %vm1318_vm0, %v1325_v18, %v4060_v19  ;;  %v3335_v4 = vld [vmem:[%s4353_s4 + $0x198] sm:$0xff]  ;;  %v1333_v12 = vor.u32 %v1331_v6, %v4060_v19  ;;  %v3347_v6 = vld [vmem:[%s4353_s4 + $0x1d0] sm:$0xff] }
  0xb3   : > { %1419 = vmatmul.bf16.vlgmr.msrb.gmra.mxu2 %v1330_v29  ;;  %v508_v17 = vadd.f32 %v3761_v44, %v456_v2  ;;  %v497_v18 = vadd.f32 %v3761_v44, %v445_v5  ;;  %v544_v19 = vmax.f32 %v496_v3, 0.0  ;;  %v893_v52 = vmul.f32 %v4054_v13, %v557_v28  ;;  %2389 = vmatpush.bf16.msra.mxu0 %v3356_v51  ;;  %v374_v51 = vld [vmem:[%s3742_s14 + $0x50] sm:$0xff] }
  0xb4   : > { %v3374_v30 = vpack.c.bf16 %v857_v22, %v856_v23  ;;  %2077 = vmatpush.bf16.msra.mxu2 %v3335_v4  ;;  %v386_v22 = vld [vmem:[%s3742_s14 + $0xb0] sm:$0xff]  ;;  %v524_v13 = vmax.f32 %v476_v54, 0.0  ;;  %2264 = vmatpush.bf16.msrb.mxu3 %v3347_v6  ;;  %v3529_v6 = vld [vmem:[%s4352_s3] ss:$0 sm:$0xff] }
  0xb5   : > { %v3303_v34 = vld [vmem:[#allocation2 + $0x90] sm:$0xff]  ;;  %v438_v31 = vmul.f32 %v3747_v38, %v386_v22  ;;  %v545_v35 = vmax.f32 %v497_v18, 0.0  ;;  %v880_v41 = vmul.f32 %v4027_v48, %v544_v19  ;;  %v397_v18 = vld [vmem:[%s3742_s14 + $0x108] sm:$0xff] }
  0xb6   : > { %3462 = vst [vmem:[#allocation2 + $0x10] sm:$0xff] %v3374_v30   ;;  %v3291_v37 = vld [vmem:[#allocation2 + $0x60] sm:$0xff]  ;;  %1241 = vmatmul.bf16.vlgmr.msrb.gmra.mxu1 %v3254_v33  ;;  %v425_v30 = vmul.f32 %v3747_v38, %v373_v20  ;;  %v449_v28 = vmul.f32 %v3747_v38, %v397_v18 }
  0xb7   : > { %1564 = vmatmul.bf16.vlgmr.msra.gmra.mxu3 %v3291_v37  ;;  %v3323_v37 = vld [vmem:[%s4353_s4 + $0x158] sm:$0xff]  ;;  %v3353_v18 = vld [vmem:[%s4353_s4 + $0x200] sm:$0xff] }
  0xb8   : > { %v4079_v45 = vpop.permute.xlu2 %764  ;;  %1709 = vmatmul.bf16.vlgmr.msrb.gmra.mxu0 %v3303_v34  ;;  %v556_v34 = vmax.f32 %v508_v17, 0.0  ;;  %1891 = vmatpush.bf16.msra.mxu1 %v3323_v37 }
  0xb9   : > { %v805_v47 = vpop.permute.xlu1 %804  ;;  %v750_v49 = vpop.permute.xlu0 %749  ;;  %2078 = vmatpush.bf16.msra.mxu2 %v3334_v50  ;;  %2265 = vmatpush.bf16.msrb.mxu3 %v3346_v36 }
  0xba   : > { %v890_v57 = vmul.f32 %v805_v47, %v554_v39  ;;  %v879_v59 = vmul.f32 %v750_v49, %v543_v40  ;;  %v394_v39 = vld [vmem:[%s3742_s14 + $0xf0] sm:$0xff]  ;;  %v477_v47 = vadd.f32 %v3761_v44, %v425_v30  ;;  %v490_v49 = vadd.f32 %v3761_v44, %v438_v31 }
  0xbc   : > { %v3444_v61 = vpack.c.bf16 %v891_v53, %v890_v57  ;;  %v3419_v62 = vpack.c.bf16 %v879_v59, %v878_v46  ;;  %v395_v57 = vld [vmem:[%s3742_s14 + $0xf8] sm:$0xff]  ;;  %v446_v59 = vmul.f32 %v3747_v38, %v394_v39  ;;  %v525_v0 = vmax.f32 %v477_v47, 0.0  ;;  %v408_v47 = vld [vmem:[%s3742_s14 + $0x160] sm:$0xff] }
  0xbd   : > { %v4094_v55 = vld [vmem:[#allocation2 + $0x10] sm:$0xff] }
  0xbe   : > { %3476 = vst [vmem:[#allocation2 + $0x98] sm:$0xff] %v3444_v61   ;;  %v1335_v24 = vshll.u32 %v4094_v55, 16  ;;  %v1339_v2 = vshrl.u32 %v4094_v55, 16  ;;  %v498_v4 = vadd.f32 %v3761_v44, %v446_v59 }
  0xbf   : > { %3471 = vst [vmem:[#allocation2 + $0x68] sm:$0xff] %v3419_v62   ;;  %v538_v62 = vmax.f32 %v490_v49, 0.0 }
  0xc0   : > { %v4109_v9 = vpop.permute.xlu2 %829  ;;  %v4114_v14 = vrot.slane %v1335_v24, 1  ;;  %v3322_v24 = vld [vmem:[%s4353_s4 + $0x150] sm:$0xff]  ;;  %v546_v25 = vmax.f32 %v498_v4, 0.0 }
  0xc1   : > { %v650_v26 = vpop.permute.xlu1 %649  ;;  %v645_v11 = vpop.permute.xlu0 %644  ;;  %1892 = vmatpush.bf16.msra.mxu1 %v3322_v24 }
  0xc2   : > { %v859_v15 = vmul.f32 %v650_v26, %v523_v1  ;;  %v858_v16 = vmul.f32 %v645_v11, %v522_v21  ;;  %v1338_v23 = vsel %vm1318_vm0, %v1333_v12, %v4114_v14  ;;  %v458_v1 = vmul.f32 %v3747_v38, %v406_v56 }
  0xc3   : > { %1424 = vmatmul.bf16.gmra.mxu2 %v1338_v23  ;;  %v447_v21 = vmul.f32 %v3747_v38, %v395_v57  ;;  %v1341_v26 = vor.u32 %v1339_v2, %v4114_v14  ;;  %v396_v23 = vld [vmem:[%s3742_s14 + $0x100] sm:$0xff]  ;;  %v559_v14 = vmax.f32 %v511_v7, 0.0  ;;  %v882_v37 = vmul.f32 %v4079_v45, %v546_v25 }
  0xc4   : > { %v3379_v27 = vpack.c.bf16 %v859_v15, %v858_v16  ;;  %v510_v16 = vadd.f32 %v3761_v44, %v458_v1  ;;  %v3320_v1 = vld [vmem:[%s4353_s4 + $0x140] sm:$0xff] }
  0xc5   : > { %v3304_v29 = vld [vmem:[#allocation2 + $0x98] sm:$0xff]  ;;  %v499_v17 = vadd.f32 %v3761_v44, %v447_v21 }
  0xc6   : > { %3463 = vst [vmem:[#allocation2 + $0x18] sm:$0xff] %v3379_v27   ;;  %v3292_v33 = vld [vmem:[#allocation2 + $0x68] sm:$0xff]  ;;  %1246 = vmatmul.bf16.gmra.mxu1 %v3255_v32  ;;  %v558_v31 = vmax.f32 %v510_v16, 0.0 }
  0xc7   : > { %1569 = vmatmul.bf16.gmra.mxu3 %v3292_v33  ;;  %v547_v32 = vmax.f32 %v499_v17, 0.0  ;;  %v448_v33 = vmul.f32 %v3747_v38, %v396_v23  ;;  %v3321_v38 = vld [vmem:[%s4353_s4 + $0x148] sm:$0xff] }
  0xc8   : > { %v4130_v40 = vpop.permute.xlu2 %834  ;;  %1714 = vmatmul.bf16.gmra.mxu0 %v3304_v29  ;;  %v3256_v29 = vld [vmem:[#allocation2 + $0x10] sm:$0xff]  ;;  %1893 = vmatpush.bf16.msra.mxu1 %v3321_v38 }
  0xc9   : > { %v815_v43 = vpop.permute.xlu1 %814  ;;  %v760_v46 = vpop.permute.xlu0 %759  ;;  %v500_v45 = vadd.f32 %v3761_v44, %v448_v33  ;;  %v3530_v33 = vld [vmem:[#allocation2 + $0x4] sm:$0xf0] }
  0xca   : > { %v892_v48 = vmul.f32 %v815_v43, %v556_v34  ;;  %v881_v53 = vmul.f32 %v760_v46, %v545_v35  ;;  %v3333_v34 = vld [vmem:[%s4353_s4 + $0x188] sm:$0xff]  ;;  %v3355_v35 = vld [vmem:[%s4353_s4 + $0x210] sm:$0xff]  ;;  %v501_v46 = vadd.f32 %v3761_v44, %v449_v28 }
  0xcb   : > { %2079 = vmatpush.bf16.msra.mxu2 %v3333_v34  ;;  %2390 = vmatpush.bf16.msra.mxu0 %v3355_v35 }
  0xcc   : > { %v3449_v60 = vpack.c.bf16 %v893_v52, %v892_v48  ;;  %v3424_v61 = vpack.c.bf16 %v881_v53, %v880_v41  ;;  %v895_v41 = vmul.f32 %v4109_v9, %v559_v14  ;;  %v409_v52 = vld [vmem:[%s3742_s14 + $0x168] sm:$0xff]  ;;  %v3528_v9 = vld [vmem:[%s4351_s2] ss:$0 sm:$0xff]  ;;  %1894 = vmatpush.bf16.msra.mxu1 %v3320_v1 }
  0xcd   : > { %v4148_v63 = vld [vmem:[#allocation2 + $0x18] sm:$0xff]  ;;  %v460_v54 = vmul.f32 %v3528_v9, %v408_v47  ;;  %v426_v59 = vmul.f32 %v3528_v9, %v374_v51  ;;  %v461_v58 = vmul.f32 %v3528_v9, %v409_v52  ;;  %v4223_v51 = vld [vmem:[#allocation2 + $0xc] sm:$0xff]  ;;  %v3315_v9 = vld [vmem:[#allocation2 + $0x60] sm:$0xff] }
  0xce   : > { %3477 = vst [vmem:[#allocation2 + $0xa0] sm:$0xff] %v3449_v60   ;;  %v1343_v5 = vshll.u32 %v4148_v63, 16  ;;  %v549_v60 = vmax.f32 %v501_v46, 0.0  ;;  %v1347_v2 = vshrl.u32 %v4148_v63, 16 }
  0xcf   : > { %3472 = vst [vmem:[#allocation2 + $0x70] sm:$0xff] %v3424_v61   ;;  %v548_v61 = vmax.f32 %v500_v45, 0.0  ;;  %v512_v24 = vadd.f32 %v3529_v6, %v460_v54 }
  0xd0   : > { %v725_v8 = vpop.permute.xlu2 %724  ;;  %v4163_v11 = vrot.slane %v1343_v5, 1 }
  0xd1   : > { %v660_v3 = vpop.permute.xlu1 %659  ;;  %v655_v10 = vpop.permute.xlu0 %654  ;;  %v874_v55 = vmul.f32 %v725_v8, %v538_v62  ;;  %v3332_v62 = vld [vmem:[%s4353_s4 + $0x180] sm:$0xff]  ;;  %v478_v8 = vadd.f32 %v3529_v6, %v426_v59  ;;  %v560_v16 = vmax.f32 %v512_v24, 0.0  ;;  %v1989_v59 = vshll.u32 %v4223_v51, 16 }
  0xd2   : > { %v861_v12 = vmul.f32 %v660_v3, %v525_v0  ;;  %v860_v15 = vmul.f32 %v655_v10, %v524_v13  ;;  %v1346_v22 = vsel %vm1318_vm0, %v1341_v26, %v4163_v11  ;;  %v3354_v0 = vld [vmem:[%s4353_s4 + $0x208] sm:$0xff]  ;;  %v3345_v13 = vld [vmem:[%s4353_s4 + $0x1c0] sm:$0xff]  ;;  %2080 = vmatpush.bf16.msra.mxu2 %v3332_v62  ;;  %v513_v3 = vadd.f32 %v3529_v6, %v461_v58 }
  0xd3   : > { %v922_v20 = vpack.c.bf16 %v874_v55, %v874_v55  ;;  %1429 = vmatmul.bf16.gmra.mxu2 %v1346_v22  ;;  %2391 = vmatpush.bf16.msra.mxu0 %v3354_v0  ;;  %v1349_v26 = vor.u32 %v1347_v2, %v4163_v11  ;;  %v526_v23 = vmax.f32 %v478_v8, 0.0  ;;  %v1798_v58 = vshll.u32 %v3315_v9, 16  ;;  %v3531_v0 = vld [vmem:[#allocation2 + $0x4] sm:$0xe] }
  0xd4   : > { %v3384_v27 = vpack.c.bf16 %v861_v12, %v860_v15  ;;  %2266 = vmatpush.bf16.msrb.mxu3 %v3345_v13  ;;  %v561_v25 = vmax.f32 %v513_v3, 0.0  ;;  %v1991_v1 = vrot.slane %v1989_v59, 1 }
  0xd5   : > { %970 = vst [vmem:[#allocation2 + $0x58] sm:$0xf] %v922_v20  ;;  %v3305_v19 = vld [vmem:[#allocation2 + $0xa0] sm:$0xff]  ;;  %v3257_v20 = vld [vmem:[#allocation2 + $0x18] sm:$0xff] }
  0xd6   : > { %3464 = vst [vmem:[#allocation2 + $0x20] sm:$0xff] %v3384_v27   ;;  %v3293_v30 = vld [vmem:[#allocation2 + $0x70] sm:$0xff]  ;;  %1251 = vmatmul.bf16.gmra.mxu1 %v3256_v29  ;;  %v896_v27 = vmul.f32 %v4130_v40, %v560_v16 }
  0xd7   : > { %1574 = vmatmul.bf16.gmra.mxu3 %v3293_v30  ;;  %2392 = vmatpush.bf16.msra.mxu0 %v3353_v18 }
  0xd8   : > { %v785_v39 = vpop.permute.xlu2 %784  ;;  %1719 = vmatmul.bf16.gmra.mxu0 %v3305_v19 }
  0xd9   : > { %v825_v42 = vpop.permute.xlu1 %824  ;;  %v770_v43 = vpop.permute.xlu0 %769 }
  0xda   : > { %v894_v49 = vmul.f32 %v825_v42, %v558_v31  ;;  %v883_v50 = vmul.f32 %v770_v43, %v547_v32  ;;  %v1929_v32 = vld [vmem:[#allocation2 + $0x4] sm:$0xff]  }
  0xdb   : > { %v1984_v54 = vshll.u32 %v1929_v32, 16  ;;  %v1982_v13 = vshrl.u32 %v1929_v32, 16 }
  0xdc   : > { %v3454_v48 = vpack.c.bf16 %v895_v41, %v894_v49  ;;  %v3429_v53 = vpack.c.bf16 %v883_v50, %v882_v37  ;;  %v3340_v50 = vld [vmem:[#allocation2 + $0x34] sm:$0xff] }
  0xdd   : > { %v2842_v56 = vld [vmem:[#allocation2 + $0x20] sm:$0xf]  ;;  %v3282_v57 = vld [vmem:[#allocation2 + $0x20] sm:$0x10]  ;;  %v2168_v6 = vshrl.u32 %v3340_v50, 16 }
  0xde   : > { %3478 = vst [vmem:[#allocation2 + $0xa8] sm:$0xff] %v3454_v48   ;;  %v2843_v44 = vor.u32 %v3282_v57, %v2842_v56  ;;  %v1004_v34 = vld [vmem:[#allocation2 + $0x20] sm:$0xf]  ;;  %v3316_v56 = vld [vmem:[#allocation2 + $0x68] sm:$0xff]  ;;  %v2170_v57 = vshll.u32 %v3340_v50, 16 }
  0xdf   : > { %3473 = vst [vmem:[#allocation2 + $0x78] sm:$0xff] %v3429_v53   ;;  %v1174_v41 = vunpack.c.l.b16 %v1004_v34  ;;  %v4251_v50 = vld [vmem:[#allocation2 + $0x1c] sm:$0xff] }
  0xe0   : > { %v4207_v21 = vpop.permute.xlu2 %2452  ;;  %v1351_v5 = vshll.u32 %v2843_v44, 16  ;;  %v1355_v38 = vshrl.u32 %v2843_v44, 16  ;;  %v1803_v44 = vshll.u32 %v3316_v56, 16  ;;  %v2172_v62 = vrot.slane %v2170_v57, 1 }
  0xe1   : > { %v780_v4 = vpop.permute.xlu1 %779  ;;  %v775_v7 = vpop.permute.xlu0 %774  ;;  %v1179_v43 = vpack.c.b16 %v1174_v41, %v1174_v41 }
  0xe2   : > { %v885_v10 = vmul.f32 %v780_v4, %v549_v60  ;;  %v884_v55 = vmul.f32 %v775_v7, %v548_v61  ;;  %v1353_v12 = vrot.slane %v1351_v5, 1  ;;  %v3341_v60 = vld [vmem:[#allocation2 + $0x3c] sm:$0xff]  ;;  %v1986_v61 = vrot.slane %v1984_v54, 1  ;;  %v3343_v54 = vld [vmem:[#allocation2 + $0x4c] sm:$0xff] }
  0xe3   : > { %v1800_v5 = vrot.slane %v1798_v58, 1  ;;  %v2175_v24 = vshll.u32 %v3341_v60, 16  ;;  %v1796_v7 = vshrl.u32 %v3315_v9, 16  ;;  %v1805_v8 = vrot.slane %v1803_v44, 1 }
  0xe4   : > { %v3434_v63 = vpack.c.bf16 %v885_v10, %v884_v55  ;;  %v1354_v15 = vsel %vm1318_vm0, %v1349_v26, %v1353_v12  ;;  %v1357_v42 = vor.u32 %v1355_v38, %v1353_v12  ;;  %v1987_v4 = vor.u32 %v1986_v61, %v1982_v13 }
  0xe5   : > { %1434 = vmatmul.bf16.gmra.mxu2 %v1354_v15  ;;  %v3306_v17 = vld [vmem:[#allocation2 + $0xa8] sm:$0xff]  ;;  %v2173_v3 = vor.u32 %v2172_v62, %v2168_v6  ;;  %v3532_v55 = vor.u32 %v3531_v0, %v3530_v33  ;;  %v1801_v12 = vor.u32 %v1800_v5, %v1796_v7  ;;  %v2324_v15 = vrot.slane %v4223_v51, 1 }
  0xe6   : > { %3474 = vst [vmem:[#allocation2 + $0x80] sm:$0xff] %v3434_v63   ;;  %v3294_v22 = vld [vmem:[#allocation2 + $0x78] sm:$0xff]  ;;  %1256 = vmatmul.bf16.gmra.mxu1 %v3257_v20  ;;  %v1992_v10 = vsel %vm1318_vm0, %v1987_v4, %v1991_v1  ;;  %v2177_v63 = vrot.slane %v2175_v24, 1  ;;  %v2179_v32 = vshrl.u32 %v3341_v60, 16  ;;  %v2191_v60 = vshll.u32 %v3343_v54, 16 }
  0xe7   : > { %1579 = vmatmul.bf16.gmra.mxu3 %v3294_v22  ;;  %v1806_v16 = vsel %vm1318_vm0, %v1801_v12, %v1805_v8  ;;  %v2323_v18 = vrot.slane %v3532_v55, 1  ;;  %v4236_v20 = vld [vmem:[#allocation2 + $0x14] sm:$0xff]  ;;  %v2328_v7 = vrot.slane %v4251_v50, 1 }
  0xe8   : > { %v4218_v11 = vpop.permute.xlu2 %2467  ;;  %1724 = vmatmul.bf16.gmra.mxu0 %v3306_v17  ;;  %v2178_v17 = vsel %vm1318_vm0, %v2173_v3, %v2177_v63  ;;  %v2001_v57 = vshrl.u32 %v4236_v20, 16  ;;  %v2193_v24 = vrot.slane %v2191_v60, 1 }
  0xe9   : > { %v665_v14 = vpop.permute.xlu1 %664  ;;  %v840_v19 = vpop.permute.xlu0 %839 }
  0xea   : > { %v862_v28 = vmul.f32 %v665_v14, %v526_v23  ;;  %v897_v29 = vmul.f32 %v840_v19, %v561_v25  ;;  %v2325_v23 = vsel %vm2322_vm1, %v2323_v18, %v2324_v15  ;;  %v3317_v25 = vld [vmem:[#allocation2 + $0x70] sm:$0xff]  ;;  %v3342_v19 = vld [vmem:[#allocation2 + $0x44] sm:$0xff] }
  0xeb   : > { %v2183_v33 = vshll.u32 %v3342_v19, 16  ;;  %v2187_v58 = vshrl.u32 %v3342_v19, 16  ;;  %v1815_v44 = vshrl.u32 %v3317_v25, 16 }
  0xec   : > { %v910_v30 = vpack.c.bf16 %v862_v28, %v862_v28  ;;  %v3459_v31 = vpack.c.bf16 %v897_v29, %v896_v27  ;;  %v1997_v27 = vshll.u32 %v4236_v20, 16  ;;  %v1811_v28 = vshll.u32 %v3317_v25, 16 }
  0xed   : > { %v1462_v35 = vld [vmem:[#allocation2 + $0x80] sm:$0xf]  ;;  %v1993_v29 = vshrl.u32 %v4223_v51, 16  ;;  %v3318_v51 = vld [vmem:[#allocation2 + $0x78] sm:$0xff] }
  0xee   : > { %958 = vst [vmem:[#allocation2 + $0x28] sm:$0xf] %v910_v30  ;;  %v1497_v40 = vunpack.c.l.b16 %v1462_v35  ;;  %v1999_v30 = vrot.slane %v1997_v27, 1  ;;  %v1807_v35 = vshrl.u32 %v3316_v56, 16  ;;  %v1819_v56 = vshll.u32 %v3318_v51, 16 }
  0xef   : > { %3479 = vst [vmem:[#allocation2 + $0xb0] sm:$0xff] %v3459_v31   ;;  %v1995_v34 = vor.u32 %v1993_v29, %v1991_v1  ;;  %v3038_v12 = vld [vmem:[#allocation2 + $0x80] sm:$0xf] }
  0xf0   : > { %v4221_v36 = vpop.permute.xlu2 %2482  ;;  %v1502_v46 = vpack.c.b16 %v1497_v40, %v1497_v40  ;;  %v2003_v61 = vor.u32 %v2001_v57, %v1999_v30  ;;  %v1821_v62 = vrot.slane %v1819_v56, 1 }
  0xf1   : > { %v730_v37 = vpop.permute.xlu1 %729  ;;  %v670_v39 = vpop.permute.xlu0 %669  ;;  %v2000_v38 = vsel %vm1318_vm0, %v1995_v34, %v1999_v30 }
  0xf2   : > { %v1813_v37 = vrot.slane %v1811_v28, 1  ;;  %v2181_v39 = vor.u32 %v2179_v32, %v2177_v63  ;;  %v3319_v63 = vld [vmem:[#allocation2 + $0x80] sm:$0x10]  ;;  %v2009_v28 = vshrl.u32 %v4251_v50, 16 }
  0xf3   : > { %v3039_v18 = vor.u32 %v3319_v63, %v3038_v12 }
  0xf4   : > { %v1817_v6 = vor.u32 %v1815_v44, %v1813_v37 }
  0xf5   : > { %1439 = vmatmul.bf16.gmra.mxu2 %v1357_v42  ;;  %v1809_v42 = vor.u32 %v1807_v35, %v1805_v8  ;;  %v3331_v4 = vld [vmem:[#allocation2 + $0x24] sm:$0x10] }
  0xf6   : > { %v1607_v47 = vld [vmem:[#allocation2 + $0xb0] sm:$0xf]  ;;  %1261 = vmatmul.bf16.gmra.mxu1 %v1179_v43  ;;  %v2185_v43 = vrot.slane %v2183_v33, 1  ;;  %v1822_v8 = vsel %vm1318_vm0, %v1817_v6, %v1821_v62  ;;  %v2195_v33 = vshrl.u32 %v3343_v54, 16 }
  0xf7   : > { %v1642_v49 = vunpack.c.l.b16 %v1607_v47  ;;  %1584 = vmatmul.bf16.gmra.mxu3 %v1502_v46  ;;  %v2326_v46 = vrot.slane %v4236_v20, 1  ;;  %v1814_v47 = vsel %vm1318_vm0, %v1809_v42, %v1813_v37 }
  0xf8   : > { %v850_v45 = vpop.permute.xlu2 %849  ;;  %v2189_v0 = vor.u32 %v2187_v58, %v2185_v43 }
  0xf9   : > { %v4225_v52 = vpop.permute.xlu1 %2447  ;;  %v790_v48 = vpop.permute.xlu0 %789  ;;  %v1647_v53 = vpack.c.b16 %v1642_v49, %v1642_v49  ;;  %v2186_v49 = vsel %vm1318_vm0, %v2181_v39, %v2185_v43  ;;  %v2327_v45 = vsel %vm2322_vm1, %v2324_v15, %v2326_v46  ;;  %v3344_v15 = vld [vmem:[#allocation2 + $0x54] sm:$0x10] }
  0xfa   : > { %v2005_v48 = vshll.u32 %v4251_v50, 16  ;;  %v2194_v3 = vsel %vm1318_vm0, %v2189_v0, %v2193_v24 }
  0xfb   : > { %1729 = vmatmul.bf16.gmra.mxu0 %v1647_v53 }
  0xfc   : > { %v2007_v59 = vrot.slane %v2005_v48, 1 }
  0xfe   : > { %v2008_v13 = vsel %vm1318_vm0, %v2003_v61, %v2007_v59  ;;  %v2011_v30 = vor.u32 %v2009_v28, %v2007_v59 }
 0x101   : > { %v4228_v2 = vpop.permute.xlu1 %2462 }
 0x104   : > { %v4231_v26 = vpop.f32.mrf.mxu2 }
 0x105   : > { %2081 = vmatmul.bf16.vlgmr.msra.gmra.mxu2 %v1992_v10  ;;  %v3102_v10 = vld [vmem:[#allocation2 + $0x24] sm:$0xf] }
 0x106   : > { %1895 = vmatmul.bf16.vlgmr.msra.gmra.mxu1 %v1806_v16  ;;  %v3103_v55 = vor.u32 %v3331_v4, %v3102_v10  ;;  %v2329_v16 = vsel %vm2322_vm1, %v2326_v46, %v2328_v7 }
 0x107   : > { %2267 = vmatmul.bf16.vlgmr.msrb.gmra.mxu3 %v2178_v17  ;;  %v3170_v17 = vld [vmem:[#allocation2 + $0x54] sm:$0xf] }
 0x108   : > { %v3171_v20 = vor.u32 %v3344_v15, %v3170_v17  ;;  %v2330_v46 = vrot.slane %v3103_v55, 1  ;;  %v2017_v61 = vshrl.u32 %v3103_v55, 16 }
 0x109   : > { %v4238_v22 = vpop.permute.xlu1 %2477 }
 0x10a   : > { %v2199_v19 = vshll.u32 %v3171_v20, 16  ;;  %v2203_v6 = vshrl.u32 %v3171_v20, 16 }
 0x10b   : > { %2393 = vmatmul.bf16.vlgmr.msra.gmra.mxu0 %v2325_v23  ;;  %v2013_v23 = vshll.u32 %v3103_v55, 16 }
 0x10c   : > { %v1155_v14 = vpop.f32.mrf.mxu2  ;;  %v2201_v34 = vrot.slane %v2199_v19, 1 }
 0x10d   : > { %v1827_v14 = vshll.u32 %v3039_v18, 16  ;;  %v2015_v29 = vrot.slane %v2013_v23, 1 }
 0x10f   : > { %v1829_v32 = vrot.slane %v1827_v14, 1  ;;  %v2016_v35 = vsel %vm1318_vm0, %v2011_v30, %v2015_v29 }
 0x111   : > { %v845_v31 = vpop.permute.xlu1 %844 }
 0x112   : > { %v1823_v31 = vshrl.u32 %v3318_v51, 16  ;;  %v2331_v51 = vsel %vm2322_vm1, %v2328_v7, %v2330_v46 }
 0x113   : > { %v4246_v40 = vpop.f32.mrf.mxu1 }
 0x114   : > { %v1825_v39 = vor.u32 %v1823_v31, %v1821_v62  ;;  %v2019_v62 = vor.u32 %v2017_v61, %v2015_v29 }
 0x115   : > { %v4244_v41 = vpop.f32.mrf.mxu0  ;;  %2086 = vmatmul.bf16.gmra.mxu2 %v2000_v38  ;;  %v2197_v38 = vor.u32 %v2195_v33, %v2193_v24 }
 0x116   : > { %1900 = vmatmul.bf16.gmra.mxu1 %v1814_v47 }
 0x117   : > { %2272 = vmatmul.bf16.gmra.mxu3 %v2186_v49  ;;  %v1830_v49 = vsel %vm1318_vm0, %v1825_v39, %v1829_v32  ;;  %v2202_v50 = vsel %vm1318_vm0, %v2197_v38, %v2201_v34 }
 0x11b   : > { %2398 = vmatmul.bf16.gmra.mxu0 %v2327_v45  ;;  %v4257_v9 = vpop.f32.mrf.mxu1 }
 0x11d   : > { %v4255_v53 = vpop.f32.mrf.mxu0 }
 0x123   : > { %v4263_v5 = vpop.f32.mrf.mxu1 }
 0x125   : > { %v4261_v1 = vpop.f32.mrf.mxu0  ;;  %2091 = vmatmul.bf16.gmra.mxu2 %v2008_v13  ;;  %v1831_v13 = vshrl.u32 %v3039_v18, 16 }
 0x126   : > { %1905 = vmatmul.bf16.gmra.mxu1 %v1822_v8 }
 0x127   : > { %2277 = vmatmul.bf16.gmra.mxu3 %v2194_v3  ;;  %v1833_v8 = vor.u32 %v1831_v13, %v1829_v32  ;;  %v2205_v3 = vor.u32 %v2203_v6, %v2201_v34 }
 0x12b   : > { %2403 = vmatmul.bf16.gmra.mxu0 %v2329_v16  ;;  %v4269_v27 = vpop.f32.mrf.mxu1 }
 0x12d   : > { %v1140_v25 = vpop.f32.mrf.mxu0 }
 0x133   : > { %v1242_v37 = vpop.f32.mrf.mxu1 }
 0x134   : > { %v1243_v42 = vadd.f32 %v1242_v37, %v4244_v41 }
 0x135   : > { %2096 = vmatmul.bf16.gmra.mxu2 %v2016_v35  ;;  %v1710_v43 = vpop.f32.mrf.mxu0 }
 0x136   : > { %v1420_v47 = vpop.f32.mrf.mxu2  ;;  %1910 = vmatmul.bf16.gmra.mxu1 %v1830_v49 }
 0x137   : > { %v1444_v45 = vadd.f32 %v1420_v47, %v1243_v42  ;;  %2282 = vmatmul.bf16.gmra.mxu3 %v2202_v50 }
 0x13a   : > { %v1565_v48 = vpop.f32.mrf.mxu3 }
 0x13b   : > { %2408 = vmatmul.bf16.gmra.mxu0 %v2331_v51  ;;  %v1589_v54 = vadd.f32 %v1565_v48, %v1444_v45  ;;  %v1244_v56 = vpop.f32.mrf.mxu1 }
 0x13c   : > { %v1245_v57 = vadd.f32 %v1244_v56, %v4255_v53 }
 0x13d   : > { %v1712_v59 = vpop.f32.mrf.mxu0  ;;  %v4278_v41 = vadd.f32 %v1710_v43, %v1589_v54 }
 0x13e   : > { %v1422_v58 = vpop.f32.mrf.mxu2 }
 0x13f   : > { %v1445_v60 = vadd.f32 %v1422_v58, %v1245_v57 }
 0x142   : > { %v1567_v44 = vpop.f32.mrf.mxu3 }
 0x143   : > { %v1590_v0 = vadd.f32 %v1567_v44, %v1445_v60  ;;  %v1247_v24 = vpop.f32.mrf.mxu1 }
 0x144   : > { %v1248_v4 = vadd.f32 %v1247_v24, %v4261_v1 }
 0x145   : > { %2101 = vmatmul.bf16.gmra.mxu2 %v2019_v62  ;;  %v1715_v7 = vpop.f32.mrf.mxu0  ;;  %v4281_v10 = vadd.f32 %v1712_v59, %v1590_v0 }
 0x146   : > { %v1425_v53 = vpop.f32.mrf.mxu2  ;;  %1915 = vmatmul.bf16.gmra.mxu1 %v1833_v8 }
 0x147   : > { %v1446_v12 = vadd.f32 %v1425_v53, %v1248_v4  ;;  %2287 = vmatmul.bf16.gmra.mxu3 %v2205_v3 }
 0x14a   : > { %v1570_v55 = vpop.f32.mrf.mxu3 }
 0x14b   : > { %2413 = vmatmul.bf16.gmra.mxu0 %v2330_v46  ;;  %v1591_v63 = vadd.f32 %v1570_v55, %v1446_v12  ;;  %v1249_v15 = vpop.f32.mrf.mxu1 }
 0x14c   : > { %v1250_v16 = vadd.f32 %v1249_v15, %v1140_v25 }
 0x14d   : > { %v1717_v17 = vpop.f32.mrf.mxu0  ;;  %v4283_v18 = vadd.f32 %v1715_v7, %v1591_v63 }
 0x14e   : > { %v1427_v20 = vpop.f32.mrf.mxu2 }
 0x14f   : > { %v1447_v23 = vadd.f32 %v1427_v20, %v1250_v16 }
 0x152   : > { %v1572_v1 = vpop.f32.mrf.mxu3 }
 0x153   : > { %v1592_v14 = vadd.f32 %v1572_v1, %v1447_v23  ;;  %v1252_v19 = vpop.f32.mrf.mxu1 }
 0x154   : > { %v1253_v28 = vadd.f32 %v1252_v19, %v4246_v40 }
 0x155   : > { %v1720_v29 = vpop.f32.mrf.mxu0  ;;  %v4286_v30 = vadd.f32 %v1717_v17, %v1592_v14 }
 0x156   : > { %v1430_v31 = vpop.f32.mrf.mxu2 }
 0x157   : > { %v1448_v32 = vadd.f32 %v1430_v31, %v1253_v28 }
 0x15a   : > { %v1575_v33 = vpop.f32.mrf.mxu3 }
 0x15b   : > { %v1593_v34 = vadd.f32 %v1575_v33, %v1448_v32  ;;  %v1254_v35 = vpop.f32.mrf.mxu1 }
 0x15c   : > { %v1255_v25 = vadd.f32 %v1254_v35, %v4257_v9 }
 0x15d   : > { %v1722_v37 = vpop.f32.mrf.mxu0  ;;  %v4289_v39 = vadd.f32 %v1720_v29, %v1593_v34 }
 0x15e   : > { %v1432_v38 = vpop.f32.mrf.mxu2 }
 0x15f   : > { %v1449_v42 = vadd.f32 %v1432_v38, %v1255_v25 }
 0x162   : > { %v1577_v43 = vpop.f32.mrf.mxu3 }
 0x163   : > { %v1594_v46 = vadd.f32 %v1577_v43, %v1449_v42  ;;  %v1257_v47 = vpop.f32.mrf.mxu1 }
 0x164   : > { %v1258_v40 = vadd.f32 %v1257_v47, %v4263_v5 }
 0x165   : > { %v1725_v49 = vpop.f32.mrf.mxu0  ;;  %v4292_v50 = vadd.f32 %v1722_v37, %v1594_v46 }
 0x168   : > { %v1435_v45 = vpop.f32.mrf.mxu2 }
 0x169   : > { %v1450_v51 = vadd.f32 %v1435_v45, %v1258_v40 }
 0x16a   : > { %v1580_v48 = vpop.f32.mrf.mxu3 }
 0x16b   : > { %v1595_v54 = vadd.f32 %v1580_v48, %v1450_v51  ;;  %v1259_v56 = vpop.f32.mrf.mxu1 }
 0x16c   : > { %v1260_v9 = vadd.f32 %v1259_v56, %v4269_v27 }
 0x16d   : > { %v4295_v57 = vadd.f32 %v1725_v49, %v1595_v54  ;;  %v1727_v59 = vpop.f32.mrf.mxu0 }
 0x170   : > { %v1437_v58 = vpop.f32.mrf.mxu2 }
 0x171   : > { %v1451_v60 = vadd.f32 %v1437_v58, %v1260_v9 }
 0x172   : > { %v1582_v61 = vpop.f32.mrf.mxu3 }
 0x173   : > { %v1596_v44 = vadd.f32 %v1582_v61, %v1451_v60  ;;  %v1262_v62 = vpop.f32.mrf.mxu1 }
 0x174   : > { %v1263_v5 = vadd.f32 %v1262_v62, %v4231_v26 }
 0x175   : > { %v4297_v0 = vadd.f32 %v1727_v59, %v1596_v44 }
 0x178   : > { %v1730_v13 = vpop.f32.mrf.mxu0  ;;  %v1440_v6 = vpop.f32.mrf.mxu2 }
 0x179   : > { %v1452_v24 = vadd.f32 %v1440_v6, %v1263_v5 }
 0x17a   : > { %v1585_v4 = vpop.f32.mrf.mxu3 }
 0x17b   : > { %v1597_v7 = vadd.f32 %v1585_v4, %v1452_v24  ;;  %v1264_v8 = vpop.f32.mrf.mxu1 }
 0x17d   : > { %v4300_v27 = vadd.f32 %v1730_v13, %v1597_v7 }
 0x180   : > { %v1732_v3 = vpop.f32.mrf.mxu0  ;;  %v1442_v53 = vpop.f32.mrf.mxu2 }
 0x182   : > { %v1587_v12 = vpop.f32.mrf.mxu3 }
 0x183   : > { %v1896_v55 = vpop.f32.mrf.mxu1 }
 0x184   : > { %v1920_v63 = vadd.f32 %v1896_v55, %v4278_v41 }
 0x188   : > { %v2394_v15 = vpop.f32.mrf.mxu0  ;;  %v2082_v16 = vpop.f32.mrf.mxu2 }
 0x189   : > { %v2106_v17 = vadd.f32 %v2082_v16, %v1920_v63 }
 0x18a   : > { %v2268_v26 = vpop.f32.mrf.mxu3 }
 0x18b   : > { %v2292_v20 = vadd.f32 %v2268_v26, %v2106_v17  ;;  %v1898_v23 = vpop.f32.mrf.mxu1 }
 0x18c   : > { %v1921_v14 = vadd.f32 %v1898_v23, %v4281_v10 }
 0x18d   : > { %v2418_v1 = vadd.f32 %v2394_v15, %v2292_v20 }
 0x18f   : > { %2427 = vst [vmem:[%s4307_s22] sm:$0xff] %v2418_v1  ;;  %v2490_v33 = vmul.f32 %v4225_v52, %v2418_v1  ;;  %v2458_v52 = vpop.permute.xlu0 %2457 }
 0x190   : > { %v2396_v19 = vpop.f32.mrf.mxu0  ;;  %v2084_v41 = vpop.f32.mrf.mxu2 }
 0x191   : > { %v2107_v28 = vadd.f32 %v2084_v41, %v1921_v14  ;;  %v2518_v10 = vmul.f32 %v2490_v33, %v2490_v33 }
 0x192   : > { %v2270_v29 = vpop.f32.mrf.mxu3 }
 0x193   : > { %v2293_v31 = vadd.f32 %v2270_v29, %v2107_v28  ;;  %v1901_v32 = vpop.f32.mrf.mxu1 }
 0x194   : > { %v1922_v35 = vadd.f32 %v1901_v32, %v4283_v18 }
 0x195   : > { %v2419_v34 = vadd.f32 %v2396_v19, %v2293_v31 }
 0x197   : > { %2428 = vst [vmem:[%s4307_s22 + $0x8] sm:$0xff] %v2419_v34  ;;  %v2491_v25 = vmul.f32 %v4207_v21, %v2419_v34  ;;  %v2473_v41 = vpop.permute.xlu0 %2472 }
 0x198   : > { %v2399_v37 = vpop.f32.mrf.mxu0  ;;  %v2087_v38 = vpop.f32.mrf.mxu2 }
 0x199   : > { %v2108_v42 = vadd.f32 %v2087_v38, %v1922_v35  ;;  %v2500_v43 = vadd.f32 %v2491_v25, %v2490_v33  ;;  %v2519_v46 = vmul.f32 %v2491_v25, %v2491_v25 }
 0x19a   : > { %v2273_v47 = vpop.f32.mrf.mxu3 }
 0x19b   : > { %v2527_v40 = vadd.f32 %v2519_v46, %v2518_v10  ;;  %v2294_v49 = vadd.f32 %v2273_v47, %v2108_v42  ;;  %v1903_v45 = vpop.f32.mrf.mxu1 }
 0x19c   : > { %v1923_v48 = vadd.f32 %v1903_v45, %v4286_v30 }
 0x19d   : > { %v2420_v51 = vadd.f32 %v2399_v37, %v2294_v49 }
 0x19f   : > { %2429 = vst [vmem:[%s4307_s22 + $0x10] sm:$0xff] %v2420_v51  ;;  %v2492_v18 = vmul.f32 %v2458_v52, %v2420_v51 }
 0x1a0   : > { %v2401_v54 = vpop.f32.mrf.mxu0  ;;  %v2089_v56 = vpop.f32.mrf.mxu2 }
 0x1a1   : > { %v2109_v21 = vadd.f32 %v2089_v56, %v1923_v48  ;;  %v2501_v9 = vadd.f32 %v2500_v43, %v2492_v18  ;;  %v2520_v59 = vmul.f32 %v2492_v18, %v2492_v18 }
 0x1a2   : > { %v2275_v58 = vpop.f32.mrf.mxu3 }
 0x1a3   : > { %v2528_v60 = vadd.f32 %v2527_v40, %v2520_v59  ;;  %v2295_v61 = vadd.f32 %v2275_v58, %v2109_v21  ;;  %v1906_v44 = vpop.f32.mrf.mxu1 }
 0x1a4   : > { %v1924_v5 = vadd.f32 %v1906_v44, %v4289_v39 }
 0x1a5   : > { %v2421_v62 = vadd.f32 %v2401_v54, %v2295_v61 }
 0x1a7   : > { %2430 = vst [vmem:[%s4307_s22 + $0x18] sm:$0xff] %v2421_v62  ;;  %v2493_v13 = vmul.f32 %v4228_v2, %v2421_v62  ;;  %v2488_v62 = vpop.permute.xlu0 %2487 }
 0x1a8   : > { %v2404_v6 = vpop.f32.mrf.mxu0  ;;  %v2092_v30 = vpop.f32.mrf.mxu2 }
 0x1a9   : > { %v2110_v24 = vadd.f32 %v2092_v30, %v1924_v5  ;;  %v2502_v4 = vadd.f32 %v2501_v9, %v2493_v13  ;;  %v2521_v7 = vmul.f32 %v2493_v13, %v2493_v13 }
 0x1aa   : > { %v2278_v8 = vpop.f32.mrf.mxu3 }
 0x1ab   : > { %v2529_v3 = vadd.f32 %v2528_v60, %v2521_v7  ;;  %v2296_v53 = vadd.f32 %v2278_v8, %v2110_v24  ;;  %v1908_v12 = vpop.f32.mrf.mxu1 }
 0x1ac   : > { %v1925_v63 = vadd.f32 %v1908_v12, %v4292_v50 }
 0x1ad   : > { %v2422_v55 = vadd.f32 %v2404_v6, %v2296_v53 }
 0x1af   : > { %2431 = vst [vmem:[%s4307_s22 + $0x20] sm:$0xff] %v2422_v55  ;;  %v2494_v15 = vmul.f32 %v4218_v11, %v2422_v55 }
 0x1b0   : > { %v2406_v39 = vpop.f32.mrf.mxu0  ;;  %v2094_v16 = vpop.f32.mrf.mxu2 }
 0x1b1   : > { %v2111_v17 = vadd.f32 %v2094_v16, %v1925_v63  ;;  %v2503_v2 = vadd.f32 %v2502_v4, %v2494_v15  ;;  %v2522_v26 = vmul.f32 %v2494_v15, %v2494_v15 }
 0x1b2   : > { %v2280_v20 = vpop.f32.mrf.mxu3 }
 0x1b3   : > { %v2530_v23 = vadd.f32 %v2529_v3, %v2522_v26  ;;  %v2297_v1 = vadd.f32 %v2280_v20, %v2111_v17  ;;  %v1911_v14 = vpop.f32.mrf.mxu1 }
 0x1b4   : > { %v1926_v28 = vadd.f32 %v1911_v14, %v4295_v57 }
 0x1b5   : > { %v2423_v19 = vadd.f32 %v2406_v39, %v2297_v1 }
 0x1b7   : > { %2432 = vst [vmem:[%s4307_s22 + $0x28] sm:$0xff] %v2423_v19  ;;  %v2495_v29 = vmul.f32 %v2473_v41, %v2423_v19 }
 0x1b8   : > { %v2409_v50 = vpop.f32.mrf.mxu0  ;;  %v2097_v31 = vpop.f32.mrf.mxu2 }
 0x1b9   : > { %v2112_v32 = vadd.f32 %v2097_v31, %v1926_v28  ;;  %v2504_v11 = vadd.f32 %v2503_v2, %v2495_v29  ;;  %v2523_v33 = vmul.f32 %v2495_v29, %v2495_v29 }
 0x1ba   : > { %v2283_v34 = vpop.f32.mrf.mxu3 }
 0x1bb   : > { %v2531_v35 = vadd.f32 %v2530_v23, %v2523_v33  ;;  %v2298_v25 = vadd.f32 %v2283_v34, %v2112_v32  ;;  %v1913_v37 = vpop.f32.mrf.mxu1 }
 0x1bc   : > { %v1927_v42 = vadd.f32 %v1913_v37, %v4297_v0 }
 0x1bd   : > { %v2424_v38 = vadd.f32 %v2409_v50, %v2298_v25 }
 0x1bf   : > { %2433 = vst [vmem:[%s4307_s22 + $0x30] sm:$0xff] %v2424_v38  ;;  %v2496_v10 = vmul.f32 %v4238_v22, %v2424_v38 }
 0x1c0   : > { %v2411_v43 = vpop.f32.mrf.mxu0  ;;  %v2099_v57 = vpop.f32.mrf.mxu2 }
 0x1c1   : > { %v2113_v46 = vadd.f32 %v2099_v57, %v1927_v42  ;;  %v2505_v47 = vadd.f32 %v2504_v11, %v2496_v10  ;;  %v2524_v40 = vmul.f32 %v2496_v10, %v2496_v10 }
 0x1c2   : > { %v2285_v49 = vpop.f32.mrf.mxu3 }
 0x1c3   : > { %v2532_v45 = vadd.f32 %v2531_v35, %v2524_v40  ;;  %v2299_v51 = vadd.f32 %v2285_v49, %v2113_v46  ;;  %v1916_v52 = vpop.f32.mrf.mxu1 }
 0x1c4   : > { %v1928_v18 = vadd.f32 %v1916_v52, %v4300_v27 }
 0x1c5   : > { %v2425_v48 = vadd.f32 %v2411_v43, %v2299_v51 }
 0x1c7   : > { %2434 = vst [vmem:[%s4307_s22 + $0x38] sm:$0xff] %v2425_v48  ;;  %v2497_v54 = vmul.f32 %v4221_v36, %v2425_v48 }
 0x1c8   : > { %v2414_v0 = vpop.f32.mrf.mxu0  ;;  %v2102_v56 = vpop.f32.mrf.mxu2 }
 0x1c9   : > { %v2114_v21 = vadd.f32 %v2102_v56, %v1928_v18  ;;  %v2506_v22 = vadd.f32 %v2505_v47, %v2497_v54  ;;  %v2525_v9 = vmul.f32 %v2497_v54, %v2497_v54 }
 0x1ca   : > { %v2288_v59 = vpop.f32.mrf.mxu3 }
 0x1cb   : > { %v2533_v58 = vadd.f32 %v2532_v45, %v2525_v9  ;;  %v2300_v60 = vadd.f32 %v2288_v59, %v2114_v21  ;;  %v1918_v61 = vpop.f32.mrf.mxu1 }
 0x1cd   : > { %v2426_v44 = vadd.f32 %v2414_v0, %v2300_v60 }
 0x1cf   : > { %2435 = vst [vmem:[%s4307_s22 + $0x40] sm:$0xff] %v2426_v44  ;;  %v2498_v5 = vmul.f32 %v2488_v62, %v2426_v44 }
 0x1d0   : > { %v2416_v13 = vpop.f32.mrf.mxu0  ;;  %v2104_v6 = vpop.f32.mrf.mxu2 }
 0x1d1   : > { %v2507_v27 = vadd.f32 %v2506_v22, %v2498_v5  ;;  %v2526_v30 = vmul.f32 %v2498_v5, %v2498_v5 }
 0x1d2   : > { %v2290_v36 = vpop.f32.mrf.mxu3 }
 0x1d3   : > { %v2508_v24 = vrot.slane %v2507_v27, 4  ;;  %v2534_v4 = vadd.f32 %v2533_v58, %v2526_v30 }
 0x1d5   : > { %v2509_v7 = vadd.f32 %v2508_v24, %v2507_v27  ;;  %v2535_v8 = vrot.slane %v2534_v4, 4 }
 0x1d7   : > { %v2510_v3 = vrot.slane %v2509_v7, 2  ;;  %v2536_v53 = vadd.f32 %v2535_v8, %v2534_v4 }
 0x1d9   : > { %v2511_v12 = vadd.f32 %v2510_v3, %v2509_v7  ;;  %v2537_v55 = vrot.slane %v2536_v53, 2 }
 0x1db   : > { %v2512_v63 = vrot.slane %v2511_v12, 1  ;;  %v2538_v15 = vadd.f32 %v2537_v55, %v2536_v53 }
 0x1dd   : > { %v2513_v39 = vadd.f32 %v2512_v63, %v2511_v12  ;;  %v2539_v16 = vrot.slane %v2538_v15, 1 }
 0x1df   : > { %2517 = vst [vmem:[%s356_s25] sm:$0x1] %v2513_v39  ;;  %v2540_v17 = vadd.f32 %v2539_v16, %v2538_v15 }
 0x1e1   : > { %2542 = vst [vmem:[%s359_s9] sm:$0x1] %v2540_v17 }
 0x1e2 PF: > { %s19_s29 = sadd.s32 1, %s3555_s29   ;;  %s4358_s27 = smov %s3551_s28 }
 0x1e3   : > { %p16_p5 = scmp.ge.s32.totalorder %s19_s29, 4   ;;  %s4359_s28 = smov %s4361_s30 }
 0x1e5   :  { %18 = sbr.rel (!%p16_p5) target bundleno = 2 (0x2), region = 118 }

// kernel: basic_block_forward.7
= control target key start
LH: loop header
LB: loop body
LE: loop exit
PB: predicated region body
PF: predicated region fallthrough
CT: control target
= control target key end

     0   :  { %s2736_s21 = smov 0   ;;  %s2738_s22 = smov 0   ;;  %s3345_s0 = inlined_call_operand.vmem [shape: f32[2,1,120,128], index: 0, kind: input, shape index: {}]   ;;  %s3346_s1 = inlined_call_operand.vmem [shape: f32[1,120,1], index: 1, kind: input, shape index: {}]   ;;  %s3347_s2 = inlined_call_operand.vmem [shape: f32[1,1,128], index: 2, kind: input, shape index: {}]   ;;  %s3348_s3 = inlined_call_operand.vmem [shape: f32[1,1,128], index: 3, kind: input, shape index: {}]   ;;  %s3349_s4 = inlined_call_operand.vmem [shape: bf16[9,128,128], index: 4, kind: input, shape index: {}]   ;;  %s3350_s5 = inlined_call_operand.vmem [shape: f32[2,80,128], index: 5, kind: input, shape index: {}]   ;;  %s3351_s6 = inlined_call_operand.vmem [shape: f32[2,80,128], index: 6, kind: output, shape index: {}]  }
   0x1   :  { %s2740_s23 = smov 0  }
   0x2 LB: > { %s28_s24 = sadd.s32 1, %s2694_s22  ;;  %p2026_p0 = scmp.ge.s32.totalorder %s2698_s23, 1  ;;  %s2698_s23 = sphi %s2740_s23, %s16_s23   ;;  %s2694_s22 = sphi %s2738_s22, %s3353_s22   ;;  %s2690_s21 = sphi %s2736_s21, %s3352_s21  }
   0x3   : > { %p30_p1 = scmp.ge.s32.totalorder %s28_s24, 2  ;;  %p250_p2 = scmp.lt.s32.totalorder %s2698_s23, 3 }
   0x5   : > { %s3355_s24 = smov (%p30_p1, %s28_s24), 0  ;;  %p251_p3 = pnand %p2026_p0, %p250_p2 }
   0x6   : > { %p295_p4 = scmp.lt.s32.totalorder (!%p251_p3), %s2690_s21, 1 }
   0x7   : > { %254 = sbr.rel (%p251_p3) target bundleno = 483 (0x1e3), region = 44 }
   0xc   : > { %v398_v0 = vld [vmem:[%s3346_s1 + $0x30] sm:$0xff]  ;;  %v396_v1 = vld [vmem:[%s3346_s1 + $0x20] sm:$0xff]  ;;  %v2700_v3 = vmov 0   ;;  %v399_v4 = vld [vmem:[%s3346_s1 + $0x38] sm:$0xff]  ;;  %s3357_s21 = smov (!%p295_p4, %s2690_s21), 1  ;;  %vm839_vm1 = vcmask 1046528  }
   0xd   : > { %v392_v2 = vld [vmem:[%s3346_s1] sm:$0xff]  ;;  %2673 = vset.pattern.permute.xlu2 %v2700_v3  ;;  %2672 = vset.pattern.permute.xlu1 %v2700_v3  ;;  %v397_v5 = vld [vmem:[%s3346_s1 + $0x28] sm:$0xff]  ;;  %v395_v7 = vld [vmem:[%s3346_s1 + $0x18] sm:$0xff]  ;;  %s2644_s11 = smul.u32 120, %s3357_s21  ;;  %vm599_vm0 = vsmask.f32 7424 }
   0xe   : > { %2671 = vset.pattern.permute.xlu0 %v2700_v3  ;;  %439 = vperm.xlu1 %2672, %v398_v0   ;;  %v393_v6 = vld [vmem:[%s3346_s1 + $0x8] sm:$0xff]  ;;  %v394_v8 = vld [vmem:[%s3346_s1 + $0x10] sm:$0xff]  ;;  %v400_v9 = vld [vmem:[%s3346_s1 + $0x40] sm:$0xff]  ;;  %vm1305_vm2 = vcmask 1045504   ;;  %vm1133_vm3 = vsmask.f32 6400 }
   0xf   : > { %429 = vperm.xlu0 %2671, %v396_v1   ;;  %409 = vperm.xlu2 %2673, %v392_v2   ;;  %v402_v10 = vld [vmem:[%s3346_s1 + $0x50] sm:$0xff]  ;;  %v401_v11 = vld [vmem:[%s3346_s1 + $0x48] sm:$0xff]  ;;  %v403_v12 = vld [vmem:[%s3346_s1 + $0x58] sm:$0xff]  ;;  %s2812_s16 = scalar_lea.vmem %s3345_s0, %s2644_s11  ;;  %vm1599_vm4 = vsmask.f32 5376  ;;  %vm1771_vm5 = vcmask 1044480  }
  0x10   : > { %v405_v13 = vld [vmem:[%s3346_s1 + $0x68] sm:$0xff]  ;;  %v404_v14 = vld [vmem:[%s3346_s1 + $0x60] sm:$0xff]  ;;  %v406_v15 = vld [vmem:[%s3346_s1 + $0x70] sm:$0xff]  ;;  %s2645_s30 = smul.u32 80, %s3357_s21 }
  0x11   : > { %v2515_v16 = vld [vmem:[%s3349_s4 + $0x78] sm:$0xff]  ;;  %v2817_v17 = vld [vmem:[%s3347_s2] ss:$0 sm:$0xff]  ;;  %v2514_v19 = vld [vmem:[%s3349_s4 + $0x70] sm:$0xff] }
  0x12   : > { %2628 = vmatpush.bf16.msra.mxu1 %v2515_v16  ;;  %2629 = vmatpush.bf16.msra.mxu2 %v2515_v16  ;;  %v324_v18 = vld [vmem:[%s2812_s16] sm:$0xff]  ;;  %v2535_v20 = vld [vmem:[%s3349_s4 + $0xf8] sm:$0xff]  ;;  %v325_v21 = vld [vmem:[%s2812_s16 + $0x8] sm:$0xff]  ;;  %s3300_s9 = scalar_lea.vmem %s3350_s5, %s2645_s30  ;;  %s3306_s21 = scalar_lea.vmem %s3351_s6, %s2645_s30 }
  0x13   : > { %697 = vmatpush.bf16.msra.mxu0 %v2515_v16  ;;  %v2513_v22 = vld [vmem:[%s3349_s4 + $0x68] sm:$0xff]  ;;  %v343_v23 = vmul.f32 %v2817_v17, %v324_v18  ;;  %v2834_v24 = vld [vmem:[%s3348_s3] ss:$0 sm:$0xff]  ;;  %1068 = vmatpush.bf16.msra.mxu3 %v2535_v20  ;;  %v344_v25 = vmul.f32 %v2817_v17, %v325_v21  ;;  %v2534_v28 = vld [vmem:[%s3349_s4 + $0xf0] sm:$0xff] }
  0x14   : > { %v2512_v30 = vld [vmem:[%s3349_s4 + $0x60] sm:$0xff]  ;;  %v2533_v32 = vld [vmem:[%s3349_s4 + $0xe8] sm:$0xff]  ;;  %v2511_v34 = vld [vmem:[%s3349_s4 + $0x58] sm:$0xff] }
  0x15   : > { %v362_v26 = vadd.f32 %v2834_v24, %v343_v23  ;;  %v363_v29 = vadd.f32 %v2834_v24, %v344_v25  ;;  %v2532_v37 = vld [vmem:[%s3349_s4 + $0xe0] sm:$0xff]  ;;  %v2510_v39 = vld [vmem:[%s3349_s4 + $0x50] sm:$0xff]  ;;  %v2531_v41 = vld [vmem:[%s3349_s4 + $0xd8] sm:$0xff] }
  0x16   : > { %444 = vperm.xlu1 %2672, %v399_v4   ;;  %2630 = vmatpush.bf16.msra.mxu1 %v2514_v19  ;;  %v2509_v42 = vld [vmem:[%s3349_s4 + $0x48] sm:$0xff]  ;;  %v2530_v44 = vld [vmem:[%s3349_s4 + $0xd0] sm:$0xff]  ;;  %v331_v46 = vld [vmem:[%s2812_s16 + $0x38] sm:$0xff] }
  0x17   : > { %434 = vperm.xlu0 %2671, %v397_v5   ;;  %414 = vperm.xlu2 %2673, %v393_v6   ;;  %v377_v31 = vmax.f32 %v362_v26, 0.0  ;;  %v378_v33 = vmax.f32 %v363_v29, 0.0  ;;  %v330_v45 = vld [vmem:[%s2812_s16 + $0x30] sm:$0xff]  ;;  %v2508_v47 = vld [vmem:[%s3349_s4 + $0x40] sm:$0xff]  ;;  %v329_v49 = vld [vmem:[%s2812_s16 + $0x28] sm:$0xff]  ;;  %v350_v51 = vmul.f32 %v2817_v17, %v331_v46 }
  0x18   : > { %2631 = vmatpush.bf16.msra.mxu2 %v2514_v19  ;;  %698 = vmatpush.bf16.msra.mxu0 %v2514_v19  ;;  %v328_v48 = vld [vmem:[%s2812_s16 + $0x20] sm:$0xff]  ;;  %v349_v50 = vmul.f32 %v2817_v17, %v330_v45  ;;  %v2529_v52 = vld [vmem:[%s3349_s4 + $0xc8] sm:$0xff]  ;;  %v348_v54 = vmul.f32 %v2817_v17, %v329_v49  ;;  %v2507_v55 = vld [vmem:[%s3349_s4 + $0x38] sm:$0xff] }
  0x19   : > { %1069 = vmatpush.bf16.msra.mxu3 %v2534_v28  ;;  %v347_v53 = vmul.f32 %v2817_v17, %v328_v48  ;;  %v2523_v56 = vld [vmem:[%s3349_s4 + $0xb8] sm:$0xff]  ;;  %v369_v61 = vadd.f32 %v2834_v24, %v350_v51  ;;  %v2528_v62 = vld [vmem:[%s3349_s4 + $0xc0] sm:$0xff]  ;;  %v2506_v2 = vld [vmem:[%s3349_s4 + $0x30] sm:$0xff] }
  0x1a   : > { %2632 = vmatpush.bf16.msra.mxu1 %v2513_v22  ;;  %v368_v58 = vadd.f32 %v2834_v24, %v349_v50  ;;  %v367_v0 = vadd.f32 %v2834_v24, %v348_v54  ;;  %v327_v1 = vld [vmem:[%s2812_s16 + $0x18] sm:$0xff]  ;;  %v326_v3 = vld [vmem:[%s2812_s16 + $0x10] sm:$0xff]  ;;  %v2504_v16 = vld [vmem:[%s3349_s4 + $0x20] sm:$0xff] }
  0x1b   : > { %v366_v63 = vadd.f32 %v2834_v24, %v347_v53  ;;  %v2522_v4 = vld [vmem:[%s3349_s4 + $0xb0] sm:$0xff]  ;;  %v2543_v5 = vld [vmem:[%s3349_s4 + $0x138] sm:$0xff]  ;;  %v2520_v23 = vld [vmem:[%s3349_s4 + $0xa0] sm:$0xff] }
  0x1c   : > { %2633 = vmatpush.bf16.msra.mxu2 %v2513_v22  ;;  %699 = vmatpush.bf16.msra.mxu0 %v2513_v22  ;;  %v383_v6 = vmax.f32 %v368_v58, 0.0  ;;  %v335_v26 = vld [vmem:[%s2812_s16 + $0x58] sm:$0xff]  ;;  %v334_v29 = vld [vmem:[%s2812_s16 + $0x50] sm:$0xff]  ;;  %v2540_v45 = vld [vmem:[%s3349_s4 + $0x120] sm:$0xff] }
  0x1d   : > { %1070 = vmatpush.bf16.msra.mxu3 %v2533_v32  ;;  %v2518_v53 = vld [vmem:[%s3349_s4 + $0x90] sm:$0xff] }
  0x1e   : > { %424 = vperm.xlu1 %2672, %v395_v7   ;;  %2634 = vmatpush.bf16.msra.mxu1 %v2512_v30  ;;  %v384_v7 = vmax.f32 %v369_v61, 0.0 }
  0x1f   : > { %419 = vperm.xlu0 %2671, %v394_v8   ;;  %449 = vperm.xlu2 %2673, %v400_v9   ;;  %v346_v8 = vmul.f32 %v2817_v17, %v327_v1  ;;  %v381_v9 = vmax.f32 %v366_v63, 0.0 }
  0x20   : > { %2635 = vmatpush.bf16.msra.mxu2 %v2512_v30  ;;  %700 = vmatpush.bf16.msra.mxu0 %v2512_v30  ;;  %v2541_v30 = vld [vmem:[%s3349_s4 + $0x128] sm:$0xff] }
  0x21   : > { %1071 = vmatpush.bf16.msra.mxu3 %v2532_v37  ;;  %v365_v22 = vadd.f32 %v2834_v24, %v346_v8  ;;  %v353_v37 = vmul.f32 %v2817_v17, %v334_v29 }
  0x22   : > { %2636 = vmatpush.bf16.msra.mxu1 %v2511_v34 }
  0x23   : > { %v372_v51 = vadd.f32 %v2834_v24, %v353_v37  ;;  %v2571_v37 = vld [vmem:[%s3349_s4 + $0x1f8] sm:$0xff] }
  0x24   : > { %2637 = vmatpush.bf16.msra.mxu2 %v2511_v34  ;;  %701 = vmatpush.bf16.msra.mxu0 %v2511_v34 }
  0x25   : > { %1072 = vmatpush.bf16.msra.mxu3 %v2531_v41 }
  0x26   : > { %459 = vperm.xlu1 %2672, %v402_v10   ;;  %2638 = vmatpush.bf16.msra.mxu1 %v2510_v39  ;;  %v382_v10 = vmax.f32 %v367_v0, 0.0  ;;  %v387_v0 = vmax.f32 %v372_v51, 0.0 }
  0x27   : > { %454 = vperm.xlu0 %2671, %v401_v11   ;;  %464 = vperm.xlu2 %2673, %v403_v12   ;;  %v345_v11 = vmul.f32 %v2817_v17, %v326_v3  ;;  %v2505_v12 = vld [vmem:[%s3349_s4 + $0x28] sm:$0xff] }
  0x28   : > { %2639 = vmatpush.bf16.msra.mxu2 %v2510_v39  ;;  %702 = vmatpush.bf16.msra.mxu0 %v2510_v39 }
  0x29   : > { %1073 = vmatpush.bf16.msra.mxu3 %v2530_v44  ;;  %v364_v28 = vadd.f32 %v2834_v24, %v345_v11  ;;  %v2519_v44 = vld [vmem:[%s3349_s4 + $0x98] sm:$0xff] }
  0x2a   : > { %2640 = vmatpush.bf16.msra.mxu1 %v2509_v42 }
  0x2b   : > { %v379_v39 = vmax.f32 %v364_v28, 0.0 }
  0x2c   : > { %2641 = vmatpush.bf16.msra.mxu2 %v2509_v42  ;;  %703 = vmatpush.bf16.msra.mxu0 %v2509_v42  ;;  %v2503_v42 = vld [vmem:[%s3349_s4 + $0x18] sm:$0xff] }
  0x2d   : > { %1074 = vmatpush.bf16.msra.mxu3 %v2529_v52  ;;  %v337_v52 = vld [vmem:[%s2812_s16 + $0x68] sm:$0xff] }
  0x2e   : > { %474 = vperm.xlu1 %2672, %v405_v13   ;;  %2642 = vmatpush.bf16.msra.mxu1 %v2508_v47  ;;  %v2521_v13 = vld [vmem:[%s3349_s4 + $0xa8] sm:$0xff]  ;;  %v356_v61 = vmul.f32 %v2817_v17, %v337_v52 }
  0x2f   : > { %469 = vperm.xlu0 %2671, %v404_v14   ;;  %479 = vperm.xlu2 %2673, %v406_v15   ;;  %v2542_v14 = vld [vmem:[%s3349_s4 + $0x130] sm:$0xff] }
  0x30   : > { %2643 = vmatpush.bf16.msra.mxu2 %v2508_v47  ;;  %704 = vmatpush.bf16.msra.mxu0 %v2508_v47  ;;  %v2502_v47 = vld [vmem:[%s3349_s4 + $0x10] sm:$0xff]  ;;  %v375_v11 = vadd.f32 %v2834_v24, %v356_v61 }
  0x31   : > { %1075 = vmatpush.bf16.msra.mxu3 %v2528_v62  ;;  %v2539_v62 = vld [vmem:[%s3349_s4 + $0x118] sm:$0xff]  ;;  %v2570_v61 = vld [vmem:[%s3349_s4 + $0x1f0] sm:$0xff] }
  0x32   : > { %784 = vmatpush.bf16.msrb.mxu1 %v2507_v55 }
  0x34   : > { %904 = vmatpush.bf16.msrb.mxu2 %v2523_v56  ;;  %1240 = vmatpush.bf16.msrb.mxu0 %v2543_v5 }
  0x35   : > { %1706 = vmatpush.bf16.msrb.mxu3 %v2571_v37  ;;  %v2577_v37 = vld [vmem:[%s3349_s4 + $0x228] sm:$0xff] }
  0x36   : > { %785 = vmatpush.bf16.msrb.mxu1 %v2506_v2  ;;  %v2501_v2 = vld [vmem:[%s3349_s4 + $0x8] sm:$0xff] }
  0x38   : > { %905 = vmatpush.bf16.msrb.mxu2 %v2522_v4  ;;  %1241 = vmatpush.bf16.msrb.mxu0 %v2542_v14 }
  0x39   : > { %1707 = vmatpush.bf16.msrb.mxu3 %v2570_v61 }
  0x3a   : > { %786 = vmatpush.bf16.msrb.mxu1 %v2505_v12 }
  0x3c   : > { %906 = vmatpush.bf16.msrb.mxu2 %v2521_v13  ;;  %1242 = vmatpush.bf16.msrb.mxu0 %v2541_v30 }
  0x3e   : > { %787 = vmatpush.bf16.msrb.mxu1 %v2504_v16 }
  0x40   : > { %907 = vmatpush.bf16.msrb.mxu2 %v2520_v23  ;;  %1243 = vmatpush.bf16.msrb.mxu0 %v2540_v45 }
  0x42   : > { %788 = vmatpush.bf16.msrb.mxu1 %v2503_v42 }
  0x44   : > { %908 = vmatpush.bf16.msrb.mxu2 %v2519_v44  ;;  %1244 = vmatpush.bf16.msrb.mxu0 %v2539_v62  ;;  %v2550_v62 = vld [vmem:[%s3349_s4 + $0x170] sm:$0xff] }
  0x46   : > { %789 = vmatpush.bf16.msrb.mxu1 %v2502_v47 }
  0x48   : > { %909 = vmatpush.bf16.msrb.mxu2 %v2518_v53 }
  0x4a   : > { %790 = vmatpush.bf16.msrb.mxu1 %v2501_v2 }
  0x69   : > { %v410_v27 = vpop.permute.xlu2 %409 }
  0x6a   : > { %v482_v35 = vmul.f32 %v410_v27, %v377_v31  ;;  %v332_v31 = vld [vmem:[%s2812_s16 + $0x40] sm:$0xff] }
  0x71   : > { %v415_v36 = vpop.permute.xlu2 %414 }
  0x72   : > { %v483_v38 = vmul.f32 %v415_v36, %v378_v33  ;;  %v333_v33 = vld [vmem:[%s2812_s16 + $0x48] sm:$0xff]  ;;  %v380_v36 = vmax.f32 %v365_v22, 0.0 }
  0x73   : > { %v352_v41 = vmul.f32 %v2817_v17, %v333_v33 }
  0x74   : > { %v2857_v40 = vpack.c.bf16 %v483_v38, %v482_v35  ;;  %v354_v35 = vmul.f32 %v2817_v17, %v335_v26  ;;  %v351_v38 = vmul.f32 %v2817_v17, %v332_v31 }
  0x75   : > { %v371_v56 = vadd.f32 %v2834_v24, %v352_v41  ;;  %v2551_v41 = vld [vmem:[%s3349_s4 + $0x178] sm:$0xff] }
  0x76   : > { %2584 = vst [vmem:[#allocation2] sm:$0xff] %v2857_v40   ;;  %v373_v48 = vadd.f32 %v2834_v24, %v354_v35  ;;  %v370_v54 = vadd.f32 %v2834_v24, %v351_v38  ;;  %v603_v12 = vshll.u32 %v2857_v40, 16  ;;  %v2536_v38 = vld [vmem:[%s3349_s4 + $0x100] sm:$0xff] }
  0x77   : > { %v386_v4 = vmax.f32 %v371_v56, 0.0 }
  0x78   : > { %v388_v63 = vmax.f32 %v373_v48, 0.0  ;;  %v385_v3 = vmax.f32 %v370_v54, 0.0  ;;  %v605_v31 = vrot.slane %v603_v12, 1 }
  0x79   : > { %v2866_v43 = vpop.permute.xlu2 %449 }
  0x80   : > { %v440_v57 = vpop.permute.xlu1 %439 }
  0x81   : > { %v430_v59 = vpop.permute.xlu0 %429  ;;  %v2892_v60 = vpop.permute.xlu2 %464  ;;  %v488_v18 = vmul.f32 %v440_v57, %v383_v6  ;;  %v336_v57 = vld [vmem:[%s2812_s16 + $0x60] sm:$0xff]  ;;  %v2517_v6 = vld [vmem:[%s3349_s4 + $0x88] sm:$0xff] }
  0x82   : > { %v486_v25 = vmul.f32 %v430_v59, %v381_v9  ;;  %v355_v5 = vmul.f32 %v2817_v17, %v336_v57  ;;  %v2500_v17 = vld [vmem:[%s3349_s4] sm:$0xff]  ;;  %v493_v13 = vmul.f32 %v2892_v60, %v388_v63  ;;  %910 = vmatpush.bf16.msrb.mxu2 %v2517_v6  ;;  %v2537_v60 = vld [vmem:[%s3349_s4 + $0x108] sm:$0xff] }
  0x83   : > { %791 = vmatpush.bf16.msrb.mxu1 %v2500_v17 }
  0x84   : > { %v374_v22 = vadd.f32 %v2834_v24, %v355_v5  ;;  %v601_v24 = vshrl.u32 %v2857_v40, 16 }
  0x86   : > { %v389_v33 = vmax.f32 %v374_v22, 0.0  ;;  %v606_v47 = vor.u32 %v605_v31, %v601_v24  ;;  %v2625_v24 = vld [vmem:[#allocation2] sm:$0xf0]  ;;  %v2626_v31 = vld [vmem:[#allocation2] sm:$0xe] }
  0x88   : > { %v445_v15 = vpop.permute.xlu1 %444 }
  0x89   : > { %v489_v19 = vmul.f32 %v445_v15, %v384_v7  ;;  %v435_v20 = vpop.permute.xlu0 %434  ;;  %v480_v21 = vpop.permute.xlu2 %479  ;;  %v2538_v7 = vld [vmem:[%s3349_s4 + $0x110] sm:$0xff] }
  0x8a   : > { %v487_v27 = vmul.f32 %v435_v20, %v382_v10  ;;  %v490_v20 = vmul.f32 %v2866_v43, %v385_v3  ;;  %1245 = vmatpush.bf16.msrb.mxu0 %v2538_v7  ;;  %v390_v43 = vmax.f32 %v375_v11, 0.0 }
  0x8b   : > { %v2598_v32 = vpack.c.bf16 %v489_v19, %v488_v18  ;;  %v2516_v19 = vld [vmem:[%s3349_s4 + $0x80] sm:$0xff] }
  0x8c   : > { %v2593_v34 = vpack.c.bf16 %v487_v27, %v486_v25  ;;  %v948_v27 = vld [vmem:[#allocation2 + $0x4] sm:$0xe]  ;;  %911 = vmatpush.bf16.msrb.mxu2 %v2516_v19 }
  0x8d   : > { %2621 = vst [vmem:[#allocation2 + $0x18] sm:$0xff] %v2598_v32   ;;  %v987_v35 = vunpack.c.l.b16 %v948_v27 }
  0x8e   : > { %2620 = vst [vmem:[#allocation2 + $0x10] sm:$0xff] %v2593_v34   ;;  %1246 = vmatpush.bf16.msrb.mxu0 %v2537_v60 }
  0x90   : > { %v425_v46 = vpop.permute.xlu1 %424 }
  0x91   : > { %v485_v49 = vmul.f32 %v425_v46, %v380_v36  ;;  %v420_v50 = vpop.permute.xlu0 %419 }
  0x92   : > { %v484_v55 = vmul.f32 %v420_v50, %v379_v39  ;;  %1247 = vmatpush.bf16.msrb.mxu0 %v2536_v38 }
  0x94   : > { %v2588_v58 = vpack.c.bf16 %v485_v49, %v484_v55  ;;  %v2962_v59 = vld [vmem:[#allocation2 + $0x18] sm:$0xff] }
  0x95   : > { %v2968_v1 = vld [vmem:[#allocation2 + $0x10] sm:$0xff]  ;;  %v624_v9 = vshll.u32 %v2962_v59, 16  ;;  %v628_v2 = vshrl.u32 %v2962_v59, 16 }
  0x96   : > { %2619 = vst [vmem:[#allocation2 + $0x8] sm:$0xff] %v2588_v58   ;;  %v616_v8 = vshll.u32 %v2968_v1, 16  ;;  %v620_v18 = vshrl.u32 %v2968_v1, 16  ;;  %v2579_v58 = vld [vmem:[%s3349_s4 + $0x238] sm:$0xff] }
  0x97   : > { %v626_v26 = vrot.slane %v624_v9, 1  ;;  %v2563_v9 = vld [vmem:[%s3349_s4 + $0x1b8] sm:$0xff] }
  0x98   : > { %v460_v10 = vpop.permute.xlu1 %459  ;;  %v2988_v16 = vrot.slane %v616_v8, 1 }
  0x99   : > { %v492_v14 = vmul.f32 %v460_v10, %v387_v0  ;;  %v455_v15 = vpop.permute.xlu0 %454  ;;  %v630_v6 = vor.u32 %v628_v2, %v626_v26  ;;  %v1284_v10 = vld [vmem:[#allocation2 + $0x4] sm:$0xc] }
  0x9a   : > { %v491_v21 = vmul.f32 %v455_v15, %v386_v4  ;;  %v622_v25 = vor.u32 %v620_v18, %v2988_v16  ;;  %v3046_v15 = vld [vmem:[#allocation2 + $0x14] sm:$0xff]  ;;  %v1303_v19 = vunpack.c.l.b16 %v1284_v10  ;;  %v2548_v2 = vld [vmem:[%s3349_s4 + $0x160] sm:$0xff] }
  0x9b   : > { %v2608_v23 = vpack.c.bf16 %v493_v13, %v492_v14  ;;  %v2578_v18 = vld [vmem:[%s3349_s4 + $0x230] sm:$0xff]  ;;  %v2559_v10 = vld [vmem:[%s3349_s4 + $0x198] sm:$0xff] }
  0x9c   : > { %v2603_v28 = vpack.c.bf16 %v491_v21, %v490_v20  ;;  %v627_v29 = vsel %vm599_vm0, %v622_v25, %v626_v26  ;;  %v2562_v21 = vld [vmem:[%s3349_s4 + $0x1b0] sm:$0xff] }
  0x9d   : > { %2623 = vst [vmem:[#allocation2 + $0x28] sm:$0xff] %v2608_v23   ;;  %v3001_v30 = vld [vmem:[#allocation2 + $0x8] sm:$0xff]  ;;  %715 = vmatmul.bf16.vlgmr.msra.gmra.mxu1 %v627_v29  ;;  %v1007_v23 = vrot.slane %v3046_v15, 1 }
  0x9e   : > { %v3004_v32 = vld [vmem:[#allocation2 + $0x8] sm:$0xff]   ;;  %2622 = vst [vmem:[#allocation2 + $0x20] sm:$0xff] %v2603_v28   ;;  %v608_v39 = vshll.u32 %v3001_v30, 16  ;;  %1370 = vmatpush.bf16.msra.mxu1 %v2551_v41  ;;  %v612_v11 = vshrl.u32 %v3001_v30, 16  ;;  %v2627_v41 = vor.u32 %v2626_v31, %v2625_v24 }
  0x9f   : > { %v3006_v34 = vld [vmem:[#allocation2 + $0xc] sm:$0xff]  ;;  %v988_v36 = vunpack.c.l.b16 %v3004_v32 }
  0xa0   : > { %v475_v42 = vpop.permute.xlu1 %474  ;;  %v610_v48 = vrot.slane %v608_v39, 1  ;;  %v1005_v51 = vrot.slane %v3006_v34, 1  ;;  %v1307_v26 = vrot.slane %v3006_v34, 2  ;;  %v2561_v28 = vld [vmem:[%s3349_s4 + $0x1a8] sm:$0xff]  ;;  %v1309_v39 = vrot.slane %v3046_v15, 2 }
  0xa1   : > { %v3019_v44 = vpack.c.b16 %v988_v36, %v987_v35  ;;  %v495_v45 = vmul.f32 %v475_v42, %v390_v43  ;;  %v470_v46 = vpop.permute.xlu0 %469  ;;  %v1304_v60 = vpack.c.b16 %v988_v36, %v1303_v19  ;;  %v2549_v35 = vld [vmem:[%s3349_s4 + $0x168] sm:$0xff]  ;;  %v843_v19 = vrot.slane %v2968_v1, 1 }
  0xa2   : > { %v494_v49 = vmul.f32 %v470_v46, %v389_v33  ;;  %v611_v52 = vsel %vm599_vm0, %v606_v47, %v610_v48  ;;  %1371 = vmatpush.bf16.msra.mxu1 %v2550_v62  ;;  %v614_v20 = vor.u32 %v612_v11, %v610_v48  ;;  %v1008_v43 = vsel %vm839_vm1, %v1005_v51, %v1007_v23  ;;  %v2560_v47 = vld [vmem:[%s3349_s4 + $0x1a0] sm:$0xff]  ;;  %v2557_v31 = vld [vmem:[%s3349_s4 + $0x188] sm:$0xff] }
  0xa3   : > { %v1004_v50 = vrot.slane %v3019_v44, 1  ;;  %705 = vmatmul.bf16.vlgmr.msra.gmra.mxu0 %v611_v52  ;;  %v1306_v25 = vrot.slane %v1304_v60, 2  ;;  %v1135_v42 = vshrl.u32 %v3019_v44, 16  ;;  %v3090_v48 = vsel %vm1305_vm2, %v1307_v26, %v1309_v39  ;;  %v2576_v11 = vld [vmem:[%s3349_s4 + $0x220] sm:$0xff] }
  0xa4   : > { %v2613_v53 = vpack.c.bf16 %v495_v45, %v494_v49  ;;  %v553_v55 = vld [vmem:[#allocation2 + $0x28] sm:$0x1]  ;;  %1836 = vmatpush.bf16.msra.mxu0 %v2579_v58  ;;  %v619_v27 = vsel %vm599_vm0, %v614_v20, %v2988_v16  ;;  %v1112_v29 = vld [vmem:[#allocation2 + $0x2c] sm:$0x3]  ;;  %v1138_v45 = vshll.u32 %v3019_v44, 16  ;;  %v841_v49 = vrot.slane %v3001_v30, 1 }
  0xa5   : > { %v1006_v54 = vsel %vm839_vm1, %v1004_v50, %v1005_v51  ;;  %v3025_v56 = vld [vmem:[#allocation2 + $0x20] sm:$0xff]  ;;  %v592_v57 = vunpack.c.l.b16 %v553_v55  ;;  %v3068_v33 = vsel %vm1305_vm2, %v1306_v25, %v1307_v26  ;;  %v2569_v16 = vld [vmem:[%s3349_s4 + $0x1e8] sm:$0xff]  ;;  %v1131_v38 = vunpack.c.l.b16 %v1112_v29  ;;  %v2558_v25 = vld [vmem:[%s3349_s4 + $0x190] sm:$0xff] }
  0xa6   : > { %1076 = vmatmul.bf16.vlgmr.msra.gmra.mxu3 %v1006_v54  ;;  %2624 = vst [vmem:[#allocation2 + $0x30] sm:$0xff] %v2613_v53   ;;  %v632_v63 = vshll.u32 %v3025_v56, 16  ;;  %v636_v4 = vshrl.u32 %v3025_v56, 16  ;;  %v847_v13 = vrot.slane %v3025_v56, 1  ;;  %v3076_v36 = vld [vmem:[#allocation2 + $0x1c] sm:$0xff]  ;;  %v3084_v46 = vld [vmem:[#allocation2 + $0x24] sm:$0xff]  ;;  %1372 = vmatpush.bf16.msra.mxu1 %v2549_v35 }
  0xa7   : > { %v598_v0 = vpack.c.b16 %v592_v57, %v592_v57  ;;  %1708 = vmatpush.bf16.msrb.mxu3 %v2569_v16  ;;  %v1143_v50 = vshrl.u32 %v3006_v34, 16  ;;  %v1146_v51 = vshll.u32 %v3006_v34, 16  ;;  %v3095_v44 = vpack.c.b16 %v1131_v38, %v1131_v38  ;;  %v2568_v34 = vld [vmem:[%s3349_s4 + $0x1e0] sm:$0xff]  ;;  %v2565_v20 = vld [vmem:[%s3349_s4 + $0x1c8] sm:$0xff]  ;;  %v2574_v16 = vld [vmem:[%s3349_s4 + $0x210] sm:$0xff] }
  0xa8   : > { %v634_v3 = vrot.slane %v632_v63, 1  ;;  %1837 = vmatpush.bf16.msra.mxu0 %v2578_v18  ;;  %v1311_v52 = vrot.slane %v3076_v36, 2  ;;  %v840_v53 = vrot.slane %v2627_v41, 1  ;;  %v1137_v54 = vrot.slane %v1135_v42, 1  ;;  %v2564_v26 = vld [vmem:[%s3349_s4 + $0x1c0] sm:$0xff] }
  0xa9   : > { %v640_v5 = vshll.u32 %v598_v0, 16  ;;  %v849_v14 = vrot.slane %v598_v0, 1  ;;  %v1140_v55 = vrot.slane %v1138_v45, 2  ;;  %v1313_v57 = vrot.slane %v3084_v46, 2  ;;  %v958_v24 = vld [vmem:[#allocation2 + $0x2c] sm:$0x1] }
  0xaa   : > { %v638_v7 = vor.u32 %v636_v4, %v634_v3  ;;  %v635_v12 = vsel %vm599_vm0, %v630_v6, %v634_v3  ;;  %v3100_v58 = vsel %vm1305_vm2, %v1309_v39, %v1311_v52  ;;  %v842_v61 = vsel %vm839_vm1, %v840_v53, %v841_v49  ;;  %1373 = vmatpush.bf16.msra.mxu1 %v2548_v2 }
  0xab   : > { %v642_v8 = vrot.slane %v640_v5, 1  ;;  %v3057_v22 = vsel %vm839_vm1, %v847_v13, %v849_v14  ;;  %v1145_v62 = vrot.slane %v1143_v50, 1  ;;  %v1148_v63 = vrot.slane %v1146_v51, 2  ;;  %1709 = vmatpush.bf16.msrb.mxu3 %v2568_v34  ;;  %v2545_v50 = vld [vmem:[%s3349_s4 + $0x148] sm:$0xff] }
  0xac   : > { %1838 = vmatpush.bf16.msra.mxu0 %v2577_v37  ;;  %v3104_v0 = vsel %vm1305_vm2, %v1311_v52, %v1313_v57  ;;  %v1315_v3 = vrot.slane %v3095_v44, 2  ;;  %v1141_v4 = vor.u32 %v1140_v55, %v1137_v54  ;;  %v1009_v5 = vrot.slane %v3076_v36, 1 }
  0xad   : > { %v643_v17 = vsel %vm599_vm0, %v638_v7, %v642_v8  ;;  %720 = vmatmul.bf16.gmra.mxu1 %v635_v12  ;;  %v2547_v12 = vld [vmem:[%s3349_s4 + $0x158] sm:$0xff]  ;;  %v1152_v14 = vshrl.u32 %v3046_v15, 16  ;;  %v1155_v18 = vshll.u32 %v3046_v15, 16  ;;  %v1161_v35 = vshrl.u32 %v3076_v36, 16 }
  0xae   : > { %725 = vmatmul.bf16.vlgmr.msra.gmra.mxu2 %v643_v17  ;;  %v3116_v6 = vsel %vm1305_vm2, %v1313_v57, %v1315_v3  ;;  %v1010_v8 = vsel %vm839_vm1, %v1007_v23, %v1009_v5  ;;  %v2566_v17 = vld [vmem:[%s3349_s4 + $0x1d0] sm:$0xff]  ;;  %1374 = vmatpush.bf16.msra.mxu1 %v2547_v12  ;;  %v2575_v15 = vld [vmem:[%s3349_s4 + $0x218] sm:$0xff]  ;;  %v1164_v37 = vshll.u32 %v3076_v36, 16  ;;  %v997_v38 = vunpack.c.l.b16 %v958_v24 }
  0xaf   : > { %1534 = vmatpush.bf16.msra.mxu2 %v2563_v9  ;;  %v2567_v9 = vld [vmem:[%s3349_s4 + $0x1d8] sm:$0xff]  ;;  %v1154_v60 = vrot.slane %v1152_v14, 1  ;;  %v1157_v23 = vrot.slane %v1155_v18, 2  ;;  %v845_v39 = vrot.slane %v2962_v59, 1  ;;  %v1163_v41 = vrot.slane %v1161_v35, 1 }
  0xb0   : > { %1710 = vmatpush.bf16.msrb.mxu3 %v2567_v9  ;;  %1839 = vmatpush.bf16.msra.mxu0 %v2576_v11  ;;  %v1166_v42 = vrot.slane %v1164_v37, 2  ;;  %v1003_v45 = vpack.c.b16 %v997_v38, %v997_v38  ;;  %v1454_v53 = vunpack.c.h.b16 %v3004_v32  ;;  %v1170_v34 = vshrl.u32 %v3084_v46, 16 }
  0xb1   : > { %v1173_v2 = vshll.u32 %v3084_v46, 16  ;;  %v848_v11 = vsel %vm839_vm1, %v845_v39, %v847_v13  ;;  %v3205_v13 = vld [vmem:[#allocation2 + $0x18] sm:$0xff] }
  0xb2   : > { %v1167_v51 = vor.u32 %v1166_v42, %v1163_v41  ;;  %v1013_v36 = vrot.slane %v1003_v45, 1 }
  0xb3   : > { %1535 = vmatpush.bf16.msra.mxu2 %v2562_v21  ;;  %710 = vmatmul.bf16.gmra.mxu0 %v619_v27  ;;  %v844_v21 = vsel %vm839_vm1, %v841_v49, %v843_v19  ;;  %v1011_v27 = vrot.slane %v3084_v46, 1  ;;  %v1414_v49 = vld [vmem:[#allocation2 + $0x8] sm:$0xc] }
  0xb4   : > { %1711 = vmatpush.bf16.msrb.mxu3 %v2566_v17  ;;  %1840 = vmatpush.bf16.msra.mxu0 %v2575_v15  ;;  %v1453_v52 = vunpack.c.l.b16 %v1414_v49  ;;  %v2572_v17 = vld [vmem:[%s3349_s4 + $0x200] sm:$0xff] }
  0xb5   : > { %v1012_v29 = vsel %vm839_vm1, %v1009_v5, %v1011_v27  ;;  %v1014_v55 = vsel %vm839_vm1, %v1011_v27, %v1013_v36  ;;  %v3228_v36 = vld [vmem:[#allocation2 + $0x28] sm:$0xff] }
  0xb6   : > { %1081 = vmatmul.bf16.gmra.mxu3 %v1008_v43  ;;  %v2546_v43 = vld [vmem:[%s3349_s4 + $0x150] sm:$0xff]  ;;  %v3177_v57 = vpack.c.b16 %v1454_v53, %v1453_v52  ;;  %v1636_v32 = vshrl.u32 %v3228_v36, 16  ;;  %v1639_v52 = vshll.u32 %v3228_v36, 16 }
  0xb7   : > { %1536 = vmatpush.bf16.msra.mxu2 %v2561_v28  ;;  %v1158_v28 = vor.u32 %v1157_v23, %v1154_v60  ;;  %1375 = vmatpush.bf16.msra.mxu1 %v2546_v43  ;;  %v1182_v60 = vshll.u32 %v3095_v44, 16  ;;  %v1618_v23 = vshrl.u32 %v3205_v13, 16 }
  0xb8   : > { %1712 = vmatpush.bf16.msrb.mxu3 %v2565_v20  ;;  %1841 = vmatpush.bf16.msra.mxu0 %v2574_v16  ;;  %v1601_v3 = vshrl.u32 %v3177_v57, 16 }
  0xb9   : > { %v1168_v54 = vsel %vm1133_vm3, %v1158_v28, %v1167_v51  ;;  %v1620_v27 = vrot.slane %v1618_v23, 2 }
  0xba   : > { %v1603_v9 = vrot.slane %v1601_v3, 2 }
  0xbb   : > { %1537 = vmatpush.bf16.msra.mxu2 %v2560_v47  ;;  %v846_v47 = vsel %vm839_vm1, %v843_v19, %v845_v39  ;;  %1376 = vmatpush.bf16.msra.mxu1 %v2545_v50 }
  0xbc   : > { %1713 = vmatpush.bf16.msrb.mxu3 %v2564_v26  ;;  %v1184_v26 = vrot.slane %v1182_v60, 2 }
  0xbd   : > { %792 = vmatmul.bf16.vlgmr.msrb.gmra.mxu1 %v2857_v40  ;;  %v1149_v40 = vor.u32 %v1148_v63, %v1145_v62  ;;  %v2544_v62 = vld [vmem:[%s3349_s4 + $0x140] sm:$0xff]  ;;  %v3188_v63 = vld [vmem:[#allocation2 + $0x10] sm:$0xff] }
  0xbe   : > { %912 = vmatmul.bf16.vlgmr.msrb.gmra.mxu2 %v842_v61  ;;  %v2573_v61 = vld [vmem:[%s3349_s4 + $0x208] sm:$0xff]  ;;  %v1609_v5 = vshrl.u32 %v3188_v63, 16  ;;  %v1773_v49 = vrot.slane %v3188_v63, 3 }
  0xbf   : > { %v1150_v7 = vsel %vm1133_vm3, %v1141_v4, %v1149_v40  ;;  %1538 = vmatpush.bf16.msra.mxu2 %v2559_v10  ;;  %1842 = vmatpush.bf16.msra.mxu0 %v2573_v61  ;;  %v1604_v4 = vshll.u32 %v3177_v57, 16  ;;  %v1775_v61 = vrot.slane %v3205_v13, 3 }
  0xc0   : > { %1377 = vmatpush.bf16.msra.mxu1 %v2544_v62  ;;  %v1611_v46 = vrot.slane %v1609_v5, 2 }
  0xc1   : > { %v1606_v10 = vrot.slane %v1604_v4, 3  ;;  %v1776_v3 = vsel %vm1771_vm5, %v1773_v49, %v1775_v61 }
  0xc3   : > { %1248 = vmatmul.bf16.vlgmr.msrb.gmra.mxu0 %v1150_v7  ;;  %1539 = vmatpush.bf16.msra.mxu2 %v2558_v25  ;;  %v1172_v7 = vrot.slane %v1170_v34, 1  ;;  %v1607_v18 = vor.u32 %v1606_v10, %v1603_v9  ;;  %v1621_v25 = vshll.u32 %v3205_v13, 16 }
  0xc4   : > { %1843 = vmatpush.bf16.msra.mxu0 %v2572_v17 }
  0xc6   : > { %1086 = vmatmul.bf16.gmra.mxu3 %v1010_v8  ;;  %v1175_v8 = vrot.slane %v1173_v2, 2 }
  0xc7   : > { %1540 = vmatpush.bf16.msra.mxu2 %v2557_v31  ;;  %v1750_v31 = vld [vmem:[#allocation2 + $0x8] sm:$0x8] }
  0xc8   : > { %v1176_v14 = vor.u32 %v1175_v8, %v1172_v7  ;;  %v1769_v16 = vunpack.c.l.b16 %v1750_v31 }
  0xca   : > { %v1177_v20 = vsel %vm1133_vm3, %v1167_v51, %v1176_v14  ;;  %v1770_v38 = vpack.c.b16 %v1454_v53, %v1769_v16 }
  0xcc   : > { %v1772_v45 = vrot.slane %v1770_v38, 3 }
  0xcd   : > { %797 = vmatmul.bf16.gmra.mxu1 %v3001_v30  ;;  %v1159_v30 = vsel %vm1133_vm3, %v1149_v40, %v1158_v28  ;;  %v1612_v40 = vshll.u32 %v3188_v63, 16  ;;  %v1623_v28 = vrot.slane %v1621_v25, 3 }
  0xce   : > { %917 = vmatmul.bf16.gmra.mxu2 %v844_v21  ;;  %v1774_v50 = vsel %vm1771_vm5, %v1772_v45, %v1773_v49 }
  0xcf   : > { %v1614_v12 = vrot.slane %v1612_v40, 3 }
  0xd1   : > { %v1615_v19 = vor.u32 %v1614_v12, %v1611_v46 }
  0xd3   : > { %1253 = vmatmul.bf16.gmra.mxu0 %v1159_v30  ;;  %v1616_v21 = vsel %vm1599_vm4, %v1607_v18, %v1615_v19 }
  0xd6   : > { %1091 = vmatmul.bf16.gmra.mxu3 %v1012_v29  ;;  %v1624_v29 = vor.u32 %v1623_v28, %v1620_v27  ;;  %v1424_v28 = vld [vmem:[#allocation2 + $0x30] sm:$0x3] }
  0xd8   : > { %v1625_v24 = vsel %vm1599_vm4, %v1615_v19, %v1624_v29 }
  0xdd   : > { %802 = vmatmul.bf16.gmra.mxu1 %v2968_v1  ;;  %v2556_v1 = vld [vmem:[%s3349_s4 + $0x180] sm:$0xff] }
  0xde   : > { %922 = vmatmul.bf16.gmra.mxu2 %v846_v47 }
  0xdf   : > { %1541 = vmatpush.bf16.msra.mxu2 %v2556_v1  ;;  %v1578_v1 = vld [vmem:[#allocation2 + $0x30] sm:$0x7] }
  0xe3   : > { %1258 = vmatmul.bf16.gmra.mxu0 %v1168_v54  ;;  %v1638_v54 = vrot.slane %v1636_v32, 2 }
  0xe6   : > { %1096 = vmatmul.bf16.gmra.mxu3 %v1014_v55  ;;  %v1641_v55 = vrot.slane %v1639_v52, 3 }
  0xe8   : > { %v1642_v62 = vor.u32 %v1641_v55, %v1638_v54 }
  0xed   : > { %807 = vmatmul.bf16.gmra.mxu1 %v2962_v59  ;;  %v1179_v59 = vshrl.u32 %v3095_v44, 16  ;;  %v3215_v44 = vld [vmem:[#allocation2 + $0x20] sm:$0xff] }
  0xee   : > { %927 = vmatmul.bf16.gmra.mxu2 %v848_v11  ;;  %v1627_v35 = vshrl.u32 %v3215_v44, 16  ;;  %v1630_v37 = vshll.u32 %v3215_v44, 16  ;;  %v1475_v9 = vrot.slane %v3215_v44, 2  ;;  %v1777_v17 = vrot.slane %v3215_v44, 3 }
  0xef   : > { %v1181_v15 = vrot.slane %v1179_v59, 1  ;;  %v1463_v44 = vunpack.c.l.b16 %v1424_v28 }
  0xf0   : > { %v1629_v39 = vrot.slane %v1627_v35, 2  ;;  %v1632_v41 = vrot.slane %v1630_v37, 3 }
  0xf1   : > { %v1185_v30 = vor.u32 %v1184_v26, %v1181_v15 }
  0xf2   : > { %v1633_v47 = vor.u32 %v1632_v41, %v1629_v39 }
  0xf3   : > { %1263 = vmatmul.bf16.gmra.mxu0 %v1177_v20  ;;  %v1186_v43 = vsel %vm1133_vm3, %v1176_v14, %v1185_v30  ;;  %v1779_v30 = vrot.slane %v3228_v36, 3 }
  0xf4   : > { %v1634_v51 = vsel %vm1599_vm4, %v1624_v29, %v1633_v47  ;;  %v1643_v4 = vsel %vm1599_vm4, %v1633_v47, %v1642_v62 }
  0xf5   : > { %v1780_v35 = vsel %vm1771_vm5, %v1777_v17, %v1779_v30 }
  0xf6   : > { %1714 = vmatmul.bf16.vlgmr.msrb.gmra.mxu3 %v1616_v21 }
  0xfd   : > { %812 = vmatmul.bf16.gmra.mxu1 %v3025_v56  ;;  %v1470_v56 = vrot.slane %v3177_v57, 2 }
  0xfe   : > { %932 = vmatmul.bf16.gmra.mxu2 %v3057_v22  ;;  %v1471_v22 = vrot.slane %v3188_v63, 2  ;;  %v1597_v63 = vunpack.c.l.b16 %v1578_v1 }
 0x100   : > { %v1472_v42 = vsel %vm1305_vm2, %v1470_v56, %v1471_v22  ;;  %v3242_v5 = vpack.c.b16 %v1597_v63, %v1597_v63 }
 0x102   : > { %v1645_v7 = vshrl.u32 %v3242_v5, 16  ;;  %v1781_v32 = vrot.slane %v3242_v5, 3 }
 0x103   : > { %1268 = vmatmul.bf16.gmra.mxu0 %v1186_v43 }
 0x104   : > { %v1647_v11 = vrot.slane %v1645_v7, 2  ;;  %v1782_v1 = vsel %vm1771_vm5, %v1779_v30, %v1781_v32 }
 0x106   : > { %1719 = vmatmul.bf16.gmra.mxu3 %v1625_v24 }
 0x10d   : > { %1378 = vmatmul.bf16.vlgmr.msra.gmra.mxu1 %v3068_v33  ;;  %v1473_v33 = vrot.slane %v3205_v13, 2  ;;  %v1778_v13 = vsel %vm1771_vm5, %v1775_v61, %v1777_v17 }
 0x10e   : > { %1542 = vmatmul.bf16.vlgmr.msra.gmra.mxu2 %v1472_v42 }
 0x10f   : > { %v1474_v57 = vsel %vm1305_vm2, %v1471_v22, %v1473_v33  ;;  %v1476_v12 = vsel %vm1305_vm2, %v1473_v33, %v1475_v9  ;;  %v1469_v22 = vpack.c.b16 %v1463_v44, %v1463_v44 }
 0x111   : > { %v1479_v42 = vrot.slane %v1469_v22, 2 }
 0x113   : > { %1844 = vmatmul.bf16.vlgmr.msra.gmra.mxu0 %v1774_v50 }
 0x116   : > { %1724 = vmatmul.bf16.gmra.mxu3 %v1634_v51 }
 0x11a   : > { %v3233_v53 = vpop.f32.mrf.mxu1 }
 0x11d   : > { %1383 = vmatmul.bf16.gmra.mxu1 %v3090_v48  ;;  %v1648_v48 = vshll.u32 %v3242_v5, 16 }
 0x11e   : > { %1547 = vmatmul.bf16.gmra.mxu2 %v1474_v57 }
 0x11f   : > { %v1650_v46 = vrot.slane %v1648_v48, 3 }
 0x120   : > { %v706_v34 = vpop.f32.mrf.mxu0 }
 0x121   : > { %v1651_v18 = vor.u32 %v1650_v46, %v1647_v11 }
 0x122   : > { %v3238_v2 = vpop.f32.mrf.mxu1 }
 0x123   : > { %1849 = vmatmul.bf16.gmra.mxu0 %v1776_v3  ;;  %v1652_v59 = vsel %vm1599_vm4, %v1642_v62, %v1651_v18 }
 0x126   : > { %1729 = vmatmul.bf16.gmra.mxu3 %v1643_v4 }
 0x128   : > { %v708_v8 = vpop.f32.mrf.mxu0 }
 0x129   : > { %v1077_v40 = vpop.f32.mrf.mxu3 }
 0x12a   : > { %v3247_v10 = vpop.f32.mrf.mxu1 }
 0x12d   : > { %1388 = vmatmul.bf16.gmra.mxu1 %v3100_v58  ;;  %v1477_v58 = vrot.slane %v3228_v36, 2 }
 0x12e   : > { %1552 = vmatmul.bf16.gmra.mxu2 %v1476_v12 }
 0x12f   : > { %v1478_v27 = vsel %vm1305_vm2, %v1475_v9, %v1477_v58  ;;  %v1480_v51 = vsel %vm1305_vm2, %v1477_v58, %v1479_v42 }
 0x130   : > { %v711_v19 = vpop.f32.mrf.mxu0 }
 0x131   : > { %v1079_v14 = vpop.f32.mrf.mxu3  ;;  %v3252_v20 = vpop.f32.mrf.mxu2 }
 0x132   : > { %v3254_v21 = vpop.f32.mrf.mxu1 }
 0x133   : > { %1854 = vmatmul.bf16.gmra.mxu0 %v1778_v13 }
 0x136   : > { %1734 = vmatmul.bf16.gmra.mxu3 %v1652_v59 }
 0x138   : > { %v713_v23 = vpop.f32.mrf.mxu0 }
 0x139   : > { %v1082_v60 = vpop.f32.mrf.mxu3  ;;  %v3258_v25 = vpop.f32.mrf.mxu2 }
 0x13a   : > { %v793_v15 = vpop.f32.mrf.mxu1 }
 0x13b   : > { %v794_v26 = vadd.f32 %v793_v15, %v706_v34 }
 0x13d   : > { %1393 = vmatmul.bf16.gmra.mxu1 %v3104_v0 }
 0x13e   : > { %1557 = vmatmul.bf16.gmra.mxu2 %v1478_v27 }
 0x140   : > { %v1249_v24 = vpop.f32.mrf.mxu0 }
 0x141   : > { %v1084_v29 = vpop.f32.mrf.mxu3  ;;  %v913_v43 = vpop.f32.mrf.mxu2 }
 0x142   : > { %v938_v31 = vadd.f32 %v913_v43, %v794_v26  ;;  %v795_v16 = vpop.f32.mrf.mxu1 }
 0x143   : > { %v796_v56 = vadd.f32 %v795_v16, %v708_v8  ;;  %1859 = vmatmul.bf16.gmra.mxu0 %v1780_v35 }
 0x144   : > { %v1102_v37 = vadd.f32 %v1077_v40, %v938_v31 }
 0x146   : > { %v3265_v38 = vadd.f32 %v1249_v24, %v1102_v37 }
 0x148   : > { %v1251_v41 = vpop.f32.mrf.mxu0 }
 0x149   : > { %v1087_v39 = vpop.f32.mrf.mxu3  ;;  %v915_v0 = vpop.f32.mrf.mxu2 }
 0x14a   : > { %v939_v45 = vadd.f32 %v915_v0, %v796_v56  ;;  %v798_v47 = vpop.f32.mrf.mxu1 }
 0x14b   : > { %v799_v50 = vadd.f32 %v798_v47, %v711_v19 }
 0x14c   : > { %v1103_v49 = vadd.f32 %v1079_v14, %v939_v45 }
 0x14d   : > { %1398 = vmatmul.bf16.gmra.mxu1 %v3116_v6 }
 0x14e   : > { %v3268_v36 = vadd.f32 %v1251_v41, %v1103_v49  ;;  %1562 = vmatmul.bf16.gmra.mxu2 %v1480_v51 }
 0x150   : > { %v1254_v54 = vpop.f32.mrf.mxu0 }
 0x151   : > { %v1089_v52 = vpop.f32.mrf.mxu3  ;;  %v918_v33 = vpop.f32.mrf.mxu2 }
 0x152   : > { %v940_v55 = vadd.f32 %v918_v33, %v799_v50  ;;  %v800_v57 = vpop.f32.mrf.mxu1 }
 0x153   : > { %v801_v62 = vadd.f32 %v800_v57, %v713_v23  ;;  %1864 = vmatmul.bf16.gmra.mxu0 %v1782_v1 }
 0x154   : > { %v1104_v61 = vadd.f32 %v1082_v60, %v940_v55 }
 0x156   : > { %v3273_v63 = vadd.f32 %v1254_v54, %v1104_v61 }
 0x158   : > { %v1256_v4 = vpop.f32.mrf.mxu0 }
 0x159   : > { %v1092_v34 = vpop.f32.mrf.mxu3  ;;  %v920_v3 = vpop.f32.mrf.mxu2 }
 0x15a   : > { %v941_v40 = vadd.f32 %v920_v3, %v801_v62  ;;  %v803_v6 = vpop.f32.mrf.mxu1 }
 0x15b   : > { %v804_v5 = vadd.f32 %v803_v6, %v3233_v53 }
 0x15c   : > { %v1105_v7 = vadd.f32 %v1084_v29, %v941_v40 }
 0x15e   : > { %v3276_v48 = vadd.f32 %v1256_v4, %v1105_v7 }
 0x160   : > { %v1259_v9 = vpop.f32.mrf.mxu0 }
 0x161   : > { %v923_v8 = vpop.f32.mrf.mxu2  ;;  %v1094_v11 = vpop.f32.mrf.mxu3 }
 0x162   : > { %v942_v46 = vadd.f32 %v923_v8, %v804_v5  ;;  %v805_v12 = vpop.f32.mrf.mxu1 }
 0x163   : > { %v806_v14 = vadd.f32 %v805_v12, %v3238_v2 }
 0x164   : > { %v1106_v17 = vadd.f32 %v1087_v39, %v942_v46 }
 0x166   : > { %v3279_v18 = vadd.f32 %v1259_v9, %v1106_v17  ;;  %v1881_v9 = vld [vmem:[%s3300_s9 + $0x8] sm:$0xff] }
 0x168   : > { %v1261_v13 = vpop.f32.mrf.mxu0 }
 0x169   : > { %v925_v19 = vpop.f32.mrf.mxu2  ;;  %v1097_v23 = vpop.f32.mrf.mxu3 }
 0x16a   : > { %v943_v59 = vadd.f32 %v925_v19, %v806_v14  ;;  %v808_v60 = vpop.f32.mrf.mxu1 }
 0x16b   : > { %v809_v53 = vadd.f32 %v808_v60, %v3247_v10  ;;  %v1882_v60 = vld [vmem:[%s3300_s9 + $0x10] sm:$0xff] }
 0x16c   : > { %v1107_v58 = vadd.f32 %v1089_v52, %v943_v59 }
 0x16e   : > { %v3282_v15 = vadd.f32 %v1261_v13, %v1107_v58 }
 0x170   : > { %v1264_v27 = vpop.f32.mrf.mxu0 }
 0x171   : > { %v928_v26 = vpop.f32.mrf.mxu2  ;;  %v1099_v2 = vpop.f32.mrf.mxu3 }
 0x172   : > { %v944_v28 = vadd.f32 %v928_v26, %v809_v53  ;;  %v810_v30 = vpop.f32.mrf.mxu1 }
 0x173   : > { %v811_v43 = vadd.f32 %v810_v30, %v3254_v21 }
 0x174   : > { %v1108_v29 = vadd.f32 %v1092_v34, %v944_v28  ;;  %v1880_v34 = vld [vmem:[%s3300_s9] sm:$0xff] }
 0x176   : > { %v3285_v24 = vadd.f32 %v1264_v27, %v1108_v29 }
 0x178   : > { %v1266_v31 = vpop.f32.mrf.mxu0 }
 0x179   : > { %v930_v44 = vpop.f32.mrf.mxu2  ;;  %v1715_v10 = vpop.f32.mrf.mxu3 }
 0x17a   : > { %v945_v16 = vadd.f32 %v930_v44, %v811_v43  ;;  %v813_v35 = vpop.f32.mrf.mxu1  ;;  %v1883_v43 = vld [vmem:[%s3300_s9 + $0x18] sm:$0xff] }
 0x17b   : > { %v814_v22 = vadd.f32 %v813_v35, %v3252_v20 }
 0x17c   : > { %v1109_v37 = vadd.f32 %v1094_v11, %v945_v16 }
 0x17e   : > { %v3287_v56 = vadd.f32 %v1266_v31, %v1109_v37 }
 0x180   : > { %v1269_v0 = vpop.f32.mrf.mxu0 }
 0x181   : > { %v933_v39 = vpop.f32.mrf.mxu2  ;;  %v1717_v51 = vpop.f32.mrf.mxu3 }
 0x182   : > { %v946_v41 = vadd.f32 %v933_v39, %v814_v22  ;;  %v815_v42 = vpop.f32.mrf.mxu1  ;;  %v1884_v39 = vld [vmem:[%s3300_s9 + $0x20] sm:$0xff] }
 0x183   : > { %v816_v47 = vadd.f32 %v815_v42, %v3258_v25 }
 0x184   : > { %v1110_v45 = vadd.f32 %v1097_v23, %v946_v41 }
 0x186   : > { %v3290_v21 = vadd.f32 %v1269_v0, %v1110_v45 }
 0x188   : > { %v1271_v50 = vpop.f32.mrf.mxu0 }
 0x189   : > { %v935_v49 = vpop.f32.mrf.mxu2  ;;  %v1720_v61 = vpop.f32.mrf.mxu3 }
 0x18a   : > { %v947_v32 = vadd.f32 %v935_v49, %v816_v47  ;;  %v1379_v52 = vpop.f32.mrf.mxu1 }
 0x18b   : > { %v1404_v20 = vadd.f32 %v1379_v52, %v3265_v38 }
 0x18c   : > { %v1111_v33 = vadd.f32 %v1099_v2, %v947_v32  ;;  %v1885_v32 = vld [vmem:[%s3300_s9 + $0x28] sm:$0xff] }
 0x18e   : > { %v3293_v54 = vadd.f32 %v1271_v50, %v1111_v33 }
 0x190   : > { %v1845_v57 = vpop.f32.mrf.mxu0 }
 0x191   : > { %v1543_v55 = vpop.f32.mrf.mxu2  ;;  %v1722_v11 = vpop.f32.mrf.mxu3 }
 0x192   : > { %v1568_v1 = vadd.f32 %v1543_v55, %v1404_v20  ;;  %v1381_v25 = vpop.f32.mrf.mxu1 }
 0x193   : > { %v1405_v4 = vadd.f32 %v1381_v25, %v3268_v36 }
 0x194   : > { %v1740_v62 = vadd.f32 %v1715_v10, %v1568_v1 }
 0x196   : > { %v1870_v3 = vadd.f32 %v1845_v57, %v1740_v62 }
 0x198   : > { %v1890_v38 = vadd.f32 %v1880_v34, %v1870_v3  ;;  %v1847_v6 = vpop.f32.mrf.mxu0 }
 0x199   : > { %v1545_v40 = vpop.f32.mrf.mxu2  ;;  %v1725_v58 = vpop.f32.mrf.mxu3 }
 0x19a   : > { %1900 = vst [vmem:[%s3306_s21] sm:$0xff] %v1890_v38  ;;  %v1569_v7 = vadd.f32 %v1545_v40, %v1405_v4  ;;  %v1384_v5 = vpop.f32.mrf.mxu1 }
 0x19b   : > { %v1406_v17 = vadd.f32 %v1384_v5, %v3273_v63  ;;  %v1887_v5 = vld [vmem:[%s3300_s9 + $0x38] sm:$0xff] }
 0x19c   : > { %v1741_v8 = vadd.f32 %v1717_v51, %v1569_v7 }
 0x19e   : > { %v1871_v46 = vadd.f32 %v1847_v6, %v1741_v8 }
 0x1a0   : > { %v1891_v12 = vadd.f32 %v1881_v9, %v1871_v46  ;;  %v1850_v19 = vpop.f32.mrf.mxu0 }
 0x1a1   : > { %v1548_v14 = vpop.f32.mrf.mxu2  ;;  %v1727_v10 = vpop.f32.mrf.mxu3 }
 0x1a2   : > { %1901 = vst [vmem:[%s3306_s21 + $0x8] sm:$0xff] %v1891_v12  ;;  %v1570_v13 = vadd.f32 %v1548_v14, %v1406_v17  ;;  %v1386_v36 = vpop.f32.mrf.mxu1 }
 0x1a3   : > { %v1407_v26 = vadd.f32 %v1386_v36, %v3276_v48 }
 0x1a4   : > { %v1742_v59 = vadd.f32 %v1720_v61, %v1570_v13  ;;  %v1886_v61 = vld [vmem:[%s3300_s9 + $0x30] sm:$0xff] }
 0x1a6   : > { %v1872_v23 = vadd.f32 %v1850_v19, %v1742_v59  ;;  %v1888_v19 = vld [vmem:[%s3300_s9 + $0x40] sm:$0xff] }
 0x1a8   : > { %v1892_v53 = vadd.f32 %v1882_v60, %v1872_v23  ;;  %v1852_v28 = vpop.f32.mrf.mxu0 }
 0x1a9   : > { %v1550_v27 = vpop.f32.mrf.mxu2  ;;  %v1730_v51 = vpop.f32.mrf.mxu3 }
 0x1aa   : > { %1902 = vst [vmem:[%s3306_s21 + $0x10] sm:$0xff] %v1892_v53  ;;  %v1571_v30 = vadd.f32 %v1550_v27, %v1407_v26  ;;  %v1389_v63 = vpop.f32.mrf.mxu1  ;;  %v1889_v27 = vld [vmem:[%s3300_s9 + $0x48] sm:$0xff] }
 0x1ab   : > { %v1408_v31 = vadd.f32 %v1389_v63, %v3279_v18 }
 0x1ac   : > { %v1743_v29 = vadd.f32 %v1722_v11, %v1571_v30 }
 0x1ae   : > { %v1873_v2 = vadd.f32 %v1852_v28, %v1743_v29 }
 0x1b0   : > { %v1893_v44 = vadd.f32 %v1883_v43, %v1873_v2  ;;  %v1855_v35 = vpop.f32.mrf.mxu0 }
 0x1b1   : > { %v1553_v16 = vpop.f32.mrf.mxu2  ;;  %v1732_v34 = vpop.f32.mrf.mxu3 }
 0x1b2   : > { %1903 = vst [vmem:[%s3306_s21 + $0x18] sm:$0xff] %v1893_v44  ;;  %v1572_v37 = vadd.f32 %v1553_v16, %v1408_v31  ;;  %v1391_v48 = vpop.f32.mrf.mxu1 }
 0x1b3   : > { %v1409_v42 = vadd.f32 %v1391_v48, %v3282_v15 }
 0x1b4   : > { %v1744_v22 = vadd.f32 %v1725_v58, %v1572_v37 }
 0x1b6   : > { %v1874_v0 = vadd.f32 %v1855_v35, %v1744_v22 }
 0x1b8   : > { %v1894_v41 = vadd.f32 %v1884_v39, %v1874_v0  ;;  %v1857_v47 = vpop.f32.mrf.mxu0 }
 0x1b9   : > { %v1555_v45 = vpop.f32.mrf.mxu2  ;;  %v1735_v46 = vpop.f32.mrf.mxu3 }
 0x1ba   : > { %1904 = vst [vmem:[%s3306_s21 + $0x20] sm:$0xff] %v1894_v41  ;;  %v1573_v49 = vadd.f32 %v1555_v45, %v1409_v42  ;;  %v1394_v18 = vpop.f32.mrf.mxu1 }
 0x1bb   : > { %v1410_v20 = vadd.f32 %v1394_v18, %v3285_v24 }
 0x1bc   : > { %v1745_v50 = vadd.f32 %v1727_v10, %v1573_v49 }
 0x1be   : > { %v1875_v52 = vadd.f32 %v1857_v47, %v1745_v50 }
 0x1c0   : > { %v1895_v33 = vadd.f32 %v1885_v32, %v1875_v52  ;;  %v1860_v57 = vpop.f32.mrf.mxu0 }
 0x1c1   : > { %v1558_v55 = vpop.f32.mrf.mxu2  ;;  %v1737_v53 = vpop.f32.mrf.mxu3 }
 0x1c2   : > { %1905 = vst [vmem:[%s3306_s21 + $0x28] sm:$0xff] %v1895_v33  ;;  %v1574_v1 = vadd.f32 %v1558_v55, %v1410_v20  ;;  %v1396_v15 = vpop.f32.mrf.mxu1 }
 0x1c3   : > { %v1411_v38 = vadd.f32 %v1396_v15, %v3287_v56 }
 0x1c4   : > { %v1746_v25 = vadd.f32 %v1730_v51, %v1574_v1 }
 0x1c6   : > { %v1876_v62 = vadd.f32 %v1860_v57, %v1746_v25 }
 0x1c8   : > { %v1896_v3 = vadd.f32 %v1886_v61, %v1876_v62  ;;  %v1862_v40 = vpop.f32.mrf.mxu0 }
 0x1c9   : > { %v1560_v4 = vpop.f32.mrf.mxu2 }
 0x1ca   : > { %1906 = vst [vmem:[%s3306_s21 + $0x30] sm:$0xff] %v1896_v3  ;;  %v1575_v6 = vadd.f32 %v1560_v4, %v1411_v38  ;;  %v1399_v24 = vpop.f32.mrf.mxu1 }
 0x1cb   : > { %v1412_v11 = vadd.f32 %v1399_v24, %v3290_v21 }
 0x1cc   : > { %v1747_v7 = vadd.f32 %v1732_v34, %v1575_v6 }
 0x1ce   : > { %v1877_v8 = vadd.f32 %v1862_v40, %v1747_v7 }
 0x1d0   : > { %v1897_v9 = vadd.f32 %v1887_v5, %v1877_v8  ;;  %v1865_v14 = vpop.f32.mrf.mxu0 }
 0x1d1   : > { %v1563_v12 = vpop.f32.mrf.mxu2 }
 0x1d2   : > { %1907 = vst [vmem:[%s3306_s21 + $0x38] sm:$0xff] %v1897_v9  ;;  %v1576_v17 = vadd.f32 %v1563_v12, %v1412_v11  ;;  %v1401_v13 = vpop.f32.mrf.mxu1 }
 0x1d3   : > { %v1413_v60 = vadd.f32 %v1401_v13, %v3293_v54 }
 0x1d4   : > { %v1748_v56 = vadd.f32 %v1735_v46, %v1576_v17 }
 0x1d6   : > { %v1878_v36 = vadd.f32 %v1865_v14, %v1748_v56 }
 0x1d8   : > { %v1898_v59 = vadd.f32 %v1888_v19, %v1878_v36  ;;  %v1867_v21 = vpop.f32.mrf.mxu0 }
 0x1d9   : > { %v1565_v23 = vpop.f32.mrf.mxu2 }
 0x1da   : > { %1908 = vst [vmem:[%s3306_s21 + $0x40] sm:$0xff] %v1898_v59  ;;  %v1577_v58 = vadd.f32 %v1565_v23, %v1413_v60 }
 0x1dc   : > { %v1749_v26 = vadd.f32 %v1737_v53, %v1577_v58 }
 0x1de   : > { %v1879_v28 = vadd.f32 %v1867_v21, %v1749_v26 }
 0x1e0   : > { %v1899_v30 = vadd.f32 %v1889_v27, %v1879_v28 }
 0x1e2   : > { %1909 = vst [vmem:[%s3306_s21 + $0x48] sm:$0xff] %v1899_v30 }
 0x1e3 PF: > { %s16_s23 = sadd.s32 1, %s2698_s23   ;;  %s3352_s21 = smov %s2694_s22 }
 0x1e4   : > { %p13_p5 = scmp.ge.s32.totalorder %s16_s23, 4   ;;  %s3353_s22 = smov %s3355_s24 }
 0x1e6   :  { %15 = sbr.rel (!%p13_p5) target bundleno = 2 (0x2), region = 92 }

</bundles_post_ra>
